<compile_context>
chip_gen: v7x
topology: tpu7x:2x2x1
jax: 0.10.0
libtpu: 0.0.40
codegen_flags: <defaults>
</compile_context>

<pallas_src>
import math
import jax
import jax.numpy as jnp
from jax.experimental import pallas as pl
from jax.experimental.pallas import tpu as pltpu

N_HEADS = 12          # hardcoded in CLIPLayer(12, d_embed)
N_LAYERS = 12
LN_EPS = 1e-5
NEG_BIG = -1e30       # finite "-inf" for the causal mask


# ----------------------------- kernel helpers ------------------------------

def _layer_norm(x, g, b):
    # x: (R, D) f32, g/b: (1, D) f32
    mu = jnp.mean(x, axis=-1, keepdims=True)
    xc = x - mu
    var = jnp.mean(xc * xc, axis=-1, keepdims=True)
    return xc * jax.lax.rsqrt(var + LN_EPS) * g + b


# ------------------------------ fused kernel --------------------------------

def clip_fused_kernel(tok_ref, pos_ref, mask_ref,
                      ln1g_ref, ln1b_ref,
                      wq_ref, bq_ref, wk_ref, bk_ref, wv_ref, bv_ref,
                      wo_ref, bo_ref,
                      ln2g_ref, ln2b_ref,
                      w1_ref, b1_ref, w2_ref, b2_ref,
                      lnfg_ref, lnfb_ref,
                      o_ref,
                      act_ref, attn_ref):
    layer = pl.program_id(0)
    n_layers = pl.num_programs(0)

    B, S, D = tok_ref.shape
    BS = B * S
    dh = D // N_HEADS
    scale = 1.0 / math.sqrt(dh)

    # ---- step 0: token-embedding + positional embedding into resident scratch
    @pl.when(layer == 0)
    def _():
        x0 = tok_ref[...] + pos_ref[...][None, :, :]         # (B, S, D)
        act_ref[...] = x0.reshape(BS, D)

    x = act_ref[...]                                          # (BS, D) f32

    # ---- attention block (pre-LN, causal) ----------------------------------
    xn = _layer_norm(x, ln1g_ref[0], ln1b_ref[0])
    xb = xn.astype(jnp.bfloat16)
    q = jnp.dot(xb, wq_ref[0], preferred_element_type=jnp.float32) + bq_ref[0]
    k = jnp.dot(xb, wk_ref[0], preferred_element_type=jnp.float32) + bk_ref[0]
    v = jnp.dot(xb, wv_ref[0], preferred_element_type=jnp.float32) + bv_ref[0]
    q = q * scale                                             # fold 1/sqrt(dh)

    bias = mask_ref[...][None, :, :]                          # (1, S, S) additive

    # Per-head attention, batched over B with a single-batch-dim contraction.
    # TODO(synk): a single (B*H)-batched contraction would need a lane-splitting
    # reshape + major-dim transpose that Mosaic may not lower; keep the head
    # loop but fold the batch and avoid the concat by writing into scratch.
    for h in range(N_HEADS):
        sl = slice(h * dh, (h + 1) * dh)
        qh = q[:, sl].reshape(B, S, dh).astype(jnp.bfloat16)
        kh = k[:, sl].reshape(B, S, dh).astype(jnp.bfloat16)
        vh = v[:, sl].reshape(B, S, dh).astype(jnp.bfloat16)
        s = jnp.einsum('bqd,bkd->bqk', qh, kh,
                       preferred_element_type=jnp.float32) + bias   # (B, S, S)
        m = jnp.max(s, axis=-1, keepdims=True)
        e = jnp.exp(s - m)
        p = e * pl.reciprocal(jnp.sum(e, axis=-1, keepdims=True), approx=True)
        oh = jnp.einsum('bqk,bkd->bqd', p.astype(jnp.bfloat16), vh,
                        preferred_element_type=jnp.float32)         # (B, S, dh)
        attn_ref[:, sl] = oh.reshape(BS, dh)

    attn = jnp.dot(attn_ref[...].astype(jnp.bfloat16), wo_ref[0],
                   preferred_element_type=jnp.float32) + bo_ref[0]
    x = x + attn

    # ---- MLP block (QuickGELU) ----------------------------------------------
    xn = _layer_norm(x, ln2g_ref[0], ln2b_ref[0])
    h1 = jnp.dot(xn.astype(jnp.bfloat16), w1_ref[0],
                 preferred_element_type=jnp.float32) + b1_ref[0]
    h1 = h1 * (1.0 / (1.0 + jnp.exp(-1.702 * h1)))
    h2 = jnp.dot(h1.astype(jnp.bfloat16), w2_ref[0],
                 preferred_element_type=jnp.float32) + b2_ref[0]
    x = x + h2
    act_ref[...] = x

    # ---- last step: final LayerNorm + single HBM write ----------------------
    @pl.when(layer == n_layers - 1)
    def _():
        y = _layer_norm(act_ref[...], lnfg_ref[...], lnfb_ref[...])
        o_ref[...] = y.reshape(B, S, D)


# ------------------------------ JAX wrapper ---------------------------------

_LAYER_PARAM_ORDER = ("ln1_g", "ln1_b", "wq", "bq", "wk", "bk", "wv", "bv",
                      "wo", "bo", "ln2_g", "ln2_b", "w1", "b1", "w2", "b2")


def clip_forward(tokens, params):
    tokens = tokens.astype(jnp.int32)
    # TODO(synk): token-embedding gather stays in plain JAX (jnp.take); a
    # data-dependent row gather inside the fused kernel needs per-row DMA.
    tok = jnp.take(params["tok_emb"], tokens, axis=0)        # (B, S, D) f32
    pos = params["pos_emb"]                                  # (S, D) f32
    B, S, D = tok.shape

    # additive causal bias (built once, loaded once into VMEM)
    row = jnp.arange(S)[:, None]
    col = jnp.arange(S)[None, :]
    mask_bias = jnp.where(col > row, NEG_BIG, 0.0).astype(jnp.float32)  # (S, S)

    lp = params["layers"]                                    # stacked (L, ...) arrays
    layer_args = [lp[name] for name in _LAYER_PARAM_ORDER]

    def lspec(arr):
        block = (1,) + arr.shape[1:]
        nz = arr.ndim - 1
        return pl.BlockSpec(block, lambda l, nz=nz: (l,) + (0,) * nz)

    def fspec(arr):
        nd = arr.ndim
        return pl.BlockSpec(arr.shape, lambda l, nd=nd: (0,) * nd)

    in_specs = ([fspec(tok), fspec(pos), fspec(mask_bias)]
                + [lspec(a) for a in layer_args]
                + [fspec(params["ln_f_g"]), fspec(params["ln_f_b"])])

    return pl.pallas_call(
        clip_fused_kernel,
        out_shape=jax.ShapeDtypeStruct((B, S, D), jnp.float32),
        grid=(N_LAYERS,),
        in_specs=in_specs,
        out_specs=pl.BlockSpec((B, S, D), lambda l: (0, 0, 0)),
        scratch_shapes=[pltpu.VMEM((B * S, D), jnp.float32),   # resident activation
                        pltpu.VMEM((B * S, D), jnp.float32)],  # per-layer attn assembly
        compiler_params=pltpu.CompilerParams(
            dimension_semantics=("arbitrary",)),
    )(tok, pos, mask_bias, *layer_args,
      params["ln_f_g"], params["ln_f_b"])


# ------------------------------ param init ----------------------------------

def init_params(key, vocab_size, d_embed, seq_length, n_layers=N_LAYERS):
    D = d_embed

    def nrm(k, shape, dtype=jnp.float32, scale=0.02):
        return (scale * jax.random.normal(k, shape, jnp.float32)).astype(dtype)

    keys = jax.random.split(key, 3)
    lk = jax.random.split(keys[1], 10)

    layers = {
        "ln1_g": jnp.ones((n_layers, 1, D), jnp.float32),
        "ln1_b": jnp.zeros((n_layers, 1, D), jnp.float32),
        "wq": nrm(lk[0], (n_layers, D, D), jnp.bfloat16),
        "bq": nrm(lk[1], (n_layers, 1, D)),
        "wk": nrm(lk[2], (n_layers, D, D), jnp.bfloat16),
        "bk": nrm(lk[3], (n_layers, 1, D)),
        "wv": nrm(lk[4], (n_layers, D, D), jnp.bfloat16),
        "bv": nrm(lk[5], (n_layers, 1, D)),
        "wo": nrm(lk[6], (n_layers, D, D), jnp.bfloat16),
        "bo": nrm(lk[7], (n_layers, 1, D)),
        "ln2_g": jnp.ones((n_layers, 1, D), jnp.float32),
        "ln2_b": jnp.zeros((n_layers, 1, D), jnp.float32),
        "w1": nrm(lk[8], (n_layers, D, 4 * D), jnp.bfloat16),
        "b1": jnp.zeros((n_layers, 1, 4 * D), jnp.float32),
        "w2": nrm(lk[9], (n_layers, 4 * D, D), jnp.bfloat16),
        "b2": jnp.zeros((n_layers, 1, D), jnp.float32),
    }
    return {
        "tok_emb": nrm(keys[0], (vocab_size, D)),
        # matches the PyTorch module: nn.Parameter(torch.zeros(seq_length, d_embed))
        "pos_emb": jnp.zeros((seq_length, D), jnp.float32),
        "ln_f_g": jnp.ones((1, D), jnp.float32),
        "ln_f_b": jnp.zeros((1, D), jnp.float32),
        "layers": layers,
    }


# --------------------------------- main --------------------------------------

if __name__ == "__main__":
    VOCAB = 64
    D_EMBED = 96        # divisible by the hardcoded 12 heads -> d_head = 8
    SEQ = 8
    BATCH = 2

    root = jax.random.PRNGKey(0)
    pkey, tkey = jax.random.split(root)
    params = init_params(pkey, VOCAB, D_EMBED, SEQ)
    tokens = jax.random.randint(tkey, (BATCH, SEQ), 0, VOCAB, dtype=jnp.int32)

    out = jax.block_until_ready(clip_forward(tokens, params))
    assert out.shape == (BATCH, SEQ, D_EMBED) and out.dtype == jnp.float32
    assert bool(jnp.all(jnp.isfinite(out)))
    print("KERNEL_OK")
</pallas_src>

<mosaic_0001>
module attributes {stable_mosaic.version = 11 : i64} {
  func.func @clip_fused_kernel(%arg0: i32, %arg1: memref<2x8x96xf32, #tpu.memory_space<vmem>>, %arg2: memref<8x96xf32, #tpu.memory_space<vmem>>, %arg3: memref<8x8xf32, #tpu.memory_space<vmem>>, %arg4: memref<1x1x96xf32, #tpu.memory_space<vmem>>, %arg5: memref<1x1x96xf32, #tpu.memory_space<vmem>>, %arg6: memref<1x96x96xbf16, #tpu.memory_space<vmem>>, %arg7: memref<1x1x96xf32, #tpu.memory_space<vmem>>, %arg8: memref<1x96x96xbf16, #tpu.memory_space<vmem>>, %arg9: memref<1x1x96xf32, #tpu.memory_space<vmem>>, %arg10: memref<1x96x96xbf16, #tpu.memory_space<vmem>>, %arg11: memref<1x1x96xf32, #tpu.memory_space<vmem>>, %arg12: memref<1x96x96xbf16, #tpu.memory_space<vmem>>, %arg13: memref<1x1x96xf32, #tpu.memory_space<vmem>>, %arg14: memref<1x1x96xf32, #tpu.memory_space<vmem>>, %arg15: memref<1x1x96xf32, #tpu.memory_space<vmem>>, %arg16: memref<1x96x384xbf16, #tpu.memory_space<vmem>>, %arg17: memref<1x1x384xf32, #tpu.memory_space<vmem>>, %arg18: memref<1x384x96xbf16, #tpu.memory_space<vmem>>, %arg19: memref<1x1x96xf32, #tpu.memory_space<vmem>>, %arg20: memref<1x96xf32, #tpu.memory_space<vmem>>, %arg21: memref<1x96xf32, #tpu.memory_space<vmem>>, %arg22: memref<2x8x96xf32, #tpu.memory_space<vmem>>, %arg23: memref<16x96xf32, #tpu.memory_space<vmem>>, %arg24: memref<16x96xf32, #tpu.memory_space<vmem>>) attributes {dimension_semantics = [#tpu.dimension_semantics<arbitrary>], iteration_bounds = array<i64: 12>, scalar_prefetch = 0 : i64, scratch_operands = 2 : i64, tpu.core_type = #tpu.core_type<tc>, window_params = [{pipeline_mode = #tpu.pipeline_mode<synchronous>, transform_indices = @transform_0, window_bounds = array<i64: 2, 8, 96>}, {pipeline_mode = #tpu.pipeline_mode<synchronous>, transform_indices = @transform_1, window_bounds = array<i64: 8, 96>}, {pipeline_mode = #tpu.pipeline_mode<synchronous>, transform_indices = @transform_2, window_bounds = array<i64: 8, 8>}, {transform_indices = @transform_3, window_bounds = array<i64: 1, 1, 96>}, {transform_indices = @transform_4, window_bounds = array<i64: 1, 1, 96>}, {transform_indices = @transform_5, window_bounds = array<i64: 1, 96, 96>}, {transform_indices = @transform_6, window_bounds = array<i64: 1, 1, 96>}, {transform_indices = @transform_7, window_bounds = array<i64: 1, 96, 96>}, {transform_indices = @transform_8, window_bounds = array<i64: 1, 1, 96>}, {transform_indices = @transform_9, window_bounds = array<i64: 1, 96, 96>}, {transform_indices = @transform_10, window_bounds = array<i64: 1, 1, 96>}, {transform_indices = @transform_11, window_bounds = array<i64: 1, 96, 96>}, {transform_indices = @transform_12, window_bounds = array<i64: 1, 1, 96>}, {transform_indices = @transform_13, window_bounds = array<i64: 1, 1, 96>}, {transform_indices = @transform_14, window_bounds = array<i64: 1, 1, 96>}, {transform_indices = @transform_15, window_bounds = array<i64: 1, 96, 384>}, {transform_indices = @transform_16, window_bounds = array<i64: 1, 1, 384>}, {transform_indices = @transform_17, window_bounds = array<i64: 1, 384, 96>}, {transform_indices = @transform_18, window_bounds = array<i64: 1, 1, 96>}, {pipeline_mode = #tpu.pipeline_mode<synchronous>, transform_indices = @transform_19, window_bounds = array<i64: 1, 96>}, {pipeline_mode = #tpu.pipeline_mode<synchronous>, transform_indices = @transform_20, window_bounds = array<i64: 1, 96>}, {pipeline_mode = #tpu.pipeline_mode<synchronous>, transform_indices = @transform_21, window_bounds = array<i64: 2, 8, 96>}]} {
    %c0_i32 = arith.constant 0 : i32
    %0 = arith.cmpi eq, %arg0, %c0_i32 : i32
    %1 = arith.extui %0 : i1 to i32
    %c0_i32_0 = arith.constant 0 : i32
    %2 = arith.cmpi ne, %1, %c0_i32_0 : i32
    scf.if %2 {
      %c0_137 = arith.constant 0 : index
      %c0_138 = arith.constant 0 : index
      %c0_139 = arith.constant 0 : index
      %429 = vector.load %arg1[%c0_137, %c0_138, %c0_139] : memref<2x8x96xf32, #tpu.memory_space<vmem>>, vector<2x8x96xf32>
      %c0_140 = arith.constant 0 : index
      %c0_141 = arith.constant 0 : index
      %430 = vector.load %arg2[%c0_140, %c0_141] : memref<8x96xf32, #tpu.memory_space<vmem>>, vector<8x96xf32>
      %431 = vector.shape_cast %430 : vector<8x96xf32> to vector<1x8x96xf32>
      %432 = vector.broadcast %431 : vector<1x8x96xf32> to vector<2x8x96xf32>
      %433 = arith.addf %429, %432 : vector<2x8x96xf32>
      %434 = vector.shape_cast %433 : vector<2x8x96xf32> to vector<16x96xf32>
      %c0_142 = arith.constant 0 : index
      %c0_143 = arith.constant 0 : index
      %435 = vector.load %arg23[%c0_142, %c0_143] : memref<16x96xf32, #tpu.memory_space<vmem>>, vector<16x96xf32>
      tpu.vector_store %arg23[%c0_142, %c0_143], %434 {strides = array<i32>} : memref<16x96xf32, #tpu.memory_space<vmem>>, vector<16x96xf32>,
    } else {
    }
    %c0 = arith.constant 0 : index
    %c0_1 = arith.constant 0 : index
    %3 = vector.load %arg23[%c0, %c0_1] : memref<16x96xf32, #tpu.memory_space<vmem>>, vector<16x96xf32>
    %c0_2 = arith.constant 0 : index
    %c0_3 = arith.constant 0 : index
    %c0_4 = arith.constant 0 : index
    %4 = vector.load %arg4[%c0_2, %c0_3, %c0_4] : memref<1x1x96xf32, #tpu.memory_space<vmem>>, vector<1x1x96xf32>
    %5 = vector.shape_cast %4 : vector<1x1x96xf32> to vector<1x96xf32>
    %c0_5 = arith.constant 0 : index
    %c0_6 = arith.constant 0 : index
    %c0_7 = arith.constant 0 : index
    %6 = vector.load %arg5[%c0_5, %c0_6, %c0_7] : memref<1x1x96xf32, #tpu.memory_space<vmem>>, vector<1x1x96xf32>
    %7 = vector.shape_cast %6 : vector<1x1x96xf32> to vector<1x96xf32>
    %cst = arith.constant dense<0.000000e+00> : vector<16xf32>
    %8 = vector.multi_reduction <add>, %3, %cst [1] : vector<16x96xf32> to vector<16xf32>
    %9 = vector.shape_cast %8 : vector<16xf32> to vector<16x1xf32>
    %cst_8 = arith.constant 9.600000e+01 : f32
    %10 = vector.broadcast %cst_8 : f32 to vector<16x1xf32>
    %11 = arith.divf %9, %10 : vector<16x1xf32>
    %12 = vector.broadcast %11 : vector<16x1xf32> to vector<16x96xf32>
    %13 = arith.subf %3, %12 : vector<16x96xf32>
    %14 = arith.mulf %13, %13 : vector<16x96xf32>
    %cst_9 = arith.constant dense<0.000000e+00> : vector<16xf32>
    %15 = vector.multi_reduction <add>, %14, %cst_9 [1] : vector<16x96xf32> to vector<16xf32>
    %16 = vector.shape_cast %15 : vector<16xf32> to vector<16x1xf32>
    %cst_10 = arith.constant 9.600000e+01 : f32
    %17 = vector.broadcast %cst_10 : f32 to vector<16x1xf32>
    %18 = arith.divf %16, %17 : vector<16x1xf32>
    %cst_11 = arith.constant 9.99999974E-6 : f32
    %19 = vector.broadcast %cst_11 : f32 to vector<16x1xf32>
    %20 = arith.addf %18, %19 : vector<16x1xf32>
    %21 = math.rsqrt %20 : vector<16x1xf32>
    %22 = vector.broadcast %21 : vector<16x1xf32> to vector<16x96xf32>
    %23 = arith.mulf %13, %22 : vector<16x96xf32>
    %24 = vector.broadcast %5 : vector<1x96xf32> to vector<16x96xf32>
    %25 = arith.mulf %23, %24 : vector<16x96xf32>
    %26 = vector.broadcast %7 : vector<1x96xf32> to vector<16x96xf32>
    %27 = arith.addf %25, %26 : vector<16x96xf32>
    %28 = arith.truncf %27 : vector<16x96xf32> to vector<16x96xbf16>
    %c0_12 = arith.constant 0 : index
    %c0_13 = arith.constant 0 : index
    %c0_14 = arith.constant 0 : index
    %29 = vector.load %arg6[%c0_12, %c0_13, %c0_14] : memref<1x96x96xbf16, #tpu.memory_space<vmem>>, vector<1x96x96xbf16>
    %30 = vector.shape_cast %29 : vector<1x96x96xbf16> to vector<96x96xbf16>
    %cst_15 = arith.constant dense<0.000000e+00> : vector<16x96xf32>
    %31 = tpu.matmul %28, %30, %cst_15 {dimension_numbers = #tpu.dot_dimension_numbers<[1], [0], [0], [1], [0, 0, 1, 1], [], []>} : vector<16x96xbf16>, vector<96x96xbf16>, vector<16x96xf32> -> vector<16x96xf32>
    %c0_16 = arith.constant 0 : index
    %c0_17 = arith.constant 0 : index
    %c0_18 = arith.constant 0 : index
    %32 = vector.load %arg7[%c0_16, %c0_17, %c0_18] : memref<1x1x96xf32, #tpu.memory_space<vmem>>, vector<1x1x96xf32>
    %33 = vector.shape_cast %32 : vector<1x1x96xf32> to vector<1x96xf32>
    %34 = vector.broadcast %33 : vector<1x96xf32> to vector<16x96xf32>
    %35 = arith.addf %31, %34 : vector<16x96xf32>
    %c0_19 = arith.constant 0 : index
    %c0_20 = arith.constant 0 : index
    %c0_21 = arith.constant 0 : index
    %36 = vector.load %arg8[%c0_19, %c0_20, %c0_21] : memref<1x96x96xbf16, #tpu.memory_space<vmem>>, vector<1x96x96xbf16>
    %37 = vector.shape_cast %36 : vector<1x96x96xbf16> to vector<96x96xbf16>
    %cst_22 = arith.constant dense<0.000000e+00> : vector<16x96xf32>
    %38 = tpu.matmul %28, %37, %cst_22 {dimension_numbers = #tpu.dot_dimension_numbers<[1], [0], [0], [1], [0, 0, 1, 1], [], []>} : vector<16x96xbf16>, vector<96x96xbf16>, vector<16x96xf32> -> vector<16x96xf32>
    %c0_23 = arith.constant 0 : index
    %c0_24 = arith.constant 0 : index
    %c0_25 = arith.constant 0 : index
    %39 = vector.load %arg9[%c0_23, %c0_24, %c0_25] : memref<1x1x96xf32, #tpu.memory_space<vmem>>, vector<1x1x96xf32>
    %40 = vector.shape_cast %39 : vector<1x1x96xf32> to vector<1x96xf32>
    %41 = vector.broadcast %40 : vector<1x96xf32> to vector<16x96xf32>
    %42 = arith.addf %38, %41 : vector<16x96xf32>
    %c0_26 = arith.constant 0 : index
    %c0_27 = arith.constant 0 : index
    %c0_28 = arith.constant 0 : index
    %43 = vector.load %arg10[%c0_26, %c0_27, %c0_28] : memref<1x96x96xbf16, #tpu.memory_space<vmem>>, vector<1x96x96xbf16>
    %44 = vector.shape_cast %43 : vector<1x96x96xbf16> to vector<96x96xbf16>
    %cst_29 = arith.constant dense<0.000000e+00> : vector<16x96xf32>
    %45 = tpu.matmul %28, %44, %cst_29 {dimension_numbers = #tpu.dot_dimension_numbers<[1], [0], [0], [1], [0, 0, 1, 1], [], []>} : vector<16x96xbf16>, vector<96x96xbf16>, vector<16x96xf32> -> vector<16x96xf32>
    %c0_30 = arith.constant 0 : index
    %c0_31 = arith.constant 0 : index
    %c0_32 = arith.constant 0 : index
    %46 = vector.load %arg11[%c0_30, %c0_31, %c0_32] : memref<1x1x96xf32, #tpu.memory_space<vmem>>, vector<1x1x96xf32>
    %47 = vector.shape_cast %46 : vector<1x1x96xf32> to vector<1x96xf32>
    %48 = vector.broadcast %47 : vector<1x96xf32> to vector<16x96xf32>
    %49 = arith.addf %45, %48 : vector<16x96xf32>
    %cst_33 = arith.constant 0.353553385 : f32
    %50 = vector.broadcast %cst_33 : f32 to vector<16x96xf32>
    %51 = arith.mulf %35, %50 : vector<16x96xf32>
    %c0_34 = arith.constant 0 : index
    %c0_35 = arith.constant 0 : index
    %52 = vector.load %arg3[%c0_34, %c0_35] : memref<8x8xf32, #tpu.memory_space<vmem>>, vector<8x8xf32>
    %53 = vector.shape_cast %52 : vector<8x8xf32> to vector<1x8x8xf32>
    %54 = vector.extract_strided_slice %51 {offsets = [0, 0], sizes = [16, 8], strides = [1, 1]} : vector<16x96xf32> to vector<16x8xf32>
    %55 = vector.shape_cast %54 : vector<16x8xf32> to vector<2x8x8xf32>
    %56 = arith.truncf %55 : vector<2x8x8xf32> to vector<2x8x8xbf16>
    %57 = vector.extract_strided_slice %42 {offsets = [0, 0], sizes = [16, 8], strides = [1, 1]} : vector<16x96xf32> to vector<16x8xf32>
    %58 = vector.shape_cast %57 : vector<16x8xf32> to vector<2x8x8xf32>
    %59 = arith.truncf %58 : vector<2x8x8xf32> to vector<2x8x8xbf16>
    %60 = vector.extract_strided_slice %49 {offsets = [0, 0], sizes = [16, 8], strides = [1, 1]} : vector<16x96xf32> to vector<16x8xf32>
    %61 = vector.shape_cast %60 : vector<16x8xf32> to vector<2x8x8xf32>
    %62 = arith.truncf %61 : vector<2x8x8xf32> to vector<2x8x8xbf16>
    "tpu.trace_start"() <{level = 10 : i32, message = "bqd,bkd->bqk"}> : () -> ()
    %cst_36 = arith.constant dense<0.000000e+00> : vector<2x8x8xf32>
    %63 = tpu.matmul %56, %59, %cst_36 {dimension_numbers = #tpu.dot_dimension_numbers<[2], [2], [1], [1], [0, 0, 0, 1, 1, 1], [0], [0]>} : vector<2x8x8xbf16>, vector<2x8x8xbf16>, vector<2x8x8xf32> -> vector<2x8x8xf32>
    "tpu.trace_stop"() : () -> ()
    %64 = vector.broadcast %53 : vector<1x8x8xf32> to vector<2x8x8xf32>
    %65 = arith.addf %63, %64 : vector<2x8x8xf32>
    %cst_37 = arith.constant dense<0xFF800000> : vector<2x8xf32>
    %66 = vector.multi_reduction <maximumf>, %65, %cst_37 [2] : vector<2x8x8xf32> to vector<2x8xf32>
    %67 = vector.shape_cast %66 : vector<2x8xf32> to vector<2x8x1xf32>
    %68 = vector.broadcast %67 : vector<2x8x1xf32> to vector<2x8x8xf32>
    %69 = arith.subf %65, %68 : vector<2x8x8xf32>
    %70 = math.exp %69 : vector<2x8x8xf32>
    %cst_38 = arith.constant dense<0.000000e+00> : vector<2x8xf32>
    %71 = vector.multi_reduction <add>, %70, %cst_38 [2] : vector<2x8x8xf32> to vector<2x8xf32>
    %72 = vector.shape_cast %71 : vector<2x8xf32> to vector<2x8x1xf32>
    %73 = tpu.reciprocal %72 {approx = true} : vector<2x8x1xf32> -> vector<2x8x1xf32>
    %74 = vector.broadcast %73 : vector<2x8x1xf32> to vector<2x8x8xf32>
    %75 = arith.mulf %70, %74 : vector<2x8x8xf32>
    %76 = arith.truncf %75 : vector<2x8x8xf32> to vector<2x8x8xbf16>
    "tpu.trace_start"() <{level = 10 : i32, message = "bqk,bkd->bqd"}> : () -> ()
    %cst_39 = arith.constant dense<0.000000e+00> : vector<2x8x8xf32>
    %77 = tpu.matmul %76, %62, %cst_39 {dimension_numbers = #tpu.dot_dimension_numbers<[2], [1], [1], [2], [0, 0, 0, 1, 1, 2], [0], [0]>} : vector<2x8x8xbf16>, vector<2x8x8xbf16>, vector<2x8x8xf32> -> vector<2x8x8xf32>
    "tpu.trace_stop"() : () -> ()
    %78 = vector.shape_cast %77 : vector<2x8x8xf32> to vector<16x8xf32>
    %c0_40 = arith.constant 0 : index
    %c0_41 = arith.constant 0 : index
    %79 = vector.load %arg24[%c0_40, %c0_41] : memref<16x96xf32, #tpu.memory_space<vmem>>, vector<16x8xf32>
    tpu.vector_store %arg24[%c0_40, %c0_41], %78 {strides = array<i32>} : memref<16x96xf32, #tpu.memory_space<vmem>>, vector<16x8xf32>,
    %80 = vector.extract_strided_slice %51 {offsets = [0, 8], sizes = [16, 8], strides = [1, 1]} : vector<16x96xf32> to vector<16x8xf32>
    %81 = vector.shape_cast %80 : vector<16x8xf32> to vector<2x8x8xf32>
    %82 = arith.truncf %81 : vector<2x8x8xf32> to vector<2x8x8xbf16>
    %83 = vector.extract_strided_slice %42 {offsets = [0, 8], sizes = [16, 8], strides = [1, 1]} : vector<16x96xf32> to vector<16x8xf32>
    %84 = vector.shape_cast %83 : vector<16x8xf32> to vector<2x8x8xf32>
    %85 = arith.truncf %84 : vector<2x8x8xf32> to vector<2x8x8xbf16>
    %86 = vector.extract_strided_slice %49 {offsets = [0, 8], sizes = [16, 8], strides = [1, 1]} : vector<16x96xf32> to vector<16x8xf32>
    %87 = vector.shape_cast %86 : vector<16x8xf32> to vector<2x8x8xf32>
    %88 = arith.truncf %87 : vector<2x8x8xf32> to vector<2x8x8xbf16>
    "tpu.trace_start"() <{level = 10 : i32, message = "bqd,bkd->bqk"}> : () -> ()
    %cst_42 = arith.constant dense<0.000000e+00> : vector<2x8x8xf32>
    %89 = tpu.matmul %82, %85, %cst_42 {dimension_numbers = #tpu.dot_dimension_numbers<[2], [2], [1], [1], [0, 0, 0, 1, 1, 1], [0], [0]>} : vector<2x8x8xbf16>, vector<2x8x8xbf16>, vector<2x8x8xf32> -> vector<2x8x8xf32>
    "tpu.trace_stop"() : () -> ()
    %90 = vector.broadcast %53 : vector<1x8x8xf32> to vector<2x8x8xf32>
    %91 = arith.addf %89, %90 : vector<2x8x8xf32>
    %cst_43 = arith.constant dense<0xFF800000> : vector<2x8xf32>
    %92 = vector.multi_reduction <maximumf>, %91, %cst_43 [2] : vector<2x8x8xf32> to vector<2x8xf32>
    %93 = vector.shape_cast %92 : vector<2x8xf32> to vector<2x8x1xf32>
    %94 = vector.broadcast %93 : vector<2x8x1xf32> to vector<2x8x8xf32>
    %95 = arith.subf %91, %94 : vector<2x8x8xf32>
    %96 = math.exp %95 : vector<2x8x8xf32>
    %cst_44 = arith.constant dense<0.000000e+00> : vector<2x8xf32>
    %97 = vector.multi_reduction <add>, %96, %cst_44 [2] : vector<2x8x8xf32> to vector<2x8xf32>
    %98 = vector.shape_cast %97 : vector<2x8xf32> to vector<2x8x1xf32>
    %99 = tpu.reciprocal %98 {approx = true} : vector<2x8x1xf32> -> vector<2x8x1xf32>
    %100 = vector.broadcast %99 : vector<2x8x1xf32> to vector<2x8x8xf32>
    %101 = arith.mulf %96, %100 : vector<2x8x8xf32>
    %102 = arith.truncf %101 : vector<2x8x8xf32> to vector<2x8x8xbf16>
    "tpu.trace_start"() <{level = 10 : i32, message = "bqk,bkd->bqd"}> : () -> ()
    %cst_45 = arith.constant dense<0.000000e+00> : vector<2x8x8xf32>
    %103 = tpu.matmul %102, %88, %cst_45 {dimension_numbers = #tpu.dot_dimension_numbers<[2], [1], [1], [2], [0, 0, 0, 1, 1, 2], [0], [0]>} : vector<2x8x8xbf16>, vector<2x8x8xbf16>, vector<2x8x8xf32> -> vector<2x8x8xf32>
    "tpu.trace_stop"() : () -> ()
    %104 = vector.shape_cast %103 : vector<2x8x8xf32> to vector<16x8xf32>
    %c0_46 = arith.constant 0 : index
    %c8 = arith.constant 8 : index
    %105 = vector.load %arg24[%c0_46, %c8] : memref<16x96xf32, #tpu.memory_space<vmem>>, vector<16x8xf32>
    tpu.vector_store %arg24[%c0_46, %c8], %104 {strides = array<i32>} : memref<16x96xf32, #tpu.memory_space<vmem>>, vector<16x8xf32>,
    %106 = vector.extract_strided_slice %51 {offsets = [0, 16], sizes = [16, 8], strides = [1, 1]} : vector<16x96xf32> to vector<16x8xf32>
    %107 = vector.shape_cast %106 : vector<16x8xf32> to vector<2x8x8xf32>
    %108 = arith.truncf %107 : vector<2x8x8xf32> to vector<2x8x8xbf16>
    %109 = vector.extract_strided_slice %42 {offsets = [0, 16], sizes = [16, 8], strides = [1, 1]} : vector<16x96xf32> to vector<16x8xf32>
    %110 = vector.shape_cast %109 : vector<16x8xf32> to vector<2x8x8xf32>
    %111 = arith.truncf %110 : vector<2x8x8xf32> to vector<2x8x8xbf16>
    %112 = vector.extract_strided_slice %49 {offsets = [0, 16], sizes = [16, 8], strides = [1, 1]} : vector<16x96xf32> to vector<16x8xf32>
    %113 = vector.shape_cast %112 : vector<16x8xf32> to vector<2x8x8xf32>
    %114 = arith.truncf %113 : vector<2x8x8xf32> to vector<2x8x8xbf16>
    "tpu.trace_start"() <{level = 10 : i32, message = "bqd,bkd->bqk"}> : () -> ()
    %cst_47 = arith.constant dense<0.000000e+00> : vector<2x8x8xf32>
    %115 = tpu.matmul %108, %111, %cst_47 {dimension_numbers = #tpu.dot_dimension_numbers<[2], [2], [1], [1], [0, 0, 0, 1, 1, 1], [0], [0]>} : vector<2x8x8xbf16>, vector<2x8x8xbf16>, vector<2x8x8xf32> -> vector<2x8x8xf32>
    "tpu.trace_stop"() : () -> ()
    %116 = vector.broadcast %53 : vector<1x8x8xf32> to vector<2x8x8xf32>
    %117 = arith.addf %115, %116 : vector<2x8x8xf32>
    %cst_48 = arith.constant dense<0xFF800000> : vector<2x8xf32>
    %118 = vector.multi_reduction <maximumf>, %117, %cst_48 [2] : vector<2x8x8xf32> to vector<2x8xf32>
    %119 = vector.shape_cast %118 : vector<2x8xf32> to vector<2x8x1xf32>
    %120 = vector.broadcast %119 : vector<2x8x1xf32> to vector<2x8x8xf32>
    %121 = arith.subf %117, %120 : vector<2x8x8xf32>
    %122 = math.exp %121 : vector<2x8x8xf32>
    %cst_49 = arith.constant dense<0.000000e+00> : vector<2x8xf32>
    %123 = vector.multi_reduction <add>, %122, %cst_49 [2] : vector<2x8x8xf32> to vector<2x8xf32>
    %124 = vector.shape_cast %123 : vector<2x8xf32> to vector<2x8x1xf32>
    %125 = tpu.reciprocal %124 {approx = true} : vector<2x8x1xf32> -> vector<2x8x1xf32>
    %126 = vector.broadcast %125 : vector<2x8x1xf32> to vector<2x8x8xf32>
    %127 = arith.mulf %122, %126 : vector<2x8x8xf32>
    %128 = arith.truncf %127 : vector<2x8x8xf32> to vector<2x8x8xbf16>
    "tpu.trace_start"() <{level = 10 : i32, message = "bqk,bkd->bqd"}> : () -> ()
    %cst_50 = arith.constant dense<0.000000e+00> : vector<2x8x8xf32>
    %129 = tpu.matmul %128, %114, %cst_50 {dimension_numbers = #tpu.dot_dimension_numbers<[2], [1], [1], [2], [0, 0, 0, 1, 1, 2], [0], [0]>} : vector<2x8x8xbf16>, vector<2x8x8xbf16>, vector<2x8x8xf32> -> vector<2x8x8xf32>
    "tpu.trace_stop"() : () -> ()
    %130 = vector.shape_cast %129 : vector<2x8x8xf32> to vector<16x8xf32>
    %c0_51 = arith.constant 0 : index
    %c16 = arith.constant 16 : index
    %131 = vector.load %arg24[%c0_51, %c16] : memref<16x96xf32, #tpu.memory_space<vmem>>, vector<16x8xf32>
    tpu.vector_store %arg24[%c0_51, %c16], %130 {strides = array<i32>} : memref<16x96xf32, #tpu.memory_space<vmem>>, vector<16x8xf32>,
    %132 = vector.extract_strided_slice %51 {offsets = [0, 24], sizes = [16, 8], strides = [1, 1]} : vector<16x96xf32> to vector<16x8xf32>
    %133 = vector.shape_cast %132 : vector<16x8xf32> to vector<2x8x8xf32>
    %134 = arith.truncf %133 : vector<2x8x8xf32> to vector<2x8x8xbf16>
    %135 = vector.extract_strided_slice %42 {offsets = [0, 24], sizes = [16, 8], strides = [1, 1]} : vector<16x96xf32> to vector<16x8xf32>
    %136 = vector.shape_cast %135 : vector<16x8xf32> to vector<2x8x8xf32>
    %137 = arith.truncf %136 : vector<2x8x8xf32> to vector<2x8x8xbf16>
    %138 = vector.extract_strided_slice %49 {offsets = [0, 24], sizes = [16, 8], strides = [1, 1]} : vector<16x96xf32> to vector<16x8xf32>
    %139 = vector.shape_cast %138 : vector<16x8xf32> to vector<2x8x8xf32>
    %140 = arith.truncf %139 : vector<2x8x8xf32> to vector<2x8x8xbf16>
    "tpu.trace_start"() <{level = 10 : i32, message = "bqd,bkd->bqk"}> : () -> ()
    %cst_52 = arith.constant dense<0.000000e+00> : vector<2x8x8xf32>
    %141 = tpu.matmul %134, %137, %cst_52 {dimension_numbers = #tpu.dot_dimension_numbers<[2], [2], [1], [1], [0, 0, 0, 1, 1, 1], [0], [0]>} : vector<2x8x8xbf16>, vector<2x8x8xbf16>, vector<2x8x8xf32> -> vector<2x8x8xf32>
    "tpu.trace_stop"() : () -> ()
    %142 = vector.broadcast %53 : vector<1x8x8xf32> to vector<2x8x8xf32>
    %143 = arith.addf %141, %142 : vector<2x8x8xf32>
    %cst_53 = arith.constant dense<0xFF800000> : vector<2x8xf32>
    %144 = vector.multi_reduction <maximumf>, %143, %cst_53 [2] : vector<2x8x8xf32> to vector<2x8xf32>
    %145 = vector.shape_cast %144 : vector<2x8xf32> to vector<2x8x1xf32>
    %146 = vector.broadcast %145 : vector<2x8x1xf32> to vector<2x8x8xf32>
    %147 = arith.subf %143, %146 : vector<2x8x8xf32>
    %148 = math.exp %147 : vector<2x8x8xf32>
    %cst_54 = arith.constant dense<0.000000e+00> : vector<2x8xf32>
    %149 = vector.multi_reduction <add>, %148, %cst_54 [2] : vector<2x8x8xf32> to vector<2x8xf32>
    %150 = vector.shape_cast %149 : vector<2x8xf32> to vector<2x8x1xf32>
    %151 = tpu.reciprocal %150 {approx = true} : vector<2x8x1xf32> -> vector<2x8x1xf32>
    %152 = vector.broadcast %151 : vector<2x8x1xf32> to vector<2x8x8xf32>
    %153 = arith.mulf %148, %152 : vector<2x8x8xf32>
    %154 = arith.truncf %153 : vector<2x8x8xf32> to vector<2x8x8xbf16>
    "tpu.trace_start"() <{level = 10 : i32, message = "bqk,bkd->bqd"}> : () -> ()
    %cst_55 = arith.constant dense<0.000000e+00> : vector<2x8x8xf32>
    %155 = tpu.matmul %154, %140, %cst_55 {dimension_numbers = #tpu.dot_dimension_numbers<[2], [1], [1], [2], [0, 0, 0, 1, 1, 2], [0], [0]>} : vector<2x8x8xbf16>, vector<2x8x8xbf16>, vector<2x8x8xf32> -> vector<2x8x8xf32>
    "tpu.trace_stop"() : () -> ()
    %156 = vector.shape_cast %155 : vector<2x8x8xf32> to vector<16x8xf32>
    %c0_56 = arith.constant 0 : index
    %c24 = arith.constant 24 : index
    %157 = vector.load %arg24[%c0_56, %c24] : memref<16x96xf32, #tpu.memory_space<vmem>>, vector<16x8xf32>
    tpu.vector_store %arg24[%c0_56, %c24], %156 {strides = array<i32>} : memref<16x96xf32, #tpu.memory_space<vmem>>, vector<16x8xf32>,
    %158 = vector.extract_strided_slice %51 {offsets = [0, 32], sizes = [16, 8], strides = [1, 1]} : vector<16x96xf32> to vector<16x8xf32>
    %159 = vector.shape_cast %158 : vector<16x8xf32> to vector<2x8x8xf32>
    %160 = arith.truncf %159 : vector<2x8x8xf32> to vector<2x8x8xbf16>
    %161 = vector.extract_strided_slice %42 {offsets = [0, 32], sizes = [16, 8], strides = [1, 1]} : vector<16x96xf32> to vector<16x8xf32>
    %162 = vector.shape_cast %161 : vector<16x8xf32> to vector<2x8x8xf32>
    %163 = arith.truncf %162 : vector<2x8x8xf32> to vector<2x8x8xbf16>
    %164 = vector.extract_strided_slice %49 {offsets = [0, 32], sizes = [16, 8], strides = [1, 1]} : vector<16x96xf32> to vector<16x8xf32>
    %165 = vector.shape_cast %164 : vector<16x8xf32> to vector<2x8x8xf32>
    %166 = arith.truncf %165 : vector<2x8x8xf32> to vector<2x8x8xbf16>
    "tpu.trace_start"() <{level = 10 : i32, message = "bqd,bkd->bqk"}> : () -> ()
    %cst_57 = arith.constant dense<0.000000e+00> : vector<2x8x8xf32>
    %167 = tpu.matmul %160, %163, %cst_57 {dimension_numbers = #tpu.dot_dimension_numbers<[2], [2], [1], [1], [0, 0, 0, 1, 1, 1], [0], [0]>} : vector<2x8x8xbf16>, vector<2x8x8xbf16>, vector<2x8x8xf32> -> vector<2x8x8xf32>
    "tpu.trace_stop"() : () -> ()
    %168 = vector.broadcast %53 : vector<1x8x8xf32> to vector<2x8x8xf32>
    %169 = arith.addf %167, %168 : vector<2x8x8xf32>
    %cst_58 = arith.constant dense<0xFF800000> : vector<2x8xf32>
    %170 = vector.multi_reduction <maximumf>, %169, %cst_58 [2] : vector<2x8x8xf32> to vector<2x8xf32>
    %171 = vector.shape_cast %170 : vector<2x8xf32> to vector<2x8x1xf32>
    %172 = vector.broadcast %171 : vector<2x8x1xf32> to vector<2x8x8xf32>
    %173 = arith.subf %169, %172 : vector<2x8x8xf32>
    %174 = math.exp %173 : vector<2x8x8xf32>
    %cst_59 = arith.constant dense<0.000000e+00> : vector<2x8xf32>
    %175 = vector.multi_reduction <add>, %174, %cst_59 [2] : vector<2x8x8xf32> to vector<2x8xf32>
    %176 = vector.shape_cast %175 : vector<2x8xf32> to vector<2x8x1xf32>
    %177 = tpu.reciprocal %176 {approx = true} : vector<2x8x1xf32> -> vector<2x8x1xf32>
    %178 = vector.broadcast %177 : vector<2x8x1xf32> to vector<2x8x8xf32>
    %179 = arith.mulf %174, %178 : vector<2x8x8xf32>
    %180 = arith.truncf %179 : vector<2x8x8xf32> to vector<2x8x8xbf16>
    "tpu.trace_start"() <{level = 10 : i32, message = "bqk,bkd->bqd"}> : () -> ()
    %cst_60 = arith.constant dense<0.000000e+00> : vector<2x8x8xf32>
    %181 = tpu.matmul %180, %166, %cst_60 {dimension_numbers = #tpu.dot_dimension_numbers<[2], [1], [1], [2], [0, 0, 0, 1, 1, 2], [0], [0]>} : vector<2x8x8xbf16>, vector<2x8x8xbf16>, vector<2x8x8xf32> -> vector<2x8x8xf32>
    "tpu.trace_stop"() : () -> ()
    %182 = vector.shape_cast %181 : vector<2x8x8xf32> to vector<16x8xf32>
    %c0_61 = arith.constant 0 : index
    %c32 = arith.constant 32 : index
    %183 = vector.load %arg24[%c0_61, %c32] : memref<16x96xf32, #tpu.memory_space<vmem>>, vector<16x8xf32>
    tpu.vector_store %arg24[%c0_61, %c32], %182 {strides = array<i32>} : memref<16x96xf32, #tpu.memory_space<vmem>>, vector<16x8xf32>,
    %184 = vector.extract_strided_slice %51 {offsets = [0, 40], sizes = [16, 8], strides = [1, 1]} : vector<16x96xf32> to vector<16x8xf32>
    %185 = vector.shape_cast %184 : vector<16x8xf32> to vector<2x8x8xf32>
    %186 = arith.truncf %185 : vector<2x8x8xf32> to vector<2x8x8xbf16>
    %187 = vector.extract_strided_slice %42 {offsets = [0, 40], sizes = [16, 8], strides = [1, 1]} : vector<16x96xf32> to vector<16x8xf32>
    %188 = vector.shape_cast %187 : vector<16x8xf32> to vector<2x8x8xf32>
    %189 = arith.truncf %188 : vector<2x8x8xf32> to vector<2x8x8xbf16>
    %190 = vector.extract_strided_slice %49 {offsets = [0, 40], sizes = [16, 8], strides = [1, 1]} : vector<16x96xf32> to vector<16x8xf32>
    %191 = vector.shape_cast %190 : vector<16x8xf32> to vector<2x8x8xf32>
    %192 = arith.truncf %191 : vector<2x8x8xf32> to vector<2x8x8xbf16>
    "tpu.trace_start"() <{level = 10 : i32, message = "bqd,bkd->bqk"}> : () -> ()
    %cst_62 = arith.constant dense<0.000000e+00> : vector<2x8x8xf32>
    %193 = tpu.matmul %186, %189, %cst_62 {dimension_numbers = #tpu.dot_dimension_numbers<[2], [2], [1], [1], [0, 0, 0, 1, 1, 1], [0], [0]>} : vector<2x8x8xbf16>, vector<2x8x8xbf16>, vector<2x8x8xf32> -> vector<2x8x8xf32>
    "tpu.trace_stop"() : () -> ()
    %194 = vector.broadcast %53 : vector<1x8x8xf32> to vector<2x8x8xf32>
    %195 = arith.addf %193, %194 : vector<2x8x8xf32>
    %cst_63 = arith.constant dense<0xFF800000> : vector<2x8xf32>
    %196 = vector.multi_reduction <maximumf>, %195, %cst_63 [2] : vector<2x8x8xf32> to vector<2x8xf32>
    %197 = vector.shape_cast %196 : vector<2x8xf32> to vector<2x8x1xf32>
    %198 = vector.broadcast %197 : vector<2x8x1xf32> to vector<2x8x8xf32>
    %199 = arith.subf %195, %198 : vector<2x8x8xf32>
    %200 = math.exp %199 : vector<2x8x8xf32>
    %cst_64 = arith.constant dense<0.000000e+00> : vector<2x8xf32>
    %201 = vector.multi_reduction <add>, %200, %cst_64 [2] : vector<2x8x8xf32> to vector<2x8xf32>
    %202 = vector.shape_cast %201 : vector<2x8xf32> to vector<2x8x1xf32>
    %203 = tpu.reciprocal %202 {approx = true} : vector<2x8x1xf32> -> vector<2x8x1xf32>
    %204 = vector.broadcast %203 : vector<2x8x1xf32> to vector<2x8x8xf32>
    %205 = arith.mulf %200, %204 : vector<2x8x8xf32>
    %206 = arith.truncf %205 : vector<2x8x8xf32> to vector<2x8x8xbf16>
    "tpu.trace_start"() <{level = 10 : i32, message = "bqk,bkd->bqd"}> : () -> ()
    %cst_65 = arith.constant dense<0.000000e+00> : vector<2x8x8xf32>
    %207 = tpu.matmul %206, %192, %cst_65 {dimension_numbers = #tpu.dot_dimension_numbers<[2], [1], [1], [2], [0, 0, 0, 1, 1, 2], [0], [0]>} : vector<2x8x8xbf16>, vector<2x8x8xbf16>, vector<2x8x8xf32> -> vector<2x8x8xf32>
    "tpu.trace_stop"() : () -> ()
    %208 = vector.shape_cast %207 : vector<2x8x8xf32> to vector<16x8xf32>
    %c0_66 = arith.constant 0 : index
    %c40 = arith.constant 40 : index
    %209 = vector.load %arg24[%c0_66, %c40] : memref<16x96xf32, #tpu.memory_space<vmem>>, vector<16x8xf32>
    tpu.vector_store %arg24[%c0_66, %c40], %208 {strides = array<i32>} : memref<16x96xf32, #tpu.memory_space<vmem>>, vector<16x8xf32>,
    %210 = vector.extract_strided_slice %51 {offsets = [0, 48], sizes = [16, 8], strides = [1, 1]} : vector<16x96xf32> to vector<16x8xf32>
    %211 = vector.shape_cast %210 : vector<16x8xf32> to vector<2x8x8xf32>
    %212 = arith.truncf %211 : vector<2x8x8xf32> to vector<2x8x8xbf16>
    %213 = vector.extract_strided_slice %42 {offsets = [0, 48], sizes = [16, 8], strides = [1, 1]} : vector<16x96xf32> to vector<16x8xf32>
    %214 = vector.shape_cast %213 : vector<16x8xf32> to vector<2x8x8xf32>
    %215 = arith.truncf %214 : vector<2x8x8xf32> to vector<2x8x8xbf16>
    %216 = vector.extract_strided_slice %49 {offsets = [0, 48], sizes = [16, 8], strides = [1, 1]} : vector<16x96xf32> to vector<16x8xf32>
    %217 = vector.shape_cast %216 : vector<16x8xf32> to vector<2x8x8xf32>
    %218 = arith.truncf %217 : vector<2x8x8xf32> to vector<2x8x8xbf16>
    "tpu.trace_start"() <{level = 10 : i32, message = "bqd,bkd->bqk"}> : () -> ()
    %cst_67 = arith.constant dense<0.000000e+00> : vector<2x8x8xf32>
    %219 = tpu.matmul %212, %215, %cst_67 {dimension_numbers = #tpu.dot_dimension_numbers<[2], [2], [1], [1], [0, 0, 0, 1, 1, 1], [0], [0]>} : vector<2x8x8xbf16>, vector<2x8x8xbf16>, vector<2x8x8xf32> -> vector<2x8x8xf32>
    "tpu.trace_stop"() : () -> ()
    %220 = vector.broadcast %53 : vector<1x8x8xf32> to vector<2x8x8xf32>
    %221 = arith.addf %219, %220 : vector<2x8x8xf32>
    %cst_68 = arith.constant dense<0xFF800000> : vector<2x8xf32>
    %222 = vector.multi_reduction <maximumf>, %221, %cst_68 [2] : vector<2x8x8xf32> to vector<2x8xf32>
    %223 = vector.shape_cast %222 : vector<2x8xf32> to vector<2x8x1xf32>
    %224 = vector.broadcast %223 : vector<2x8x1xf32> to vector<2x8x8xf32>
    %225 = arith.subf %221, %224 : vector<2x8x8xf32>
    %226 = math.exp %225 : vector<2x8x8xf32>
    %cst_69 = arith.constant dense<0.000000e+00> : vector<2x8xf32>
    %227 = vector.multi_reduction <add>, %226, %cst_69 [2] : vector<2x8x8xf32> to vector<2x8xf32>
    %228 = vector.shape_cast %227 : vector<2x8xf32> to vector<2x8x1xf32>
    %229 = tpu.reciprocal %228 {approx = true} : vector<2x8x1xf32> -> vector<2x8x1xf32>
    %230 = vector.broadcast %229 : vector<2x8x1xf32> to vector<2x8x8xf32>
    %231 = arith.mulf %226, %230 : vector<2x8x8xf32>
    %232 = arith.truncf %231 : vector<2x8x8xf32> to vector<2x8x8xbf16>
    "tpu.trace_start"() <{level = 10 : i32, message = "bqk,bkd->bqd"}> : () -> ()
    %cst_70 = arith.constant dense<0.000000e+00> : vector<2x8x8xf32>
    %233 = tpu.matmul %232, %218, %cst_70 {dimension_numbers = #tpu.dot_dimension_numbers<[2], [1], [1], [2], [0, 0, 0, 1, 1, 2], [0], [0]>} : vector<2x8x8xbf16>, vector<2x8x8xbf16>, vector<2x8x8xf32> -> vector<2x8x8xf32>
    "tpu.trace_stop"() : () -> ()
    %234 = vector.shape_cast %233 : vector<2x8x8xf32> to vector<16x8xf32>
    %c0_71 = arith.constant 0 : index
    %c48 = arith.constant 48 : index
    %235 = vector.load %arg24[%c0_71, %c48] : memref<16x96xf32, #tpu.memory_space<vmem>>, vector<16x8xf32>
    tpu.vector_store %arg24[%c0_71, %c48], %234 {strides = array<i32>} : memref<16x96xf32, #tpu.memory_space<vmem>>, vector<16x8xf32>,
    %236 = vector.extract_strided_slice %51 {offsets = [0, 56], sizes = [16, 8], strides = [1, 1]} : vector<16x96xf32> to vector<16x8xf32>
    %237 = vector.shape_cast %236 : vector<16x8xf32> to vector<2x8x8xf32>
    %238 = arith.truncf %237 : vector<2x8x8xf32> to vector<2x8x8xbf16>
    %239 = vector.extract_strided_slice %42 {offsets = [0, 56], sizes = [16, 8], strides = [1, 1]} : vector<16x96xf32> to vector<16x8xf32>
    %240 = vector.shape_cast %239 : vector<16x8xf32> to vector<2x8x8xf32>
    %241 = arith.truncf %240 : vector<2x8x8xf32> to vector<2x8x8xbf16>
    %242 = vector.extract_strided_slice %49 {offsets = [0, 56], sizes = [16, 8], strides = [1, 1]} : vector<16x96xf32> to vector<16x8xf32>
    %243 = vector.shape_cast %242 : vector<16x8xf32> to vector<2x8x8xf32>
    %244 = arith.truncf %243 : vector<2x8x8xf32> to vector<2x8x8xbf16>
    "tpu.trace_start"() <{level = 10 : i32, message = "bqd,bkd->bqk"}> : () -> ()
    %cst_72 = arith.constant dense<0.000000e+00> : vector<2x8x8xf32>
    %245 = tpu.matmul %238, %241, %cst_72 {dimension_numbers = #tpu.dot_dimension_numbers<[2], [2], [1], [1], [0, 0, 0, 1, 1, 1], [0], [0]>} : vector<2x8x8xbf16>, vector<2x8x8xbf16>, vector<2x8x8xf32> -> vector<2x8x8xf32>
    "tpu.trace_stop"() : () -> ()
    %246 = vector.broadcast %53 : vector<1x8x8xf32> to vector<2x8x8xf32>
    %247 = arith.addf %245, %246 : vector<2x8x8xf32>
    %cst_73 = arith.constant dense<0xFF800000> : vector<2x8xf32>
    %248 = vector.multi_reduction <maximumf>, %247, %cst_73 [2] : vector<2x8x8xf32> to vector<2x8xf32>
    %249 = vector.shape_cast %248 : vector<2x8xf32> to vector<2x8x1xf32>
    %250 = vector.broadcast %249 : vector<2x8x1xf32> to vector<2x8x8xf32>
    %251 = arith.subf %247, %250 : vector<2x8x8xf32>
    %252 = math.exp %251 : vector<2x8x8xf32>
    %cst_74 = arith.constant dense<0.000000e+00> : vector<2x8xf32>
    %253 = vector.multi_reduction <add>, %252, %cst_74 [2] : vector<2x8x8xf32> to vector<2x8xf32>
    %254 = vector.shape_cast %253 : vector<2x8xf32> to vector<2x8x1xf32>
    %255 = tpu.reciprocal %254 {approx = true} : vector<2x8x1xf32> -> vector<2x8x1xf32>
    %256 = vector.broadcast %255 : vector<2x8x1xf32> to vector<2x8x8xf32>
    %257 = arith.mulf %252, %256 : vector<2x8x8xf32>
    %258 = arith.truncf %257 : vector<2x8x8xf32> to vector<2x8x8xbf16>
    "tpu.trace_start"() <{level = 10 : i32, message = "bqk,bkd->bqd"}> : () -> ()
    %cst_75 = arith.constant dense<0.000000e+00> : vector<2x8x8xf32>
    %259 = tpu.matmul %258, %244, %cst_75 {dimension_numbers = #tpu.dot_dimension_numbers<[2], [1], [1], [2], [0, 0, 0, 1, 1, 2], [0], [0]>} : vector<2x8x8xbf16>, vector<2x8x8xbf16>, vector<2x8x8xf32> -> vector<2x8x8xf32>
    "tpu.trace_stop"() : () -> ()
    %260 = vector.shape_cast %259 : vector<2x8x8xf32> to vector<16x8xf32>
    %c0_76 = arith.constant 0 : index
    %c56 = arith.constant 56 : index
    %261 = vector.load %arg24[%c0_76, %c56] : memref<16x96xf32, #tpu.memory_space<vmem>>, vector<16x8xf32>
    tpu.vector_store %arg24[%c0_76, %c56], %260 {strides = array<i32>} : memref<16x96xf32, #tpu.memory_space<vmem>>, vector<16x8xf32>,
    %262 = vector.extract_strided_slice %51 {offsets = [0, 64], sizes = [16, 8], strides = [1, 1]} : vector<16x96xf32> to vector<16x8xf32>
    %263 = vector.shape_cast %262 : vector<16x8xf32> to vector<2x8x8xf32>
    %264 = arith.truncf %263 : vector<2x8x8xf32> to vector<2x8x8xbf16>
    %265 = vector.extract_strided_slice %42 {offsets = [0, 64], sizes = [16, 8], strides = [1, 1]} : vector<16x96xf32> to vector<16x8xf32>
    %266 = vector.shape_cast %265 : vector<16x8xf32> to vector<2x8x8xf32>
    %267 = arith.truncf %266 : vector<2x8x8xf32> to vector<2x8x8xbf16>
    %268 = vector.extract_strided_slice %49 {offsets = [0, 64], sizes = [16, 8], strides = [1, 1]} : vector<16x96xf32> to vector<16x8xf32>
    %269 = vector.shape_cast %268 : vector<16x8xf32> to vector<2x8x8xf32>
    %270 = arith.truncf %269 : vector<2x8x8xf32> to vector<2x8x8xbf16>
    "tpu.trace_start"() <{level = 10 : i32, message = "bqd,bkd->bqk"}> : () -> ()
    %cst_77 = arith.constant dense<0.000000e+00> : vector<2x8x8xf32>
    %271 = tpu.matmul %264, %267, %cst_77 {dimension_numbers = #tpu.dot_dimension_numbers<[2], [2], [1], [1], [0, 0, 0, 1, 1, 1], [0], [0]>} : vector<2x8x8xbf16>, vector<2x8x8xbf16>, vector<2x8x8xf32> -> vector<2x8x8xf32>
    "tpu.trace_stop"() : () -> ()
    %272 = vector.broadcast %53 : vector<1x8x8xf32> to vector<2x8x8xf32>
    %273 = arith.addf %271, %272 : vector<2x8x8xf32>
    %cst_78 = arith.constant dense<0xFF800000> : vector<2x8xf32>
    %274 = vector.multi_reduction <maximumf>, %273, %cst_78 [2] : vector<2x8x8xf32> to vector<2x8xf32>
    %275 = vector.shape_cast %274 : vector<2x8xf32> to vector<2x8x1xf32>
    %276 = vector.broadcast %275 : vector<2x8x1xf32> to vector<2x8x8xf32>
    %277 = arith.subf %273, %276 : vector<2x8x8xf32>
    %278 = math.exp %277 : vector<2x8x8xf32>
    %cst_79 = arith.constant dense<0.000000e+00> : vector<2x8xf32>
    %279 = vector.multi_reduction <add>, %278, %cst_79 [2] : vector<2x8x8xf32> to vector<2x8xf32>
    %280 = vector.shape_cast %279 : vector<2x8xf32> to vector<2x8x1xf32>
    %281 = tpu.reciprocal %280 {approx = true} : vector<2x8x1xf32> -> vector<2x8x1xf32>
    %282 = vector.broadcast %281 : vector<2x8x1xf32> to vector<2x8x8xf32>
    %283 = arith.mulf %278, %282 : vector<2x8x8xf32>
    %284 = arith.truncf %283 : vector<2x8x8xf32> to vector<2x8x8xbf16>
    "tpu.trace_start"() <{level = 10 : i32, message = "bqk,bkd->bqd"}> : () -> ()
    %cst_80 = arith.constant dense<0.000000e+00> : vector<2x8x8xf32>
    %285 = tpu.matmul %284, %270, %cst_80 {dimension_numbers = #tpu.dot_dimension_numbers<[2], [1], [1], [2], [0, 0, 0, 1, 1, 2], [0], [0]>} : vector<2x8x8xbf16>, vector<2x8x8xbf16>, vector<2x8x8xf32> -> vector<2x8x8xf32>
    "tpu.trace_stop"() : () -> ()
    %286 = vector.shape_cast %285 : vector<2x8x8xf32> to vector<16x8xf32>
    %c0_81 = arith.constant 0 : index
    %c64 = arith.constant 64 : index
    %287 = vector.load %arg24[%c0_81, %c64] : memref<16x96xf32, #tpu.memory_space<vmem>>, vector<16x8xf32>
    tpu.vector_store %arg24[%c0_81, %c64], %286 {strides = array<i32>} : memref<16x96xf32, #tpu.memory_space<vmem>>, vector<16x8xf32>,
    %288 = vector.extract_strided_slice %51 {offsets = [0, 72], sizes = [16, 8], strides = [1, 1]} : vector<16x96xf32> to vector<16x8xf32>
    %289 = vector.shape_cast %288 : vector<16x8xf32> to vector<2x8x8xf32>
    %290 = arith.truncf %289 : vector<2x8x8xf32> to vector<2x8x8xbf16>
    %291 = vector.extract_strided_slice %42 {offsets = [0, 72], sizes = [16, 8], strides = [1, 1]} : vector<16x96xf32> to vector<16x8xf32>
    %292 = vector.shape_cast %291 : vector<16x8xf32> to vector<2x8x8xf32>
    %293 = arith.truncf %292 : vector<2x8x8xf32> to vector<2x8x8xbf16>
    %294 = vector.extract_strided_slice %49 {offsets = [0, 72], sizes = [16, 8], strides = [1, 1]} : vector<16x96xf32> to vector<16x8xf32>
    %295 = vector.shape_cast %294 : vector<16x8xf32> to vector<2x8x8xf32>
    %296 = arith.truncf %295 : vector<2x8x8xf32> to vector<2x8x8xbf16>
    "tpu.trace_start"() <{level = 10 : i32, message = "bqd,bkd->bqk"}> : () -> ()
    %cst_82 = arith.constant dense<0.000000e+00> : vector<2x8x8xf32>
    %297 = tpu.matmul %290, %293, %cst_82 {dimension_numbers = #tpu.dot_dimension_numbers<[2], [2], [1], [1], [0, 0, 0, 1, 1, 1], [0], [0]>} : vector<2x8x8xbf16>, vector<2x8x8xbf16>, vector<2x8x8xf32> -> vector<2x8x8xf32>
    "tpu.trace_stop"() : () -> ()
    %298 = vector.broadcast %53 : vector<1x8x8xf32> to vector<2x8x8xf32>
    %299 = arith.addf %297, %298 : vector<2x8x8xf32>
    %cst_83 = arith.constant dense<0xFF800000> : vector<2x8xf32>
    %300 = vector.multi_reduction <maximumf>, %299, %cst_83 [2] : vector<2x8x8xf32> to vector<2x8xf32>
    %301 = vector.shape_cast %300 : vector<2x8xf32> to vector<2x8x1xf32>
    %302 = vector.broadcast %301 : vector<2x8x1xf32> to vector<2x8x8xf32>
    %303 = arith.subf %299, %302 : vector<2x8x8xf32>
    %304 = math.exp %303 : vector<2x8x8xf32>
    %cst_84 = arith.constant dense<0.000000e+00> : vector<2x8xf32>
    %305 = vector.multi_reduction <add>, %304, %cst_84 [2] : vector<2x8x8xf32> to vector<2x8xf32>
    %306 = vector.shape_cast %305 : vector<2x8xf32> to vector<2x8x1xf32>
    %307 = tpu.reciprocal %306 {approx = true} : vector<2x8x1xf32> -> vector<2x8x1xf32>
    %308 = vector.broadcast %307 : vector<2x8x1xf32> to vector<2x8x8xf32>
    %309 = arith.mulf %304, %308 : vector<2x8x8xf32>
    %310 = arith.truncf %309 : vector<2x8x8xf32> to vector<2x8x8xbf16>
    "tpu.trace_start"() <{level = 10 : i32, message = "bqk,bkd->bqd"}> : () -> ()
    %cst_85 = arith.constant dense<0.000000e+00> : vector<2x8x8xf32>
    %311 = tpu.matmul %310, %296, %cst_85 {dimension_numbers = #tpu.dot_dimension_numbers<[2], [1], [1], [2], [0, 0, 0, 1, 1, 2], [0], [0]>} : vector<2x8x8xbf16>, vector<2x8x8xbf16>, vector<2x8x8xf32> -> vector<2x8x8xf32>
    "tpu.trace_stop"() : () -> ()
    %312 = vector.shape_cast %311 : vector<2x8x8xf32> to vector<16x8xf32>
    %c0_86 = arith.constant 0 : index
    %c72 = arith.constant 72 : index
    %313 = vector.load %arg24[%c0_86, %c72] : memref<16x96xf32, #tpu.memory_space<vmem>>, vector<16x8xf32>
    tpu.vector_store %arg24[%c0_86, %c72], %312 {strides = array<i32>} : memref<16x96xf32, #tpu.memory_space<vmem>>, vector<16x8xf32>,
    %314 = vector.extract_strided_slice %51 {offsets = [0, 80], sizes = [16, 8], strides = [1, 1]} : vector<16x96xf32> to vector<16x8xf32>
    %315 = vector.shape_cast %314 : vector<16x8xf32> to vector<2x8x8xf32>
    %316 = arith.truncf %315 : vector<2x8x8xf32> to vector<2x8x8xbf16>
    %317 = vector.extract_strided_slice %42 {offsets = [0, 80], sizes = [16, 8], strides = [1, 1]} : vector<16x96xf32> to vector<16x8xf32>
    %318 = vector.shape_cast %317 : vector<16x8xf32> to vector<2x8x8xf32>
    %319 = arith.truncf %318 : vector<2x8x8xf32> to vector<2x8x8xbf16>
    %320 = vector.extract_strided_slice %49 {offsets = [0, 80], sizes = [16, 8], strides = [1, 1]} : vector<16x96xf32> to vector<16x8xf32>
    %321 = vector.shape_cast %320 : vector<16x8xf32> to vector<2x8x8xf32>
    %322 = arith.truncf %321 : vector<2x8x8xf32> to vector<2x8x8xbf16>
    "tpu.trace_start"() <{level = 10 : i32, message = "bqd,bkd->bqk"}> : () -> ()
    %cst_87 = arith.constant dense<0.000000e+00> : vector<2x8x8xf32>
    %323 = tpu.matmul %316, %319, %cst_87 {dimension_numbers = #tpu.dot_dimension_numbers<[2], [2], [1], [1], [0, 0, 0, 1, 1, 1], [0], [0]>} : vector<2x8x8xbf16>, vector<2x8x8xbf16>, vector<2x8x8xf32> -> vector<2x8x8xf32>
    "tpu.trace_stop"() : () -> ()
    %324 = vector.broadcast %53 : vector<1x8x8xf32> to vector<2x8x8xf32>
    %325 = arith.addf %323, %324 : vector<2x8x8xf32>
    %cst_88 = arith.constant dense<0xFF800000> : vector<2x8xf32>
    %326 = vector.multi_reduction <maximumf>, %325, %cst_88 [2] : vector<2x8x8xf32> to vector<2x8xf32>
    %327 = vector.shape_cast %326 : vector<2x8xf32> to vector<2x8x1xf32>
    %328 = vector.broadcast %327 : vector<2x8x1xf32> to vector<2x8x8xf32>
    %329 = arith.subf %325, %328 : vector<2x8x8xf32>
    %330 = math.exp %329 : vector<2x8x8xf32>
    %cst_89 = arith.constant dense<0.000000e+00> : vector<2x8xf32>
    %331 = vector.multi_reduction <add>, %330, %cst_89 [2] : vector<2x8x8xf32> to vector<2x8xf32>
    %332 = vector.shape_cast %331 : vector<2x8xf32> to vector<2x8x1xf32>
    %333 = tpu.reciprocal %332 {approx = true} : vector<2x8x1xf32> -> vector<2x8x1xf32>
    %334 = vector.broadcast %333 : vector<2x8x1xf32> to vector<2x8x8xf32>
    %335 = arith.mulf %330, %334 : vector<2x8x8xf32>
    %336 = arith.truncf %335 : vector<2x8x8xf32> to vector<2x8x8xbf16>
    "tpu.trace_start"() <{level = 10 : i32, message = "bqk,bkd->bqd"}> : () -> ()
    %cst_90 = arith.constant dense<0.000000e+00> : vector<2x8x8xf32>
    %337 = tpu.matmul %336, %322, %cst_90 {dimension_numbers = #tpu.dot_dimension_numbers<[2], [1], [1], [2], [0, 0, 0, 1, 1, 2], [0], [0]>} : vector<2x8x8xbf16>, vector<2x8x8xbf16>, vector<2x8x8xf32> -> vector<2x8x8xf32>
    "tpu.trace_stop"() : () -> ()
    %338 = vector.shape_cast %337 : vector<2x8x8xf32> to vector<16x8xf32>
    %c0_91 = arith.constant 0 : index
    %c80 = arith.constant 80 : index
    %339 = vector.load %arg24[%c0_91, %c80] : memref<16x96xf32, #tpu.memory_space<vmem>>, vector<16x8xf32>
    tpu.vector_store %arg24[%c0_91, %c80], %338 {strides = array<i32>} : memref<16x96xf32, #tpu.memory_space<vmem>>, vector<16x8xf32>,
    %340 = vector.extract_strided_slice %51 {offsets = [0, 88], sizes = [16, 8], strides = [1, 1]} : vector<16x96xf32> to vector<16x8xf32>
    %341 = vector.shape_cast %340 : vector<16x8xf32> to vector<2x8x8xf32>
    %342 = arith.truncf %341 : vector<2x8x8xf32> to vector<2x8x8xbf16>
    %343 = vector.extract_strided_slice %42 {offsets = [0, 88], sizes = [16, 8], strides = [1, 1]} : vector<16x96xf32> to vector<16x8xf32>
    %344 = vector.shape_cast %343 : vector<16x8xf32> to vector<2x8x8xf32>
    %345 = arith.truncf %344 : vector<2x8x8xf32> to vector<2x8x8xbf16>
    %346 = vector.extract_strided_slice %49 {offsets = [0, 88], sizes = [16, 8], strides = [1, 1]} : vector<16x96xf32> to vector<16x8xf32>
    %347 = vector.shape_cast %346 : vector<16x8xf32> to vector<2x8x8xf32>
    %348 = arith.truncf %347 : vector<2x8x8xf32> to vector<2x8x8xbf16>
    "tpu.trace_start"() <{level = 10 : i32, message = "bqd,bkd->bqk"}> : () -> ()
    %cst_92 = arith.constant dense<0.000000e+00> : vector<2x8x8xf32>
    %349 = tpu.matmul %342, %345, %cst_92 {dimension_numbers = #tpu.dot_dimension_numbers<[2], [2], [1], [1], [0, 0, 0, 1, 1, 1], [0], [0]>} : vector<2x8x8xbf16>, vector<2x8x8xbf16>, vector<2x8x8xf32> -> vector<2x8x8xf32>
    "tpu.trace_stop"() : () -> ()
    %350 = vector.broadcast %53 : vector<1x8x8xf32> to vector<2x8x8xf32>
    %351 = arith.addf %349, %350 : vector<2x8x8xf32>
    %cst_93 = arith.constant dense<0xFF800000> : vector<2x8xf32>
    %352 = vector.multi_reduction <maximumf>, %351, %cst_93 [2] : vector<2x8x8xf32> to vector<2x8xf32>
    %353 = vector.shape_cast %352 : vector<2x8xf32> to vector<2x8x1xf32>
    %354 = vector.broadcast %353 : vector<2x8x1xf32> to vector<2x8x8xf32>
    %355 = arith.subf %351, %354 : vector<2x8x8xf32>
    %356 = math.exp %355 : vector<2x8x8xf32>
    %cst_94 = arith.constant dense<0.000000e+00> : vector<2x8xf32>
    %357 = vector.multi_reduction <add>, %356, %cst_94 [2] : vector<2x8x8xf32> to vector<2x8xf32>
    %358 = vector.shape_cast %357 : vector<2x8xf32> to vector<2x8x1xf32>
    %359 = tpu.reciprocal %358 {approx = true} : vector<2x8x1xf32> -> vector<2x8x1xf32>
    %360 = vector.broadcast %359 : vector<2x8x1xf32> to vector<2x8x8xf32>
    %361 = arith.mulf %356, %360 : vector<2x8x8xf32>
    %362 = arith.truncf %361 : vector<2x8x8xf32> to vector<2x8x8xbf16>
    "tpu.trace_start"() <{level = 10 : i32, message = "bqk,bkd->bqd"}> : () -> ()
    %cst_95 = arith.constant dense<0.000000e+00> : vector<2x8x8xf32>
    %363 = tpu.matmul %362, %348, %cst_95 {dimension_numbers = #tpu.dot_dimension_numbers<[2], [1], [1], [2], [0, 0, 0, 1, 1, 2], [0], [0]>} : vector<2x8x8xbf16>, vector<2x8x8xbf16>, vector<2x8x8xf32> -> vector<2x8x8xf32>
    "tpu.trace_stop"() : () -> ()
    %364 = vector.shape_cast %363 : vector<2x8x8xf32> to vector<16x8xf32>
    %c0_96 = arith.constant 0 : index
    %c88 = arith.constant 88 : index
    %365 = vector.load %arg24[%c0_96, %c88] : memref<16x96xf32, #tpu.memory_space<vmem>>, vector<16x8xf32>
    tpu.vector_store %arg24[%c0_96, %c88], %364 {strides = array<i32>} : memref<16x96xf32, #tpu.memory_space<vmem>>, vector<16x8xf32>,
    %c0_97 = arith.constant 0 : index
    %c0_98 = arith.constant 0 : index
    %366 = vector.load %arg24[%c0_97, %c0_98] : memref<16x96xf32, #tpu.memory_space<vmem>>, vector<16x96xf32>
    %367 = arith.truncf %366 : vector<16x96xf32> to vector<16x96xbf16>
    %c0_99 = arith.constant 0 : index
    %c0_100 = arith.constant 0 : index
    %c0_101 = arith.constant 0 : index
    %368 = vector.load %arg12[%c0_99, %c0_100, %c0_101] : memref<1x96x96xbf16, #tpu.memory_space<vmem>>, vector<1x96x96xbf16>
    %369 = vector.shape_cast %368 : vector<1x96x96xbf16> to vector<96x96xbf16>
    %cst_102 = arith.constant dense<0.000000e+00> : vector<16x96xf32>
    %370 = tpu.matmul %367, %369, %cst_102 {dimension_numbers = #tpu.dot_dimension_numbers<[1], [0], [0], [1], [0, 0, 1, 1], [], []>} : vector<16x96xbf16>, vector<96x96xbf16>, vector<16x96xf32> -> vector<16x96xf32>
    %c0_103 = arith.constant 0 : index
    %c0_104 = arith.constant 0 : index
    %c0_105 = arith.constant 0 : index
    %371 = vector.load %arg13[%c0_103, %c0_104, %c0_105] : memref<1x1x96xf32, #tpu.memory_space<vmem>>, vector<1x1x96xf32>
    %372 = vector.shape_cast %371 : vector<1x1x96xf32> to vector<1x96xf32>
    %373 = vector.broadcast %372 : vector<1x96xf32> to vector<16x96xf32>
    %374 = arith.addf %370, %373 : vector<16x96xf32>
    %375 = arith.addf %3, %374 : vector<16x96xf32>
    %c0_106 = arith.constant 0 : index
    %c0_107 = arith.constant 0 : index
    %c0_108 = arith.constant 0 : index
    %376 = vector.load %arg14[%c0_106, %c0_107, %c0_108] : memref<1x1x96xf32, #tpu.memory_space<vmem>>, vector<1x1x96xf32>
    %377 = vector.shape_cast %376 : vector<1x1x96xf32> to vector<1x96xf32>
    %c0_109 = arith.constant 0 : index
    %c0_110 = arith.constant 0 : index
    %c0_111 = arith.constant 0 : index
    %378 = vector.load %arg15[%c0_109, %c0_110, %c0_111] : memref<1x1x96xf32, #tpu.memory_space<vmem>>, vector<1x1x96xf32>
    %379 = vector.shape_cast %378 : vector<1x1x96xf32> to vector<1x96xf32>
    %cst_112 = arith.constant dense<0.000000e+00> : vector<16xf32>
    %380 = vector.multi_reduction <add>, %375, %cst_112 [1] : vector<16x96xf32> to vector<16xf32>
    %381 = vector.shape_cast %380 : vector<16xf32> to vector<16x1xf32>
    %cst_113 = arith.constant 9.600000e+01 : f32
    %382 = vector.broadcast %cst_113 : f32 to vector<16x1xf32>
    %383 = arith.divf %381, %382 : vector<16x1xf32>
    %384 = vector.broadcast %383 : vector<16x1xf32> to vector<16x96xf32>
    %385 = arith.subf %375, %384 : vector<16x96xf32>
    %386 = arith.mulf %385, %385 : vector<16x96xf32>
    %cst_114 = arith.constant dense<0.000000e+00> : vector<16xf32>
    %387 = vector.multi_reduction <add>, %386, %cst_114 [1] : vector<16x96xf32> to vector<16xf32>
    %388 = vector.shape_cast %387 : vector<16xf32> to vector<16x1xf32>
    %cst_115 = arith.constant 9.600000e+01 : f32
    %389 = vector.broadcast %cst_115 : f32 to vector<16x1xf32>
    %390 = arith.divf %388, %389 : vector<16x1xf32>
    %cst_116 = arith.constant 9.99999974E-6 : f32
    %391 = vector.broadcast %cst_116 : f32 to vector<16x1xf32>
    %392 = arith.addf %390, %391 : vector<16x1xf32>
    %393 = math.rsqrt %392 : vector<16x1xf32>
    %394 = vector.broadcast %393 : vector<16x1xf32> to vector<16x96xf32>
    %395 = arith.mulf %385, %394 : vector<16x96xf32>
    %396 = vector.broadcast %377 : vector<1x96xf32> to vector<16x96xf32>
    %397 = arith.mulf %395, %396 : vector<16x96xf32>
    %398 = vector.broadcast %379 : vector<1x96xf32> to vector<16x96xf32>
    %399 = arith.addf %397, %398 : vector<16x96xf32>
    %400 = arith.truncf %399 : vector<16x96xf32> to vector<16x96xbf16>
    %c0_117 = arith.constant 0 : index
    %c0_118 = arith.constant 0 : index
    %c0_119 = arith.constant 0 : index
    %401 = vector.load %arg16[%c0_117, %c0_118, %c0_119] : memref<1x96x384xbf16, #tpu.memory_space<vmem>>, vector<1x96x384xbf16>
    %402 = vector.shape_cast %401 : vector<1x96x384xbf16> to vector<96x384xbf16>
    %cst_120 = arith.constant dense<0.000000e+00> : vector<16x384xf32>
    %403 = tpu.matmul %400, %402, %cst_120 {dimension_numbers = #tpu.dot_dimension_numbers<[1], [0], [0], [1], [0, 0, 1, 1], [], []>} : vector<16x96xbf16>, vector<96x384xbf16>, vector<16x384xf32> -> vector<16x384xf32>
    %c0_121 = arith.constant 0 : index
    %c0_122 = arith.constant 0 : index
    %c0_123 = arith.constant 0 : index
    %404 = vector.load %arg17[%c0_121, %c0_122, %c0_123] : memref<1x1x384xf32, #tpu.memory_space<vmem>>, vector<1x1x384xf32>
    %405 = vector.shape_cast %404 : vector<1x1x384xf32> to vector<1x384xf32>
    %406 = vector.broadcast %405 : vector<1x384xf32> to vector<16x384xf32>
    %407 = arith.addf %403, %406 : vector<16x384xf32>
    %cst_124 = arith.constant -1.702000e+00 : f32
    %408 = vector.broadcast %cst_124 : f32 to vector<16x384xf32>
    %409 = arith.mulf %408, %407 : vector<16x384xf32>
    %410 = math.exp %409 : vector<16x384xf32>
    %cst_125 = arith.constant 1.000000e+00 : f32
    %411 = vector.broadcast %cst_125 : f32 to vector<16x384xf32>
    %412 = arith.addf %411, %410 : vector<16x384xf32>
    %cst_126 = arith.constant 1.000000e+00 : f32
    %413 = vector.broadcast %cst_126 : f32 to vector<16x384xf32>
    %414 = arith.divf %413, %412 : vector<16x384xf32>
    %415 = arith.mulf %407, %414 : vector<16x384xf32>
    %416 = arith.truncf %415 : vector<16x384xf32> to vector<16x384xbf16>
    %c0_127 = arith.constant 0 : index
    %c0_128 = arith.constant 0 : index
    %c0_129 = arith.constant 0 : index
    %417 = vector.load %arg18[%c0_127, %c0_128, %c0_129] : memref<1x384x96xbf16, #tpu.memory_space<vmem>>, vector<1x384x96xbf16>
    %418 = vector.shape_cast %417 : vector<1x384x96xbf16> to vector<384x96xbf16>
    %cst_130 = arith.constant dense<0.000000e+00> : vector<16x96xf32>
    %419 = tpu.matmul %416, %418, %cst_130 {dimension_numbers = #tpu.dot_dimension_numbers<[1], [0], [0], [1], [0, 0, 1, 1], [], []>} : vector<16x384xbf16>, vector<384x96xbf16>, vector<16x96xf32> -> vector<16x96xf32>
    %c0_131 = arith.constant 0 : index
    %c0_132 = arith.constant 0 : index
    %c0_133 = arith.constant 0 : index
    %420 = vector.load %arg19[%c0_131, %c0_132, %c0_133] : memref<1x1x96xf32, #tpu.memory_space<vmem>>, vector<1x1x96xf32>
    %421 = vector.shape_cast %420 : vector<1x1x96xf32> to vector<1x96xf32>
    %422 = vector.broadcast %421 : vector<1x96xf32> to vector<16x96xf32>
    %423 = arith.addf %419, %422 : vector<16x96xf32>
    %424 = arith.addf %375, %423 : vector<16x96xf32>
    %c0_134 = arith.constant 0 : index
    %c0_135 = arith.constant 0 : index
    %425 = vector.load %arg23[%c0_134, %c0_135] : memref<16x96xf32, #tpu.memory_space<vmem>>, vector<16x96xf32>
    tpu.vector_store %arg23[%c0_134, %c0_135], %424 {strides = array<i32>} : memref<16x96xf32, #tpu.memory_space<vmem>>, vector<16x96xf32>,
    %c11_i32 = arith.constant 11 : i32
    %426 = arith.cmpi eq, %arg0, %c11_i32 : i32
    %427 = arith.extui %426 : i1 to i32
    %c0_i32_136 = arith.constant 0 : i32
    %428 = arith.cmpi ne, %427, %c0_i32_136 : i32
    scf.if %428 {
      %c0_137 = arith.constant 0 : index
      %c0_138 = arith.constant 0 : index
      %429 = vector.load %arg23[%c0_137, %c0_138] : memref<16x96xf32, #tpu.memory_space<vmem>>, vector<16x96xf32>
      %c0_139 = arith.constant 0 : index
      %c0_140 = arith.constant 0 : index
      %430 = vector.load %arg20[%c0_139, %c0_140] : memref<1x96xf32, #tpu.memory_space<vmem>>, vector<1x96xf32>
      %c0_141 = arith.constant 0 : index
      %c0_142 = arith.constant 0 : index
      %431 = vector.load %arg21[%c0_141, %c0_142] : memref<1x96xf32, #tpu.memory_space<vmem>>, vector<1x96xf32>
      %cst_143 = arith.constant dense<0.000000e+00> : vector<16xf32>
      %432 = vector.multi_reduction <add>, %429, %cst_143 [1] : vector<16x96xf32> to vector<16xf32>
      %433 = vector.shape_cast %432 : vector<16xf32> to vector<16x1xf32>
      %cst_144 = arith.constant 9.600000e+01 : f32
      %434 = vector.broadcast %cst_144 : f32 to vector<16x1xf32>
      %435 = arith.divf %433, %434 : vector<16x1xf32>
      %436 = vector.broadcast %435 : vector<16x1xf32> to vector<16x96xf32>
      %437 = arith.subf %429, %436 : vector<16x96xf32>
      %438 = arith.mulf %437, %437 : vector<16x96xf32>
      %cst_145 = arith.constant dense<0.000000e+00> : vector<16xf32>
      %439 = vector.multi_reduction <add>, %438, %cst_145 [1] : vector<16x96xf32> to vector<16xf32>
      %440 = vector.shape_cast %439 : vector<16xf32> to vector<16x1xf32>
      %cst_146 = arith.constant 9.600000e+01 : f32
      %441 = vector.broadcast %cst_146 : f32 to vector<16x1xf32>
      %442 = arith.divf %440, %441 : vector<16x1xf32>
      %cst_147 = arith.constant 9.99999974E-6 : f32
      %443 = vector.broadcast %cst_147 : f32 to vector<16x1xf32>
      %444 = arith.addf %442, %443 : vector<16x1xf32>
      %445 = math.rsqrt %444 : vector<16x1xf32>
      %446 = vector.broadcast %445 : vector<16x1xf32> to vector<16x96xf32>
      %447 = arith.mulf %437, %446 : vector<16x96xf32>
      %448 = vector.broadcast %430 : vector<1x96xf32> to vector<16x96xf32>
      %449 = arith.mulf %447, %448 : vector<16x96xf32>
      %450 = vector.broadcast %431 : vector<1x96xf32> to vector<16x96xf32>
      %451 = arith.addf %449, %450 : vector<16x96xf32>
      %452 = vector.shape_cast %451 : vector<16x96xf32> to vector<2x8x96xf32>
      %c0_148 = arith.constant 0 : index
      %c0_149 = arith.constant 0 : index
      %c0_150 = arith.constant 0 : index
      %453 = vector.load %arg22[%c0_148, %c0_149, %c0_150] : memref<2x8x96xf32, #tpu.memory_space<vmem>>, vector<2x8x96xf32>
      tpu.vector_store %arg22[%c0_148, %c0_149, %c0_150], %452 {strides = array<i32>} : memref<2x8x96xf32, #tpu.memory_space<vmem>>, vector<2x8x96xf32>,
    } else {
    }
    return
  }
  func.func @transform_0(%arg0: i32) -> (i32, i32, i32) {
    %c0_i32 = arith.constant 0 : i32
    %c0_i32_0 = arith.constant 0 : i32
    %c0_i32_1 = arith.constant 0 : i32
    %c0_i32_2 = arith.constant 0 : i32
    return %c0_i32, %c0_i32_0, %c0_i32_1 : i32, i32, i32
  }
  func.func @transform_1(%arg0: i32) -> (i32, i32) {
    %c0_i32 = arith.constant 0 : i32
    %c0_i32_0 = arith.constant 0 : i32
    %c0_i32_1 = arith.constant 0 : i32
    return %c0_i32, %c0_i32_0 : i32, i32
  }
  func.func @transform_2(%arg0: i32) -> (i32, i32) {
    %c0_i32 = arith.constant 0 : i32
    %c0_i32_0 = arith.constant 0 : i32
    %c0_i32_1 = arith.constant 0 : i32
    return %c0_i32, %c0_i32_0 : i32, i32
  }
  func.func @transform_3(%arg0: i32) -> (i32, i32, i32) {
    %c0_i32 = arith.constant 0 : i32
    %c0_i32_0 = arith.constant 0 : i32
    %c0_i32_1 = arith.constant 0 : i32
    return %arg0, %c0_i32, %c0_i32_0 : i32, i32, i32
  }
  func.func @transform_4(%arg0: i32) -> (i32, i32, i32) {
    %c0_i32 = arith.constant 0 : i32
    %c0_i32_0 = arith.constant 0 : i32
    %c0_i32_1 = arith.constant 0 : i32
    return %arg0, %c0_i32, %c0_i32_0 : i32, i32, i32
  }
  func.func @transform_5(%arg0: i32) -> (i32, i32, i32) {
    %c0_i32 = arith.constant 0 : i32
    %c0_i32_0 = arith.constant 0 : i32
    %c0_i32_1 = arith.constant 0 : i32
    return %arg0, %c0_i32, %c0_i32_0 : i32, i32, i32
  }
  func.func @transform_6(%arg0: i32) -> (i32, i32, i32) {
    %c0_i32 = arith.constant 0 : i32
    %c0_i32_0 = arith.constant 0 : i32
    %c0_i32_1 = arith.constant 0 : i32
    return %arg0, %c0_i32, %c0_i32_0 : i32, i32, i32
  }
  func.func @transform_7(%arg0: i32) -> (i32, i32, i32) {
    %c0_i32 = arith.constant 0 : i32
    %c0_i32_0 = arith.constant 0 : i32
    %c0_i32_1 = arith.constant 0 : i32
    return %arg0, %c0_i32, %c0_i32_0 : i32, i32, i32
  }
  func.func @transform_8(%arg0: i32) -> (i32, i32, i32) {
    %c0_i32 = arith.constant 0 : i32
    %c0_i32_0 = arith.constant 0 : i32
    %c0_i32_1 = arith.constant 0 : i32
    return %arg0, %c0_i32, %c0_i32_0 : i32, i32, i32
  }
  func.func @transform_9(%arg0: i32) -> (i32, i32, i32) {
    %c0_i32 = arith.constant 0 : i32
    %c0_i32_0 = arith.constant 0 : i32
    %c0_i32_1 = arith.constant 0 : i32
    return %arg0, %c0_i32, %c0_i32_0 : i32, i32, i32
  }
  func.func @transform_10(%arg0: i32) -> (i32, i32, i32) {
    %c0_i32 = arith.constant 0 : i32
    %c0_i32_0 = arith.constant 0 : i32
    %c0_i32_1 = arith.constant 0 : i32
    return %arg0, %c0_i32, %c0_i32_0 : i32, i32, i32
  }
  func.func @transform_11(%arg0: i32) -> (i32, i32, i32) {
    %c0_i32 = arith.constant 0 : i32
    %c0_i32_0 = arith.constant 0 : i32
    %c0_i32_1 = arith.constant 0 : i32
    return %arg0, %c0_i32, %c0_i32_0 : i32, i32, i32
  }
  func.func @transform_12(%arg0: i32) -> (i32, i32, i32) {
    %c0_i32 = arith.constant 0 : i32
    %c0_i32_0 = arith.constant 0 : i32
    %c0_i32_1 = arith.constant 0 : i32
    return %arg0, %c0_i32, %c0_i32_0 : i32, i32, i32
  }
  func.func @transform_13(%arg0: i32) -> (i32, i32, i32) {
    %c0_i32 = arith.constant 0 : i32
    %c0_i32_0 = arith.constant 0 : i32
    %c0_i32_1 = arith.constant 0 : i32
    return %arg0, %c0_i32, %c0_i32_0 : i32, i32, i32
  }
  func.func @transform_14(%arg0: i32) -> (i32, i32, i32) {
    %c0_i32 = arith.constant 0 : i32
    %c0_i32_0 = arith.constant 0 : i32
    %c0_i32_1 = arith.constant 0 : i32
    return %arg0, %c0_i32, %c0_i32_0 : i32, i32, i32
  }
  func.func @transform_15(%arg0: i32) -> (i32, i32, i32) {
    %c0_i32 = arith.constant 0 : i32
    %c0_i32_0 = arith.constant 0 : i32
    %c0_i32_1 = arith.constant 0 : i32
    return %arg0, %c0_i32, %c0_i32_0 : i32, i32, i32
  }
  func.func @transform_16(%arg0: i32) -> (i32, i32, i32) {
    %c0_i32 = arith.constant 0 : i32
    %c0_i32_0 = arith.constant 0 : i32
    %c0_i32_1 = arith.constant 0 : i32
    return %arg0, %c0_i32, %c0_i32_0 : i32, i32, i32
  }
  func.func @transform_17(%arg0: i32) -> (i32, i32, i32) {
    %c0_i32 = arith.constant 0 : i32
    %c0_i32_0 = arith.constant 0 : i32
    %c0_i32_1 = arith.constant 0 : i32
    return %arg0, %c0_i32, %c0_i32_0 : i32, i32, i32
  }
  func.func @transform_18(%arg0: i32) -> (i32, i32, i32) {
    %c0_i32 = arith.constant 0 : i32
    %c0_i32_0 = arith.constant 0 : i32
    %c0_i32_1 = arith.constant 0 : i32
    return %arg0, %c0_i32, %c0_i32_0 : i32, i32, i32
  }
  func.func @transform_19(%arg0: i32) -> (i32, i32) {
    %c0_i32 = arith.constant 0 : i32
    %c0_i32_0 = arith.constant 0 : i32
    %c0_i32_1 = arith.constant 0 : i32
    return %c0_i32, %c0_i32_0 : i32, i32
  }
  func.func @transform_20(%arg0: i32) -> (i32, i32) {
    %c0_i32 = arith.constant 0 : i32
    %c0_i32_0 = arith.constant 0 : i32
    %c0_i32_1 = arith.constant 0 : i32
    return %c0_i32, %c0_i32_0 : i32, i32
  }
  func.func @transform_21(%arg0: i32) -> (i32, i32, i32) {
    %c0_i32 = arith.constant 0 : i32
    %c0_i32_0 = arith.constant 0 : i32
    %c0_i32_1 = arith.constant 0 : i32
    %c0_i32_2 = arith.constant 0 : i32
    return %c0_i32, %c0_i32_0, %c0_i32_1 : i32, i32, i32
  }
}

</mosaic_0001>

<bundles_post_ra>
// kernel: tpu_custom_call.1
= control target key start
LH: loop header
LB: loop body
LE: loop exit
PB: predicated region body
PF: predicated region fallthrough
CT: control target
= control target key end

     0   :  { %s7957_s0 = inlined_call_operand.vmem [shape: f32[2,8,96], index: 0, kind: input, shape index: {}]   ;;  %s7958_s1 = inlined_call_operand.hbm [shape: f32[8,96], index: 1, kind: input, shape index: {}]   ;;  %s7959_s2 = inlined_call_operand.hbm [shape: f32[8,8], index: 2, kind: input, shape index: {}]   ;;  %s7960_s3 = inlined_call_operand.hbm [shape: f32[12,1,96], index: 3, kind: input, shape index: {}]   ;;  %s7961_s4 = inlined_call_operand.hbm [shape: f32[12,1,96], index: 4, kind: input, shape index: {}]   ;;  %s7962_s5 = inlined_call_operand.vmem [shape: bf16[12,96,96], index: 5, kind: input, shape index: {}]   ;;  %s7963_s6 = inlined_call_operand.hbm [shape: f32[12,1,96], index: 6, kind: input, shape index: {}]   ;;  %s7964_s7 = inlined_call_operand.vmem [shape: bf16[12,96,96], index: 7, kind: input, shape index: {}]   ;;  %s7965_s8 = inlined_call_operand.hbm [shape: f32[12,1,96], index: 8, kind: input, shape index: {}]   ;;  %s7966_s9 = inlined_call_operand.vmem [shape: bf16[12,96,96], index: 9, kind: input, shape index: {}]   ;;  %s7967_s10 = inlined_call_operand.hbm [shape: f32[12,1,96], index: 10, kind: input, shape index: {}]   ;;  %s7968_s11 = inlined_call_operand.vmem [shape: bf16[12,96,96], index: 11, kind: input, shape index: {}]   ;;  %s7969_s12 = inlined_call_operand.hbm [shape: f32[12,1,96], index: 12, kind: input, shape index: {}]   ;;  %s7970_s13 = inlined_call_operand.hbm [shape: f32[12,1,96], index: 13, kind: input, shape index: {}]   ;;  %s7971_s14 = inlined_call_operand.hbm [shape: f32[12,1,96], index: 14, kind: input, shape index: {}]   ;;  %s7972_s15 = inlined_call_operand.vmem [shape: bf16[12,96,384], index: 15, kind: input, shape index: {}]   ;;  %s7973_s16 = inlined_call_operand.vmem [shape: f32[12,1,384], index: 16, kind: input, shape index: {}]   ;;  %s7974_s17 = inlined_call_operand.vmem [shape: bf16[12,384,96], index: 17, kind: input, shape index: {}]   ;;  %s7975_s18 = inlined_call_operand.vmem [shape: f32[12,1,96], index: 18, kind: input, shape index: {}]   ;;  %s7976_s19 = inlined_call_operand.vmem [shape: f32[1,96], index: 19, kind: input, shape index: {}]   ;;  %s7977_s20 = inlined_call_operand.vmem [shape: f32[1,96], index: 20, kind: input, shape index: {}]   ;;  %s7978_s21 = inlined_call_operand.hbm [shape: f32[2,8,96], index: 21, kind: output, shape index: {}]  }
   0x1   :  { %8001 = sst [smem:[#allocation25_spill]] %s7957_s0 }
   0x2   :  { %8002 = sst [smem:[#allocation26_spill]] %s7958_s1 }
   0x3   :  { %8003 = sst [smem:[#allocation27_spill]] %s7959_s2 }
   0x4   :  { %8004 = sst [smem:[#allocation28_spill]] %s7960_s3 }
   0x5   :  { %8005 = sst [smem:[#allocation29_spill]] %s7961_s4 }
   0x6   :  { %8006 = sst [smem:[#allocation30_spill]] %s7962_s5 }
   0x7   :  { %8007 = sst [smem:[#allocation31_spill]] %s7963_s6 }
   0x8   :  { %8008 = sst [smem:[#allocation32_spill]] %s7964_s7 }
   0x9   :  { %8009 = sst [smem:[#allocation33_spill]] %s7965_s8 }
   0xa   :  { %8010 = sst [smem:[#allocation34_spill]] %s7966_s9 }
   0xb   :  { %8011 = sst [smem:[#allocation35_spill]] %s7967_s10 }
   0xc   :  { %8012 = sst [smem:[#allocation36_spill]] %s7968_s11 }
   0xd   :  { %8013 = sst [smem:[#allocation37_spill]] %s7969_s12 }
   0xe   :  { %8014 = sst [smem:[#allocation38_spill]] %s7970_s13 }
   0xf   :  { %8015 = sst [smem:[#allocation39_spill]] %s7972_s15 }
  0x10   :  { %8016 = sst [smem:[#allocation40_spill]] %s7973_s16 }
  0x11   :  { %8017 = sst [smem:[#allocation41_spill]] %s7974_s17 }
  0x12   :  { %8018 = sst [smem:[#allocation42_spill]] %s7976_s19 }
  0x13   :  { %8019 = sst [smem:[#allocation43_spill]] %s7977_s20 }
  0x14   :  { %8020 = sst [smem:[#allocation44_spill]] %s7978_s21 }
  0x15   :  { %26 = vsyncpa [#allocation5], 0 }
  0x16   :  { %27 = vsyncpa [#allocation8], 0 }
  0x17   :  { %28 = vsyncpa [#allocation6], 0  ;;  %s6762_s2 = smov 0   ;;  %s6764_s25 = smov 0  }
  0x18   :  { %s6766_s26 = smov 0   ;;  %s6768_s27 = smov 0  }
  0x19 LB: > { %8021 = sst [smem:[#allocation22_spill]] %s6616_s26  ;;  %s6781_s3 = sadd.s32 4294967295, %s6620_s27   ;;  %s6620_s27 = sphi %s6768_s27, %s8071_s27   ;;  %s6616_s26 = sphi %s6766_s26, %s8073_s26   ;;  %s6612_s25 = sphi %s6764_s25, %s8075_s25   ;;  %s6608_s2 = sphi %s6762_s2, %s8074_s2  }
  0x1a   : > { %s6784_s28 = sadd.s32 1, %s6620_s27   ;;  %s104_s0 = sadd.s32 1, %s6616_s26 }
  0x1b   : > { %8022 = sst [smem:[#allocation23_spill]] %s6784_s28  ;;  %s101_s29 = ssub.s32 %s6620_s27, %s6784_s28 }
  0x1c   : > { %p102_p0 = scmp.eq.s32.totalorder %s101_s29, 0  ;;  %p111_p1 = scmp.ne.s32.totalorder %s6616_s26, %s6612_s25 }
  0x1d   : > { %p112_p2 = scmp.eq.s32.totalorder %s6620_s27, 0  ;;  %p117_p3 = scmp.ne.s32.totalorder %s6612_s25, %s6608_s2 }
  0x1e   : > { %s6794_s4 = scalar_select %p102_p0, %s6616_s26, %s104_s0  }
  0x1f   : > { %p6796_p4 = por %p112_p2, %p111_p1  ;;  %p7988_p5 = scmp.eq.s32.totalorder %s6781_s3, 0 }
  0x20   : > { %8023 = sst [smem:[#allocation24_spill]] %s6794_s4  ;;  %p5212_p6 = scmp.ge.s32.totalorder %s6620_s27, 1 }
  0x21   : > { %p581_p7 = scmp.lt.s32.totalorder %s6620_s27, 13  ;;  %p6805_p8 = por %p7988_p5, %p117_p3 }
  0x22   : > { %s6622_s23 = smov [#allocation4]   ;;  %p5986_p12 = scmp.lt.s32.totalorder %s6620_s27, 12 }
  0x23   : > { %s8025_s5 = scalar_select %p6805_p8, 1, 0 }
  0x24   : > { %p6810_p10 = pnand %p5212_p6, %p581_p7  ;;  %s597_s1 = sshll.u32 %s6622_s23, 4  ;;  %s598_s1 = int_to_ptr.vmem [resolvable:$true] %s597_s1 }
  0x25   : > { %s6818_s24 = sand.u32 1, %s6616_s26   ;;  %s625_s29 = sand.u32 1, %s6620_s27  }
  0x26   : > { %s8026_s22 = scalar_select %p6810_p10, 1, 0 }
  0x27   : > { %p5952_p11 = pneg %p6810_p10  ;;  %p6829_p0 = pnand %p5986_p12, %p6796_p4 }
  0x28   : > { %s8029_s28 = sld [smem:[#allocation26_spill]] }
  0x29   : > { %p6822_p13 = pnand %p5952_p11, %p7988_p5 }
  0x2a   : > { %s8028_s0 = scalar_select %p6829_p0, 1, 0 }
  0x2b   : > { %s8027_s2 = scalar_select %p6822_p13, 1, 0 }
  0x2c   : > { %p7993_p2 = pneg %p6822_p13 }
  0x2e   : > { %s6252_s21 = scalar_lea.hbm %s8029_s28, 128 }
  0x2f   : > { %p6253_p1 = scmp.ne.s32.totalorder %s8029_s28, %s6252_s21  ;;  %p6259_p4 = scmp.lt.u32.totalorder %s6252_s21, %s8029_s28 }
  0x31   : > { %p6255_p3 = pnand %p7993_p2, %p6253_p1 }
  0x33   : > { %p6256_p6 = pneg %p6255_p3 }
  0x35   : > { %p6261_p7 = pnand %p6259_p4, %p6256_p6 }
  0x37   : > { %6264 = shalt.err (!%p6261_p7)
}
  0x38   : > { %s6265_s17 = scalar_lea.vmem %s598_s1, 128  ;;  %p6273_p5 = scmp.lt.s32.totalorder %s598_s1, %s598_s1 }
  0x39   : > { %p6266_p11 = scmp.ne.s32.totalorder %s598_s1, %s6265_s17  ;;  %p6274_p8 = scmp.lt.s32.totalorder %s6265_s17, %s6265_s17 }
  0x3b   : > { %p6268_p12 = pnand %p6266_p11, %p7993_p2  ;;  %p6275_p10 = por %p6274_p8, %p6273_p5 }
  0x3d   : > { %p6269_p9 = pneg %p6268_p12 }
  0x3f   : > { %p6276_p0 = pnand %p6275_p10, %p6269_p9 }
  0x41   : > { %6279 = shalt.err (!%p6276_p0)
}
  0x42   : > { %5955 = dma.hbm_to_vmem [thread:$0]  (!%p6822_p13), %s8029_s28, 128, %s598_s1, [#allocation5]  }
  0x43   : > { %s6856_s19 = sshll.u32 %s6620_s27, 4  ;;  %s8030_s23 = sld [smem:[#allocation28_spill]] }
  0x44   : > { %s628_s17 = scalar_lea.vmem [#allocation9], %s6818_s24  ;;  %s6867_s20 = scalar_lea.sflag [#allocation5], %s625_s29 }
  0x45   : > { %s635_s16 = sshll.u32 %s628_s17, 4  ;;  %p8031_p8 = scmp.ne.s32.totalorder %s8028_s0, 0  ;;  %s6865_s16 = int_to_ptr.vmem [resolvable:$true] %s635_s16 }
  0x47   : > { %p6873_p9 = pneg %p8031_p8 }
  0x49   : > { %s6862_s30 = scalar_lea.hbm %s8030_s23, %s6856_s19  ;;  %s6285_s4 = scalar_lea.hbm %s8030_s23, 192 }
  0x4a   : > { %s6280_s26 = scalar_lea.hbm %s6862_s30, 16  ;;  %p6286_p1 = scmp.lt.u32.totalorder %s6862_s30, %s8030_s23 }
  0x4b   : > { %p6281_p5 = scmp.ne.s32.totalorder %s6862_s30, %s6280_s26  ;;  %p6287_p3 = scmp.lt.u32.totalorder %s6285_s4, %s6280_s26 }
  0x4c   : > { %s8032_s27 = scalar_select %p6873_p9, 1, 0 }
  0x4d   : > { %p6283_p10 = pnand %p6873_p9, %p6281_p5  ;;  %p6288_p6 = por %p6287_p3, %p6286_p1 }
  0x4e   : > { %p6289_p4 = scmp.lt.u32.totalorder %s6280_s26, %s6862_s30 }
  0x4f   : > { %p6284_p0 = pneg %p6283_p10 }
  0x50   : > { %p6290_p7 = por %p6289_p4, %p6288_p6 }
  0x52   : > { %p6291_p11 = pnand %p6290_p7, %p6284_p0 }
  0x54   : > { %6294 = shalt.err (!%p6291_p11)
}
  0x55   : > { %s6295_s29 = scalar_lea.vmem %s6865_s16, 16  ;;  %s6623_s1 = smov [#allocation9]  }
  0x56   : > { %p6296_p12 = scmp.ne.s32.totalorder %s6865_s16, %s6295_s29  ;;  %s6300_s21 = sshll.u32 %s6623_s1, 4  ;;  %s6301_s21 = int_to_ptr.vmem [resolvable:$false] %s6300_s21 }
  0x57   : > { %s6302_s28 = scalar_lea.vmem %s6301_s21, 32  ;;  %p6303_p2 = scmp.lt.s32.totalorder %s6865_s16, %s6301_s21 }
  0x58   : > { %p6298_p5 = pnand %p6296_p12, %p6873_p9  ;;  %p6304_p13 = scmp.lt.s32.totalorder %s6302_s28, %s6295_s29 }
  0x5a   : > { %p6299_p10 = pneg %p6298_p5  ;;  %p6305_p1 = por %p6304_p13, %p6303_p2 }
  0x5c   : > { %p6306_p3 = pnand %p6305_p1, %p6299_p10 }
  0x5e   : > { %6309 = shalt.err (!%p6306_p3)
}
  0x5f   : > { %5962 = dma.hbm_to_vmem [thread:$0]  (!%p8031_p8), %s6862_s30, 16, %s6865_s16, %s6867_s20  }
  0x60   : > { %s8033_s17 = sld [smem:[#allocation29_spill]]  ;;  %s645_s29 = scalar_lea.vmem [#allocation10], %s6818_s24 }
  0x61   : > { %s652_s21 = sshll.u32 %s645_s29, 4  ;;  %s653_s21 = int_to_ptr.vmem [resolvable:$true] %s652_s21 }
  0x66   : > { %s6901_s1 = scalar_lea.hbm %s8033_s17, %s6856_s19  ;;  %s6315_s16 = scalar_lea.hbm %s8033_s17, 192 }
  0x67   : > { %s6310_s28 = scalar_lea.hbm %s6901_s1, 16  ;;  %p6316_p6 = scmp.lt.u32.totalorder %s6901_s1, %s8033_s17 }
  0x68   : > { %p6311_p13 = scmp.ne.s32.totalorder %s6901_s1, %s6310_s28  ;;  %p6317_p4 = scmp.lt.u32.totalorder %s6315_s16, %s6310_s28 }
  0x69   : > { %p6319_p11 = scmp.lt.u32.totalorder %s6310_s28, %s6901_s1 }
  0x6a   : > { %p6313_p2 = pnand %p6311_p13, %p6873_p9  ;;  %p6318_p7 = por %p6317_p4, %p6316_p6 }
  0x6c   : > { %p6314_p0 = pneg %p6313_p2  ;;  %p6320_p12 = por %p6319_p11, %p6318_p7 }
  0x6e   : > { %p6321_p5 = pnand %p6320_p12, %p6314_p0 }
  0x70   : > { %6324 = shalt.err (!%p6321_p5)
}
  0x71   : > { %s6325_s4 = scalar_lea.vmem %s653_s21, 16  ;;  %s6624_s29 = smov [#allocation10]  }
  0x72   : > { %p6326_p10 = scmp.ne.s32.totalorder %s653_s21, %s6325_s4  ;;  %s6330_s11 = sshll.u32 %s6624_s29, 4  ;;  %s6331_s11 = int_to_ptr.vmem [resolvable:$false] %s6330_s11 }
  0x73   : > { %s6332_s15 = scalar_lea.vmem %s6331_s11, 32  ;;  %p6333_p13 = scmp.lt.s32.totalorder %s653_s21, %s6331_s11 }
  0x74   : > { %p6328_p1 = pnand %p6326_p10, %p6873_p9  ;;  %p6334_p2 = scmp.lt.s32.totalorder %s6332_s15, %s6325_s4 }
  0x76   : > { %p6329_p3 = pneg %p6328_p1  ;;  %p6335_p8 = por %p6334_p2, %p6333_p13 }
  0x78   : > { %p6336_p4 = pnand %p6335_p8, %p6329_p3 }
  0x7a   : > { %6339 = shalt.err (!%p6336_p4)
}
  0x7b   : > { %p8034_p6 = scmp.ne.s32.totalorder %s8028_s0, 0  ;;  %s8035_s6 = sld [smem:[#allocation31_spill]] }
  0x7c   : > { %s670_s11 = scalar_lea.vmem [#allocation11], %s6818_s24 }
  0x7d   : > { %5965 = dma.hbm_to_vmem [thread:$0]  (!%p8034_p6), %s6901_s1, 16, %s653_s21, %s6867_s20  }
  0x7e   : > { %s677_s30 = sshll.u32 %s670_s11, 4  ;;  %s678_s30 = int_to_ptr.vmem [resolvable:$true] %s677_s30 }
  0x81   : > { %s6926_s16 = scalar_lea.hbm %s8035_s6, %s6856_s19  ;;  %s6345_s1 = scalar_lea.hbm %s8035_s6, 192 }
  0x82   : > { %s6340_s26 = scalar_lea.hbm %s6926_s16, 16  ;;  %p6346_p11 = scmp.lt.u32.totalorder %s6926_s16, %s8035_s6 }
  0x83   : > { %p6341_p8 = scmp.ne.s32.totalorder %s6926_s16, %s6340_s26  ;;  %p6347_p12 = scmp.lt.u32.totalorder %s6345_s1, %s6340_s26 }
  0x84   : > { %p6349_p10 = scmp.lt.u32.totalorder %s6340_s26, %s6926_s16 }
  0x85   : > { %p6343_p0 = pnand %p6341_p8, %p6873_p9  ;;  %p6348_p5 = por %p6347_p12, %p6346_p11 }
  0x87   : > { %p6344_p7 = pneg %p6343_p0  ;;  %p6350_p1 = por %p6349_p10, %p6348_p5 }
  0x89   : > { %p6351_p3 = pnand %p6350_p1, %p6344_p7 }
  0x8b   : > { %6354 = shalt.err (!%p6351_p3)
}
  0x8c   : > { %s6355_s23 = scalar_lea.vmem %s678_s30, 16  ;;  %s6625_s28 = smov [#allocation11]  }
  0x8d   : > { %p6356_p13 = scmp.ne.s32.totalorder %s678_s30, %s6355_s23  ;;  %s6360_s11 = sshll.u32 %s6625_s28, 4  ;;  %s6361_s11 = int_to_ptr.vmem [resolvable:$false] %s6360_s11 }
  0x8e   : > { %s6362_s4 = scalar_lea.vmem %s6361_s11, 32  ;;  %p6363_p8 = scmp.lt.s32.totalorder %s678_s30, %s6361_s11 }
  0x8f   : > { %p6358_p2 = pnand %p6356_p13, %p6873_p9  ;;  %p6364_p0 = scmp.lt.s32.totalorder %s6362_s4, %s6355_s23 }
  0x91   : > { %p6359_p4 = pneg %p6358_p2  ;;  %p6365_p6 = por %p6364_p0, %p6363_p8 }
  0x93   : > { %p6366_p11 = pnand %p6365_p6, %p6359_p4 }
  0x95   : > { %6369 = shalt.err (!%p6366_p11)
}
  0x96   : > { %p8036_p12 = scmp.ne.s32.totalorder %s8028_s0, 0  ;;  %s8037_s8 = sld [smem:[#allocation33_spill]] }
  0x97   : > { %s695_s21 = scalar_lea.vmem [#allocation12], %s6818_s24 }
  0x98   : > { %5968 = dma.hbm_to_vmem [thread:$0]  (!%p8036_p12), %s6926_s16, 16, %s678_s30, %s6867_s20  }
  0x99   : > { %s702_s15 = sshll.u32 %s695_s21, 4  ;;  %s703_s15 = int_to_ptr.vmem [resolvable:$true] %s702_s15 }
  0x9c   : > { %s6951_s1 = scalar_lea.hbm %s8037_s8, %s6856_s19  ;;  %s6375_s16 = scalar_lea.hbm %s8037_s8, 192 }
  0x9d   : > { %s6370_s23 = scalar_lea.hbm %s6951_s1, 16  ;;  %p6376_p10 = scmp.lt.u32.totalorder %s6951_s1, %s8037_s8 }
  0x9e   : > { %p6371_p6 = scmp.ne.s32.totalorder %s6951_s1, %s6370_s23  ;;  %p6377_p1 = scmp.lt.u32.totalorder %s6375_s16, %s6370_s23 }
  0x9f   : > { %p6379_p13 = scmp.lt.u32.totalorder %s6370_s23, %s6951_s1 }
  0xa0   : > { %p6373_p7 = pnand %p6371_p6, %p6873_p9  ;;  %p6378_p3 = por %p6377_p1, %p6376_p10 }
  0xa2   : > { %p6374_p5 = pneg %p6373_p7  ;;  %p6380_p2 = por %p6379_p13, %p6378_p3 }
  0xa4   : > { %p6381_p4 = pnand %p6380_p2, %p6374_p5 }
  0xa6   : > { %6384 = shalt.err (!%p6381_p4)
}
  0xa7   : > { %s6385_s26 = scalar_lea.vmem %s703_s15, 16  ;;  %s6626_s29 = smov [#allocation12]  }
  0xa8   : > { %p6386_p8 = scmp.ne.s32.totalorder %s703_s15, %s6385_s26  ;;  %s6390_s21 = sshll.u32 %s6626_s29, 4  ;;  %s6391_s21 = int_to_ptr.vmem [resolvable:$false] %s6390_s21 }
  0xa9   : > { %s6392_s28 = scalar_lea.vmem %s6391_s21, 32  ;;  %p6393_p6 = scmp.lt.s32.totalorder %s703_s15, %s6391_s21 }
  0xaa   : > { %p6388_p0 = pnand %p6386_p8, %p6873_p9  ;;  %p6394_p7 = scmp.lt.s32.totalorder %s6392_s28, %s6385_s26 }
  0xac   : > { %p6389_p11 = pneg %p6388_p0  ;;  %p6395_p12 = por %p6394_p7, %p6393_p6 }
  0xae   : > { %p6396_p1 = pnand %p6395_p12, %p6389_p11 }
  0xb0   : > { %6399 = shalt.err (!%p6396_p1)
}
  0xb1   : > { %p8038_p10 = scmp.ne.s32.totalorder %s8028_s0, 0  ;;  %s8039_s10 = sld [smem:[#allocation35_spill]] }
  0xb2   : > { %s720_s30 = scalar_lea.vmem [#allocation13], %s6818_s24 }
  0xb3   : > { %5971 = dma.hbm_to_vmem [thread:$0]  (!%p8038_p10), %s6951_s1, 16, %s703_s15, %s6867_s20  }
  0xb4   : > { %s727_s4 = sshll.u32 %s720_s30, 4  ;;  %s728_s4 = int_to_ptr.vmem [resolvable:$true] %s727_s4 }
  0xb7   : > { %s6976_s16 = scalar_lea.hbm %s8039_s10, %s6856_s19  ;;  %s6405_s1 = scalar_lea.hbm %s8039_s10, 192 }
  0xb8   : > { %s6400_s26 = scalar_lea.hbm %s6976_s16, 16  ;;  %p6406_p13 = scmp.lt.u32.totalorder %s6976_s16, %s8039_s10 }
  0xb9   : > { %p6401_p12 = scmp.ne.s32.totalorder %s6976_s16, %s6400_s26  ;;  %p6407_p2 = scmp.lt.u32.totalorder %s6405_s1, %s6400_s26 }
  0xba   : > { %p6409_p8 = scmp.lt.u32.totalorder %s6400_s26, %s6976_s16 }
  0xbb   : > { %p6403_p5 = pnand %p6401_p12, %p6873_p9  ;;  %p6408_p4 = por %p6407_p2, %p6406_p13 }
  0xbd   : > { %p6404_p3 = pneg %p6403_p5  ;;  %p6410_p0 = por %p6409_p8, %p6408_p4 }
  0xbf   : > { %p6411_p11 = pnand %p6410_p0, %p6404_p3 }
  0xc1   : > { %6414 = shalt.err (!%p6411_p11)
}
  0xc2   : > { %s6415_s23 = scalar_lea.vmem %s728_s4, 16  ;;  %s6627_s11 = smov [#allocation13]  }
  0xc3   : > { %p6416_p6 = scmp.ne.s32.totalorder %s728_s4, %s6415_s23  ;;  %s6420_s30 = sshll.u32 %s6627_s11, 4  ;;  %s6421_s30 = int_to_ptr.vmem [resolvable:$false] %s6420_s30 }
  0xc4   : > { %s6422_s29 = scalar_lea.vmem %s6421_s30, 32  ;;  %p6423_p12 = scmp.lt.s32.totalorder %s728_s4, %s6421_s30 }
  0xc5   : > { %p6418_p7 = pnand %p6416_p6, %p6873_p9  ;;  %p6424_p5 = scmp.lt.s32.totalorder %s6422_s29, %s6415_s23 }
  0xc7   : > { %p6419_p1 = pneg %p6418_p7  ;;  %p6425_p10 = por %p6424_p5, %p6423_p12 }
  0xc9   : > { %p6426_p2 = pnand %p6425_p10, %p6419_p1 }
  0xcb   : > { %6429 = shalt.err (!%p6426_p2)
}
  0xcc   : > { %p8040_p13 = scmp.ne.s32.totalorder %s8028_s0, 0  ;;  %s8041_s12 = sld [smem:[#allocation37_spill]] }
  0xcd   : > { %s745_s15 = scalar_lea.vmem [#allocation14], %s6818_s24 }
  0xce   : > { %5974 = dma.hbm_to_vmem [thread:$0]  (!%p8040_p13), %s6976_s16, 16, %s728_s4, %s6867_s20  }
  0xcf   : > { %s752_s28 = sshll.u32 %s745_s15, 4  ;;  %s753_s28 = int_to_ptr.vmem [resolvable:$true] %s752_s28 }
  0xd2   : > { %s7001_s1 = scalar_lea.hbm %s8041_s12, %s6856_s19  ;;  %s6435_s16 = scalar_lea.hbm %s8041_s12, 192 }
  0xd3   : > { %s6430_s23 = scalar_lea.hbm %s7001_s1, 16  ;;  %p6436_p8 = scmp.lt.u32.totalorder %s7001_s1, %s8041_s12 }
  0xd4   : > { %p6431_p10 = scmp.ne.s32.totalorder %s7001_s1, %s6430_s23  ;;  %p6437_p0 = scmp.lt.u32.totalorder %s6435_s16, %s6430_s23 }
  0xd5   : > { %p6439_p6 = scmp.lt.u32.totalorder %s6430_s23, %s7001_s1 }
  0xd6   : > { %p6433_p3 = pnand %p6431_p10, %p6873_p9  ;;  %p6438_p11 = por %p6437_p0, %p6436_p8 }
  0xd8   : > { %p6434_p4 = pneg %p6433_p3  ;;  %p6440_p7 = por %p6439_p6, %p6438_p11 }
  0xda   : > { %p6441_p1 = pnand %p6440_p7, %p6434_p4 }
  0xdc   : > { %6444 = shalt.err (!%p6441_p1)
}
  0xdd   : > { %s6445_s26 = scalar_lea.vmem %s753_s28, 16  ;;  %s6628_s21 = smov [#allocation14]  }
  0xde   : > { %p6446_p12 = scmp.ne.s32.totalorder %s753_s28, %s6445_s26  ;;  %s6450_s15 = sshll.u32 %s6628_s21, 4  ;;  %s6451_s15 = int_to_ptr.vmem [resolvable:$false] %s6450_s15 }
  0xdf   : > { %s6452_s11 = scalar_lea.vmem %s6451_s15, 32  ;;  %p6453_p10 = scmp.lt.s32.totalorder %s753_s28, %s6451_s15 }
  0xe0   : > { %p6448_p5 = pnand %p6446_p12, %p6873_p9  ;;  %p6454_p3 = scmp.lt.s32.totalorder %s6452_s11, %s6445_s26 }
  0xe2   : > { %p6449_p2 = pneg %p6448_p5  ;;  %p6455_p13 = por %p6454_p3, %p6453_p10 }
  0xe4   : > { %p6456_p0 = pnand %p6455_p13, %p6449_p2 }
  0xe6   : > { %6459 = shalt.err (!%p6456_p0)
}
  0xe7   : > { %p8042_p8 = scmp.ne.s32.totalorder %s8028_s0, 0  ;;  %s8043_s13 = sld [smem:[#allocation38_spill]] }
  0xe8   : > { %s762_s4 = scalar_lea.vmem [#allocation15], %s6818_s24 }
  0xe9   : > { %5977 = dma.hbm_to_vmem [thread:$0]  (!%p8042_p8), %s7001_s1, 16, %s753_s28, %s6867_s20  }
  0xea   : > { %s769_s29 = sshll.u32 %s762_s4, 4  ;;  %s770_s29 = int_to_ptr.vmem [resolvable:$true] %s769_s29 }
  0xed   : > { %s7026_s16 = scalar_lea.hbm %s8043_s13, %s6856_s19  ;;  %s6465_s1 = scalar_lea.hbm %s8043_s13, 192 }
  0xee   : > { %s6460_s26 = scalar_lea.hbm %s7026_s16, 16  ;;  %p6466_p6 = scmp.lt.u32.totalorder %s7026_s16, %s8043_s13 }
  0xef   : > { %p6461_p13 = scmp.ne.s32.totalorder %s7026_s16, %s6460_s26  ;;  %p6467_p7 = scmp.lt.u32.totalorder %s6465_s1, %s6460_s26 }
  0xf0   : > { %p6469_p12 = scmp.lt.u32.totalorder %s6460_s26, %s7026_s16 }
  0xf1   : > { %p6463_p4 = pnand %p6461_p13, %p6873_p9  ;;  %p6468_p1 = por %p6467_p7, %p6466_p6 }
  0xf3   : > { %p6464_p11 = pneg %p6463_p4  ;;  %p6470_p5 = por %p6469_p12, %p6468_p1 }
  0xf5   : > { %p6471_p2 = pnand %p6470_p5, %p6464_p11 }
  0xf7   : > { %6474 = shalt.err (!%p6471_p2)
}
  0xf8   : > { %s6475_s23 = scalar_lea.vmem %s770_s29, 16  ;;  %s6629_s30 = smov [#allocation15]  }
  0xf9   : > { %p6476_p10 = scmp.ne.s32.totalorder %s770_s29, %s6475_s23  ;;  %s6480_s4 = sshll.u32 %s6629_s30, 4  ;;  %s6481_s4 = int_to_ptr.vmem [resolvable:$false] %s6480_s4 }
  0xfa   : > { %s6482_s21 = scalar_lea.vmem %s6481_s4, 32  ;;  %p6483_p13 = scmp.lt.s32.totalorder %s770_s29, %s6481_s4 }
  0xfb   : > { %p6478_p3 = pnand %p6476_p10, %p6873_p9  ;;  %p6484_p4 = scmp.lt.s32.totalorder %s6482_s21, %s6475_s23 }
  0xfd   : > { %p6479_p0 = pneg %p6478_p3  ;;  %p6485_p8 = por %p6484_p4, %p6483_p13 }
  0xff   : > { %p6486_p6 = pnand %p6485_p8, %p6479_p0 }
 0x101   : > { %6489 = shalt.err (!%p6486_p6)
}
 0x102   : > { %p8044_p7 = scmp.ne.s32.totalorder %s8028_s0, 0  ;;  %s6630_s26 = smov [#allocation7]  }
 0x103   : > { %s608_s15 = sshll.u32 %s6630_s26, 4  ;;  %s7051_s11 = scalar_lea.hbm %s7971_s14, %s6856_s19  ;;  %s609_s15 = int_to_ptr.vmem [resolvable:$true] %s608_s15 }
 0x104   : > { %5980 = dma.hbm_to_vmem [thread:$0]  (!%p8044_p7), %s7026_s16, 16, %s770_s29, %s6867_s20  }
 0x105   : > { %s8045_s4 = sld [smem:[#allocation27_spill]]  ;;  %p8046_p11 = scmp.ne.s32.totalorder %s8027_s2, 0 }
 0x107   : > { %p8047_p1 = pneg %p8046_p11 }
 0x10b   : > { %s6490_s21 = scalar_lea.hbm %s8045_s4, 128 }
 0x10c   : > { %p6491_p8 = scmp.ne.s32.totalorder %s8045_s4, %s6490_s21  ;;  %p6497_p2 = scmp.lt.u32.totalorder %s6490_s21, %s8045_s4 }
 0x10e   : > { %p6493_p12 = pnand %p6491_p8, %p8047_p1 }
 0x110   : > { %p6494_p5 = pneg %p6493_p12 }
 0x112   : > { %p6499_p10 = pnand %p6497_p2, %p6494_p5 }
 0x114   : > { %6502 = shalt.err (!%p6499_p10)
}
 0x115   : > { %s6503_s19 = scalar_lea.vmem %s609_s15, 128  ;;  %p8048_p0 = pmov %p8047_p1 }
 0x116   : > { %p6504_p3 = scmp.ne.s32.totalorder %s609_s15, %s6503_s19  ;;  %p6511_p6 = scmp.lt.s32.totalorder %s609_s15, %s609_s15 }
 0x117   : > { %p6512_p7 = scmp.lt.s32.totalorder %s6503_s19, %s6503_s19 }
 0x118   : > { %p6506_p13 = pnand %p6504_p3, %p8048_p0 }
 0x119   : > { %p6513_p9 = por %p6512_p7, %p6511_p6 }
 0x11a   : > { %p6507_p4 = pneg %p6506_p13 }
 0x11c   : > { %p6514_p1 = pnand %p6513_p9, %p6507_p4 }
 0x11e   : > { %6517 = shalt.err (!%p6514_p1)
}
 0x11f   : > { %5958 = dma.hbm_to_vmem [thread:$0]  (!%p8046_p11), %s8045_s4, 128, %s609_s15, [#allocation8]  }
 0x120   : > { %s779_s26 = scalar_lea.vmem [#allocation16], %s6818_s24  ;;  %s6518_s28 = scalar_lea.hbm %s7051_s11, 16 }
 0x121   : > { %s786_s1 = sshll.u32 %s779_s26, 4  ;;  %p6519_p8 = scmp.ne.s32.totalorder %s7051_s11, %s6518_s28  ;;  %s787_s1 = int_to_ptr.vmem [resolvable:$true] %s786_s1 }
 0x122   : > { %p8049_p7 = scmp.ne.s32.totalorder %s8032_s27, 0  ;;  %s6523_s23 = scalar_lea.hbm %s7971_s14, 192 }
 0x123   : > { %p6524_p5 = scmp.lt.u32.totalorder %s7051_s11, %s7971_s14  ;;  %p6525_p2 = scmp.lt.u32.totalorder %s6523_s23, %s6518_s28 }
 0x124   : > { %p6521_p9 = pnand %p6519_p8, %p8049_p7  ;;  %p6527_p3 = scmp.lt.u32.totalorder %s6518_s28, %s7051_s11 }
 0x125   : > { %p6526_p10 = por %p6525_p2, %p6524_p5 }
 0x126   : > { %p6522_p12 = pneg %p6521_p9 }
 0x127   : > { %p6528_p11 = por %p6527_p3, %p6526_p10 }
 0x129   : > { %p6529_p0 = pnand %p6528_p11, %p6522_p12 }
 0x12b   : > { %6532 = shalt.err (!%p6529_p0)
}
 0x12c   : > { %s6533_s24 = scalar_lea.vmem %s787_s1, 16  ;;  %s6631_s15 = smov [#allocation16]  }
 0x12d   : > { %p6534_p13 = scmp.ne.s32.totalorder %s787_s1, %s6533_s24  ;;  %s6538_s29 = sshll.u32 %s6631_s15, 4  ;;  %s6539_s29 = int_to_ptr.vmem [resolvable:$false] %s6538_s29 }
 0x12e   : > { %s6540_s19 = scalar_lea.vmem %s6539_s29, 32  ;;  %p6541_p1 = scmp.lt.s32.totalorder %s787_s1, %s6539_s29 }
 0x12f   : > { %p6536_p4 = pnand %p6534_p13, %p8049_p7  ;;  %p6542_p8 = scmp.lt.s32.totalorder %s6540_s19, %s6533_s24 }
 0x131   : > { %p6537_p6 = pneg %p6536_p4  ;;  %p6543_p9 = por %p6542_p8, %p6541_p1 }
 0x133   : > { %p6544_p2 = pnand %p6543_p9, %p6537_p6 }
 0x135   : > { %6547 = shalt.err (!%p6544_p2)
}
 0x136   : > { %p8050_p5 = scmp.ne.s32.totalorder %s8028_s0, 0  ;;  %p8051_p12 = scmp.ne.s32.totalorder %s8026_s22, 0 }
 0x137   : > { %p8052_p7 = scmp.eq.s32.totalorder (!%p8051_p12), %s6781_s3, 0 }
 0x138   : > { %5983 = dma.hbm_to_vmem [thread:$0]  (!%p8050_p5), %s7051_s11, 16, %s787_s1, %s6867_s20  }
 0x139   : > { %824 = sbr.rel (%p8051_p12) target bundleno = 9077 (0x2375), region = 104 }
 0x140   : > { %6591 = dma.done.wait (%p8052_p7), [#allocation5], 128   ;;  %p8053_p10 = pmov %p8052_p7 }
 0x141   : > { %p8054_p3 = pmov %p8052_p7 }
 0x142   : > { %6593 = vsyncadd (%p8053_p10), [#allocation5], 4294967168 }
 0x143   : > { %6595 = dma.done.wait (%p8054_p3), [#allocation8], 128   ;;  %p8055_p11 = pmov %p8054_p3 }
 0x144   : > { %s834_s0 = sand.u32 1, %s6781_s3   ;;  %s7104_s20 = sand.u32 1, %s6612_s25  }
 0x145   : > { %6597 = vsyncadd (%p8055_p11), [#allocation8], 4294967168  ;;  %s835_s22 = scalar_lea.sflag [#allocation5], %s834_s0  ;;  %p8056_p0 = scmp.ne.s32.totalorder %s8025_s5, 0 }
 0x147   : > { %6599 = dma.done.wait (%p8056_p0), %s835_s22, 128  }
 0x148   : > { %6601 = vsyncadd (%p8056_p0), %s835_s22, 4294967168  ;;  %p1011_p13 = scmp.lt.s32.totalorder %s6781_s3, 11  ;;  %s8057_s2 = sld [smem:[#allocation30_spill]] }
 0x149   : > { %s8058_s7 = sld [smem:[#allocation32_spill]]  ;;  %s8059_s9 = sld [smem:[#allocation34_spill]] }
 0x14a   : > { %s7113_s11 = scalar_select %p1011_p13, %s6781_s3, 11 }
 0x14b   : > { %s8060_s8 = sld [smem:[#allocation36_spill]]  ;;  %s8061_s30 = sld [smem:[#allocation39_spill]] }
 0x14c   : > { %s5920_s6 = smul.u32 48, %s7113_s11  ;;  %s845_s0 = scalar_lea.vmem [#allocation10], %s7104_s20 }
 0x14d   : > { %s5921_s1 = smul.u32 144, %s7113_s11  ;;  %s861_s22 = scalar_lea.vmem [#allocation12], %s7104_s20 }
 0x14e   : > { %s7124_s23 = scalar_lea.vmem %s8057_s2, %s5920_s6  ;;  %s5922_s27 = smul.u32 3, %s7113_s11 }
 0x14f   : > { %s7129_s24 = scalar_lea.vmem %s8058_s7, %s5920_s6  ;;  %s7134_s19 = scalar_lea.vmem %s8059_s9, %s5920_s6 }
 0x150   : > { %s5923_s4 = smul.u32 192, %s7113_s11  ;;  %s8062_s7 = sld [smem:[#allocation40_spill]] }
 0x151   : > { %s7139_s26 = scalar_lea.vmem %s8060_s8, %s5920_s6  ;;  %s7144_s2 = scalar_lea.vmem %s8061_s30, %s5921_s1 }
 0x152   : > { %s8063_s9 = sld [smem:[#allocation41_spill]]  ;;  %s853_s6 = scalar_lea.vmem [#allocation11], %s7104_s20 }
 0x153   : > { %s869_s8 = scalar_lea.vmem [#allocation13], %s7104_s20  ;;  %s877_s13 = scalar_lea.vmem [#allocation14], %s7104_s20 }
 0x154   : > { %s885_s5 = scalar_lea.vmem [#allocation15], %s7104_s20  ;;  %s893_s1 = scalar_lea.vmem [#allocation16], %s7104_s20 }
 0x155   : > { %p8064_p4 = scmp.ne.s32.totalorder %s6781_s3, 0 }
 0x156   : > { %s7151_s10 = scalar_lea.vmem %s8062_s7, %s5922_s27  ;;  %s8065_s21 = sld [smem:[#allocation25_spill]] (!%p8064_p4)  ;;  %v1055_v1 = vld [vmem:[#allocation4] sm:$0xff] (!%p8064_p4)  ;;  %vm1058_vm0 = vcmask (!%p8064_p4), 785408  }
 0x157   : > { %1052 = sbr.rel (%p8064_p4) target bundleno = 352 (0x160), region = 148 }
 0x158   : > { %s7156_s12 = scalar_lea.vmem %s8063_s9, %s5923_s4 }
 0x15c   : > { %v1053_v0 = vld [vmem:[%s8065_s21] sm:$0xff] (!%p8064_p4)  ;;  %v1054_v2 = vld [vmem:[%s8065_s21 + $0x8] sm:$0xff] (!%p8064_p4) }
 0x15d   : > { %v1056_v3 = vadd.f32 (!%p8064_p4), %v1055_v1, %v1053_v0  ;;  %v1057_v4 = vadd.f32 (!%p8064_p4), %v1055_v1, %v1054_v2 }
 0x15f   : > { %1059 = vst.msk [vmem:[#allocation2] sm:$0xff] %vm1058_vm0, %v1056_v3  ;;  %1060 = vst.msk [vmem:[#allocation2 + $0x8] sm:$0xff] %vm1058_vm0, %v1057_v4 }
 0x160 PF: > { %vm1065_vm1 = vcmask 785408   ;;  %v6045_v19 = vld [vmem:[%s7124_s23] sm:$0xff]   ;;  %v6632_v20 = vmov 0.0   ;;  %v6047_v22 = vld [vmem:[%s7124_s23 + $0x8] sm:$0xff]   ;;  %v6049_v24 = vld [vmem:[%s7124_s23 + $0x10] sm:$0xff]   ;;  %vm6633_vm2 = vmmov 0  }
 0x161   : > { %5532 = vmatprep.subr.bf16.mxu0 %v6632_v20  ;;  %5548 = vmatprep.subr.bf16.mxu1 %v6632_v20  ;;  %v6046_v21 = vld [vmem:[%s7129_s24] sm:$0xff]   ;;  %v6048_v23 = vld [vmem:[%s7129_s24 + $0x8] sm:$0xff]   ;;  %v6050_v25 = vld [vmem:[%s7129_s24 + $0x10] sm:$0xff]   ;;  %s8066_s9 = scalar_lea.vmem [#allocation9], %s7104_s20  ;;  %vm1410_vm3 = vcmask 64512   ;;  %vm1530_vm4 = vcmask 1043456  }
 0x162   : > { %5533 = vmatpush3.bf16.msra.mxu0 %v6045_v19  ;;  %5549 = vmatpush3.bf16.msra.mxu1 %v6046_v21  ;;  %v6051_v26 = vld [vmem:[%s7124_s23 + $0x18] sm:$0xff]   ;;  %v6053_v28 = vld [vmem:[%s7124_s23 + $0x20] sm:$0xff]   ;;  %v6055_v30 = vld [vmem:[%s7124_s23 + $0x28] sm:$0xff]   ;;  %s6634_s4 = smov 120   ;;  %s6635_s23 = smov 112   ;;  %vm1856_vm5 = vcmask 130112  }
 0x163   : > { %5534 = vmatprep.subr.bf16.mxu0 %v6632_v20  ;;  %5550 = vmatprep.subr.bf16.mxu1 %v6632_v20  ;;  %v6052_v27 = vld [vmem:[%s7129_s24 + $0x18] sm:$0xff]   ;;  %v6054_v29 = vld [vmem:[%s7129_s24 + $0x20] sm:$0xff]   ;;  %v6056_v31 = vld [vmem:[%s7129_s24 + $0x28] sm:$0xff]   ;;  %s6636_s24 = smov 104   ;;  %s6638_s16 = smov 88   ;;  %vm2087_vm6 = vcmask 195712  }
 0x164   : > { %5544 = vmatprep.mubr.msk.bf16.mxu0 %vm6633_vm2, %v6632_v20  ;;  %5560 = vmatprep.mubr.msk.bf16.mxu1 %vm6633_vm2, %v6632_v20  ;;  %v5234_v40 = vld [vmem:[%s8066_s9] ss:$0 sm:$0xff]  ;;  %v6058_v50 = vld [vmem:[%s7134_s19 + $0x8] sm:$0xff]   ;;  %v6059_v51 = vld [vmem:[%s7134_s19 + $0x10] sm:$0xff]   ;;  %s6639_s15 = smov 80   ;;  %s6640_s29 = smov 72  }
 0x165   : > { %v5235_v44 = vld [vmem:[%s845_s0] ss:$0 sm:$0xff]  ;;  %v6060_v52 = vld [vmem:[%s7134_s19 + $0x18] sm:$0xff]   ;;  %v6062_v54 = vld [vmem:[%s7134_s19 + $0x28] sm:$0xff]   ;;  %s6641_s0 = smov 64   ;;  %s6645_s28 = smov 8  }
 0x166   : > { %v1061_v5 = vld [vmem:[#allocation2] sm:$0xff]  ;;  %v1062_v6 = vld [vmem:[#allocation2 + $0x8] sm:$0xff]  ;;  %5535 = vmatpush3.bf16.msra.mxu0 %v6047_v22  ;;  %5551 = vmatpush3.bf16.msra.mxu1 %v6048_v23  ;;  %s6646_s30 = smov 16   ;;  %s6647_s7 = smov 24   ;;  %vm2318_vm7 = vcmask 261312   ;;  %vm2549_vm8 = vcmask 326912  }
 0x167   : > { %v1066_v7 = vsel %vm1065_vm1, %v1061_v5, 0.0  ;;  %v1069_v8 = vsel %vm1065_vm1, %v1062_v6, 0.0  ;;  %5536 = vmatprep.subr.bf16.mxu0 %v6632_v20  ;;  %5552 = vmatprep.subr.bf16.mxu1 %v6632_v20  ;;  %v6057_v48 = vld [vmem:[%s7134_s19] sm:$0xff]   ;;  %s6648_s27 = smov 32   ;;  %vm2780_vm9 = vcmask 392512   ;;  %vm3011_vm10 = vcmask 458112  }
 0x168   : > { %1067 = vadd.xlane.f32.xlu0 %v1066_v7  ;;  %v6061_v53 = vld [vmem:[%s7134_s19 + $0x20] sm:$0xff]   ;;  %s6637_s19 = smov 96   ;;  %vm3242_vm11 = vcmask 523712   ;;  %vm3473_vm12 = vcmask 589312   ;;  %vm3704_vm13 = vcmask 654912   ;;  %vm3935_vm14 = vcmask 720512  }
 0x169   : > { %v5244_v55 = vld [vmem:[%s861_s22] ss:$0 sm:$0xff]  ;;  %s6643_s22 = smov 48   ;;  %vm4166_vm15 = vcmask 786112   ;;  %p5363_p6 = scmp.ne.s32.totalorder %s6781_s3, 11 }
 0x16a   : > { %5537 = vmatpush3.bf16.msra.mxu0 %v6049_v24  ;;  %5553 = vmatpush3.bf16.msra.mxu1 %v6050_v25  ;;  %v5236_v56 = vld [vmem:[%s853_s6] ss:$0 sm:$0xff]  ;;  %v7270_v25 = vld [vmem:[#allocation7] sm:$0xff]  ;;  %s6642_s6 = smov 56  }
 0x16b   : > { %5538 = vmatprep.subr.bf16.mxu0 %v6632_v20  ;;  %5554 = vmatprep.subr.bf16.mxu1 %v6632_v20 }
 0x16c   : > { %1070 = vadd.xlane.f32.xlu0 %v1069_v8 }
 0x16e   : > { %5539 = vmatpush3.bf16.msra.mxu0 %v6051_v26  ;;  %5555 = vmatpush3.bf16.msra.mxu1 %v6052_v27 }
 0x16f   : > { %5540 = vmatprep.subr.bf16.mxu0 %v6632_v20  ;;  %5556 = vmatprep.subr.bf16.mxu1 %v6632_v20 }
 0x172   : > { %5541 = vmatpush3.bf16.msra.mxu0 %v6053_v28  ;;  %5557 = vmatpush3.bf16.msra.mxu1 %v6054_v29 }
 0x173   : > { %5542 = vmatprep.subr.bf16.mxu0 %v6632_v20  ;;  %5558 = vmatprep.subr.bf16.mxu1 %v6632_v20 }
 0x176   : > { %5543 = vmatpush3.bf16.msra.mxu0 %v6055_v30  ;;  %5559 = vmatpush3.bf16.msra.mxu1 %v6056_v31 }
 0x177   : > { %5564 = vmatprep.subr.bf16.mxu0 %v6632_v20  ;;  %5586 = vmatprep.subr.bf16.mxu1 %v6632_v20 }
 0x1f5   : > { %v1068_v9 = vpop.xlane.xlu0 %1067 }
 0x1f6   : > { %v1073_v10 = vmul.f32 0.010416667, %v1068_v9 }
 0x1f8   : > { %v1075_v11 = vsub.f32 %v1061_v5, %v1073_v10 }
 0x1f9   : > { %v1071_v12 = vpop.xlane.xlu0 %1070 }
 0x1fa   : > { %v1074_v13 = vmul.f32 0.010416667, %v1071_v12  ;;  %v1077_v14 = vmul.f32 %v1075_v11, %v1075_v11 }
 0x1fc   : > { %v1076_v15 = vsub.f32 %v1062_v6, %v1074_v13  ;;  %v1079_v16 = vsel %vm1065_vm1, %v1077_v14, 0.0  ;;  %v5252_v13 = vld [vmem:[%s869_s8] ss:$0 sm:$0xff]  ;;  %s6644_s8 = smov 40  }
 0x1fd   : > { %1080 = vadd.xlane.f32.xlu1 %v1079_v16 }
 0x1fe   : > { %v1078_v17 = vmul.f32 %v1076_v15, %v1076_v15 }
 0x200   : > { %v1082_v18 = vsel %vm1065_vm1, %v1078_v17, 0.0 }
 0x201   : > { %1083 = vadd.xlane.f32.xlu1 %v1082_v18 }
 0x28a   : > { %v1081_v32 = vpop.xlane.xlu1 %1080 }
 0x28b   : > { %v1085_v33 = vmul.f32 0.010416667, %v1081_v32 }
 0x28d   : > { %v1087_v34 = vadd.f32 1e-05, %v1085_v33 }
 0x28e   : > { %v1084_v35 = vpop.xlane.xlu1 %1083 }
 0x28f   : > { %6117 = vrsqrt.f32 %v1087_v34  ;;  %v1086_v36 = vmul.f32 0.010416667, %v1084_v35 }
 0x291   : > { %v1088_v37 = vadd.f32 1e-05, %v1086_v36 }
 0x293   : > { %6119 = vrsqrt.f32 %v1088_v37 }
 0x299   : > { %v6118_v38 = vpop.eup %6117 }
 0x29a   : > { %v1091_v39 = vmul.f32 %v6118_v38, %v1075_v11 }
 0x29c   : > { %v1099_v43 = vmul.f32 %v5234_v40, %v1091_v39 }
 0x29d   : > { %v6120_v41 = vpop.eup %6119 }
 0x29e   : > { %v1092_v42 = vmul.f32 %v6120_v41, %v1076_v15  ;;  %v1107_v46 = vadd.f32 %v5235_v44, %v1099_v43 }
 0x2a0   : > { %v1100_v45 = vmul.f32 %v5234_v40, %v1092_v42 }
 0x2a2   : > { %v1108_v47 = vadd.f32 %v5235_v44, %v1100_v45 }
 0x2a4   : > { %v1109_v49 = vpack.c.bf16 %v1108_v47, %v1107_v46 }
 0x2a6   : > { %5545 = vmatmul.mubr.msk.bf16.vlgmr.msra.gmra.mrb[0].mxu0 %vm1065_vm1, %v1109_v49  ;;  %5561 = vmatmul.mubr.msk.bf16.vlgmr.msra.gmra.mrb[0].mxu1 %vm1065_vm1, %v1109_v49 }
 0x2a7   : > { %5565 = vmatpush3.bf16.msra.mxu0 %v6057_v48  ;;  %5576 = vmatprep.mubr.msk.bf16.mxu0 %vm6633_vm2, %v6632_v20 }
 0x2a8   : > { %5566 = vmatprep.subr.bf16.mxu0 %v6632_v20  ;;  %5588 = vmatprep.mubr.msk.bf16.mxu1 %vm6633_vm2, %v6632_v20 }
 0x2ab   : > { %5567 = vmatpush3.bf16.msra.mxu0 %v6058_v50 }
 0x2ac   : > { %5568 = vmatprep.subr.bf16.mxu0 %v6632_v20 }
 0x2af   : > { %5569 = vmatpush3.bf16.msra.mxu0 %v6059_v51 }
 0x2b0   : > { %5570 = vmatprep.subr.bf16.mxu0 %v6632_v20 }
 0x2b3   : > { %5571 = vmatpush3.bf16.msra.mxu0 %v6060_v52 }
 0x2b4   : > { %5572 = vmatprep.subr.bf16.mxu0 %v6632_v20 }
 0x2b7   : > { %5573 = vmatpush3.bf16.msra.mxu0 %v6061_v53 }
 0x2b8   : > { %5574 = vmatprep.subr.bf16.mxu0 %v6632_v20 }
 0x2bb   : > { %5575 = vmatpush3.bf16.msra.mxu0 %v6062_v54 }
 0x2bc   : > { %5580 = vmatprep.subr.bf16.mxu0 %v6632_v20 }
 0x2be   : > { %5577 = vmatmul.mubr.msk.bf16.vlgmr.msra.gmra.mrb[4].mxu0 %vm1065_vm1, %v1109_v49 }
 0x2bf   : > { %5582 = vmatprep.mubr.msk.bf16.mxu0 %vm6633_vm2, %v6632_v20 }
 0x379   : > { %v1202_v57 = vpop.f32.mrb[0].mxu0  ;;  %v1298_v58 = vpop.f32.mrb[0].mxu1 }
 0x37a   : > { %v1299_v59 = vadd.f32 %v5244_v55, %v1298_v58  ;;  %v5546_v60 = vpop.f32.mrb[1].mxu0  ;;  %v5562_v61 = vpop.f32.mrb[1].mxu1  ;;  %v1203_v0 = vadd.f32 %v5236_v56, %v1202_v57 }
 0x37b   : > { %v1205_v62 = vpop.f32.mrb[2].mxu0  ;;  %v1301_v63 = vpop.f32.mrb[2].mxu1 }
 0x37c   : > { %v7236_v1 = vpack.c.bf16 %v1299_v59, %v1299_v59  ;;  %v1302_v2 = vadd.f32 %v5244_v55, %v1301_v63  ;;  %v5547_v3 = vpop.f32.mrb[3].mxu0  ;;  %v5563_v4 = vpop.f32.mrb[3].mxu1  ;;  %v1206_v5 = vadd.f32 %v5236_v56, %v1205_v62  ;;  %v1401_v8 = vmul.f32 0.35355338, %v1203_v0 }
 0x37e   : > { %v7238_v6 = vpack.c.bf16 %v1302_v2, %v1302_v2  ;;  %v1415_v7 = vsel %vm1410_vm3, %v7236_v1, 0  ;;  %v1402_v10 = vmul.f32 0.35355338, %v1206_v5  ;;  %v7246_v11 = vpack.c.bf16 %v1401_v8, %v1401_v8 }
 0x37f   : > { %5581 = vmatpush3.bf16.xpose.msra.mxu0 %v1415_v7 }
 0x380   : > { %v1461_v9 = vsel %vm1410_vm3, %v7238_v6, 0  ;;  %5598 = vmatprep.subr.bf16.mxu0 %v6632_v20  ;;  %v7248_v12 = vpack.c.bf16 %v1402_v10, %v1402_v10 }
 0x381   : > { %5587 = vmatpush3.bf16.xpose.msra.mxu1 %v1461_v9 }
 0x382   : > { %5592 = vmatprep.subr.bf16.mxu1 %v6632_v20 }
 0x386   : > { %5583 = vmatmul.mubr.msk.bf16.vlgmr.msra.gmra.mrb[8].mxu0 %vm1410_vm3, %v7246_v11 }
 0x387   : > { %5600 = vmatprep.mubr.msk.bf16.mxu0 %vm6633_vm2, %v6632_v20 }
 0x388   : > { %5589 = vmatmul.mubr.msk.bf16.vlgmr.msra.gmra.mrb[4].mxu1 %vm1410_vm3, %v7248_v12 }
 0x389   : > { %5594 = vmatprep.mubr.msk.bf16.mxu1 %vm6633_vm2, %v6632_v20 }
 0x391   : > { %v1394_v14 = vpop.f32.mrb[4].mxu0 }
 0x392   : > { %v1395_v15 = vadd.f32 %v5252_v13, %v1394_v14  ;;  %v5578_v16 = vpop.f32.mrb[5].mxu0 }
 0x393   : > { %v1397_v17 = vpop.f32.mrb[6].mxu0 }
 0x394   : > { %v7260_v18 = vpack.c.bf16 %v1395_v15, %v1395_v15  ;;  %v1398_v19 = vadd.f32 %v5252_v13, %v1397_v17  ;;  %v5579_v21 = vpop.f32.mrb[7].mxu0 }
 0x396   : > { %v7262_v22 = vpack.c.bf16 %v1398_v19, %v1398_v19  ;;  %v1532_v23 = vsel %vm1530_vm4, %v7260_v18, 0 }
 0x397   : > { %5593 = vmatpush3.bf16.msra.mxu1 %v1532_v23 }
 0x398   : > { %v1578_v24 = vsel %vm1530_vm4, %v7262_v22, 0  ;;  %5604 = vmatprep.subr.bf16.mxu1 %v6632_v20 }
 0x399   : > { %5599 = vmatpush3.bf16.msra.mxu0 %v1578_v24 }
 0x39a   : > { %5610 = vmatprep.subr.bf16.mxu0 %v6632_v20 }
 0x459   : > { %v1451_v26 = vpop.f32.mrb[8].mxu0 }
 0x45a   : > { %v1452_v27 = vadd.f32 %v1451_v26, %v7270_v25  ;;  %v5584_v28 = vpop.f32.mrb[9].mxu0 }
 0x45b   : > { %v1454_v29 = vpop.f32.mrb[10].mxu0  ;;  %v1497_v30 = vpop.f32.mrb[4].mxu1 }
 0x45c   : > { %v1498_v31 = vadd.f32 %v1497_v30, %v7270_v25  ;;  %v5585_v32 = vpop.f32.mrb[11].mxu0  ;;  %v5590_v33 = vpop.f32.mrb[5].mxu1  ;;  %v1503_v34 = vsel %vm1410_vm3, %v1452_v27, -inf }
 0x45d   : > { %v1500_v35 = vpop.f32.mrb[6].mxu1  ;;  %1504 = vmax.xlane.f32.xlu0 %v1503_v34 }
 0x45e   : > { %v5591_v36 = vpop.f32.mrb[7].mxu1  ;;  %v1506_v37 = vsel %vm1410_vm3, %v1498_v31, -inf }
 0x45f   : > { %1507 = vmax.xlane.f32.xlu1 %v1506_v37 }
 0x470   : > { %1678 = vrot.lane.b32.xlu1 %v7238_v6, %s6634_s4 }
 0x4ea   : > { %v1505_v38 = vpop.xlane.xlu0 %1504 }
 0x4eb   : > { %v1509_v39 = vsub.f32 %v1452_v27, %v1505_v38 }
 0x4ec   : > { %v1508_v40 = vpop.xlane.xlu1 %1507 }
 0x4ed   : > { %v1511_v41 = vmul.f32 1.442695, %v1509_v39  ;;  %v1510_v42 = vsub.f32 %v1498_v31, %v1508_v40 }
 0x4ef   : > { %6121 = vpow2.f32 %v1511_v41  ;;  %v1513_v43 = vmul.f32 1.442695, %v1510_v42 }
 0x4f0   : > { %v1679_v48 = vpop.permute.xlu1 %1678 }
 0x4f1   : > { %6123 = vpow2.f32 %v1513_v43  ;;  %v1684_v59 = vsel %vm1410_vm3, %v1679_v48, 0 }
 0x4f9   : > { %v6122_v44 = vpop.eup %6121 }
 0x4fa   : > { %v1515_v45 = vsel %vm1410_vm3, %v6122_v44, 0.0 }
 0x4fb   : > { %v6124_v46 = vpop.eup %6123  ;;  %1516 = vadd.xlane.f32.xlu0 %v1515_v45 }
 0x4fc   : > { %v1518_v47 = vsel %vm1410_vm3, %v6124_v46, 0.0 }
 0x4fd   : > { %1519 = vadd.xlane.f32.xlu1 %v1518_v47 }
 0x50e   : > { %1623 = vrot.lane.b32.xlu1 %v7246_v11, %s6634_s4 }
 0x511   : > { %1626 = vrot.lane.b32.xlu0 %v7236_v1, %s6634_s4 }
 0x512   : > { %1675 = vrot.lane.b32.xlu1 %v7248_v12, %s6634_s4 }
 0x588   : > { %v1517_v49 = vpop.xlane.xlu0 %1516 }
 0x589   : > { %6125 = vrcp.f32 %v1517_v49 }
 0x58a   : > { %v1520_v50 = vpop.xlane.xlu1 %1519 }
 0x58b   : > { %6127 = vrcp.f32 %v1520_v50 }
 0x58c   : > { %v1627_v54 = vpop.permute.xlu0 %1626 }
 0x58d   : > { %v1632_v57 = vsel %vm1410_vm3, %v1627_v54, 0 }
 0x58e   : > { %v1624_v60 = vpop.permute.xlu1 %1623 }
 0x592   : > { %v1676_v61 = vpop.permute.xlu1 %1675 }
 0x593   : > { %v6126_v51 = vpop.eup %6125 }
 0x594   : > { %v1523_v52 = vmul.f32 %v6126_v51, %v6122_v44 }
 0x595   : > { %v6128_v53 = vpop.eup %6127 }
 0x596   : > { %v1525_v55 = vpack.c.bf16 %v1523_v52, %v1523_v52  ;;  %v1524_v56 = vmul.f32 %v6128_v53, %v6124_v46 }
 0x598   : > { %5595 = vmatmul.mubr.msk.bf16.vlgmr.msra.gmra.mrb[8].mxu1 %vm1410_vm3, %v1525_v55  ;;  %v1526_v58 = vpack.c.bf16 %v1524_v56, %v1524_v56 }
 0x599   : > { %5605 = vmatpush3.bf16.xpose.msra.mxu1 %v1632_v57  ;;  %5606 = vmatprep.mubr.msk.bf16.mxu1 %vm6633_vm2, %v6632_v20 }
 0x59a   : > { %5601 = vmatmul.mubr.msk.bf16.vlgmr.msra.gmra.mrb[12].mxu0 %vm1410_vm3, %v1526_v58  ;;  %5616 = vmatprep.subr.bf16.mxu1 %v6632_v20 }
 0x59b   : > { %5611 = vmatpush3.bf16.xpose.msra.mxu0 %v1684_v59  ;;  %5612 = vmatprep.mubr.msk.bf16.mxu0 %vm6633_vm2, %v6632_v20 }
 0x59c   : > { %5622 = vmatprep.subr.bf16.mxu0 %v6632_v20 }
 0x5a0   : > { %5607 = vmatmul.mubr.msk.bf16.vlgmr.msra.gmra.mrb[12].mxu1 %vm1410_vm3, %v1624_v60 }
 0x5a1   : > { %5618 = vmatprep.mubr.msk.bf16.mxu1 %vm6633_vm2, %v6632_v20 }
 0x5a2   : > { %5613 = vmatmul.mubr.msk.bf16.vlgmr.msra.gmra.mrb[16].mxu0 %vm1410_vm3, %v1676_v61 }
 0x5a3   : > { %5624 = vmatprep.mubr.msk.bf16.mxu0 %vm6633_vm2, %v6632_v20 }
 0x66b   : > { %v1568_v62 = vpop.f32.mrb[8].mxu1 }
 0x66c   : > { %1620 = vst.msk [vmem:[#allocation3] sm:$0xff] %vm1410_vm3, %v1568_v62  ;;  %v5596_v63 = vpop.f32.mrb[9].mxu1 }
 0x66d   : > { %v1571_v0 = vpop.f32.mrb[10].mxu1  ;;  %v1614_v2 = vpop.f32.mrb[12].mxu0 }
 0x66e   : > { %1621 = vst.msk [vmem:[#allocation3 + $0x8] sm:$0xff] %vm1410_vm3, %v1614_v2  ;;  %v5597_v3 = vpop.f32.mrb[11].mxu1  ;;  %v5602_v4 = vpop.f32.mrb[13].mxu0 }
 0x66f   : > { %v1617_v5 = vpop.f32.mrb[14].mxu0 }
 0x670   : > { %v5603_v7 = vpop.f32.mrb[15].mxu0 }
 0x673   : > { %v1668_v8 = vpop.f32.mrb[12].mxu1 }
 0x674   : > { %v1669_v9 = vadd.f32 %v1668_v8, %v7270_v25  ;;  %v5608_v10 = vpop.f32.mrb[13].mxu1 }
 0x675   : > { %v1671_v13 = vpop.f32.mrb[14].mxu1  ;;  %v1720_v14 = vpop.f32.mrb[16].mxu0 }
 0x676   : > { %v1721_v15 = vadd.f32 %v1720_v14, %v7270_v25  ;;  %v5609_v16 = vpop.f32.mrb[15].mxu1  ;;  %v5614_v17 = vpop.f32.mrb[17].mxu0  ;;  %v1726_v19 = vsel %vm1410_vm3, %v1669_v9, -inf }
 0x677   : > { %1727 = vmax.xlane.f32.xlu0 %v1726_v19  ;;  %v1723_v21 = vpop.f32.mrb[18].mxu0 }
 0x678   : > { %v5615_v23 = vpop.f32.mrb[19].mxu0  ;;  %v1729_v24 = vsel %vm1410_vm3, %v1721_v15, -inf }
 0x679   : > { %1730 = vmax.xlane.f32.xlu1 %v1729_v24 }
 0x68a   : > { %1800 = vrot.lane.b32.xlu1 %v7262_v22, %s6634_s4 }
 0x68e   : > { %1861 = vrot.lane.b32.xlu1 %v7236_v1, %s6635_s23 }
 0x692   : > { %1911 = vrot.lane.b32.xlu1 %v7238_v6, %s6635_s23 }
 0x696   : > { %1909 = vrot.lane.b32.xlu1 %v7248_v12, %s6635_s23 }
 0x704   : > { %v1728_v26 = vpop.xlane.xlu0 %1727 }
 0x705   : > { %v1732_v27 = vsub.f32 %v1669_v9, %v1728_v26 }
 0x706   : > { %v1731_v28 = vpop.xlane.xlu1 %1730 }
 0x707   : > { %v1734_v29 = vmul.f32 1.442695, %v1732_v27  ;;  %v1733_v30 = vsub.f32 %v1721_v15, %v1731_v28 }
 0x709   : > { %6129 = vpow2.f32 %v1734_v29  ;;  %v1736_v31 = vmul.f32 1.442695, %v1733_v30 }
 0x70a   : > { %v1801_v32 = vpop.permute.xlu1 %1800 }
 0x70b   : > { %6131 = vpow2.f32 %v1736_v31  ;;  %v1806_v33 = vsel %vm1530_vm4, %v1801_v32, 0 }
 0x70c   : > { %5623 = vmatpush3.bf16.msra.mxu0 %v1806_v33 }
 0x70d   : > { %5634 = vmatprep.subr.bf16.mxu0 %v6632_v20 }
 0x70e   : > { %v1862_v43 = vpop.permute.xlu1 %1861 }
 0x70f   : > { %v1867_v49 = vsel %vm1410_vm3, %v1862_v43, 0 }
 0x712   : > { %v1912_v48 = vpop.permute.xlu1 %1911 }
 0x713   : > { %v6130_v34 = vpop.eup %6129  ;;  %v1917_v51 = vsel %vm1410_vm3, %v1912_v48, 0 }
 0x714   : > { %v1738_v35 = vsel %vm1410_vm3, %v6130_v34, 0.0 }
 0x715   : > { %v6132_v36 = vpop.eup %6131  ;;  %1739 = vadd.xlane.f32.xlu0 %v1738_v35 }
 0x716   : > { %v1741_v37 = vsel %vm1410_vm3, %v6132_v36, 0.0  ;;  %v1910_v53 = vpop.permute.xlu1 %1909 }
 0x719   : > { %1742 = vadd.xlane.f32.xlu0 %v1741_v37 }
 0x72f   : > { %1751 = vrot.lane.b32.xlu0 %v7260_v18, %s6634_s4 }
 0x733   : > { %1859 = vrot.lane.b32.xlu0 %v7246_v11, %s6635_s23 }
 0x7a2   : > { %v1740_v38 = vpop.xlane.xlu0 %1739 }
 0x7a3   : > { %6133 = vrcp.f32 %v1740_v38 }
 0x7a6   : > { %v1743_v39 = vpop.xlane.xlu0 %1742 }
 0x7a7   : > { %6135 = vrcp.f32 %v1743_v39 }
 0x7aa   : > { %v1752_v40 = vpop.permute.xlu0 %1751 }
 0x7ab   : > { %v1757_v41 = vsel %vm1530_vm4, %v1752_v40, 0 }
 0x7ac   : > { %5617 = vmatpush3.bf16.msra.mxu1 %v1757_v41 }
 0x7ad   : > { %v6134_v42 = vpop.eup %6133  ;;  %5628 = vmatprep.subr.bf16.mxu1 %v6632_v20 }
 0x7ae   : > { %v1746_v44 = vmul.f32 %v6134_v42, %v6130_v34  ;;  %v1860_v52 = vpop.permute.xlu0 %1859 }
 0x7b0   : > { %v1748_v45 = vpack.c.bf16 %v1746_v44, %v1746_v44 }
 0x7b1   : > { %v6136_v46 = vpop.eup %6135 }
 0x7b2   : > { %5619 = vmatmul.mubr.msk.bf16.vlgmr.msra.gmra.mrb[16].mxu1 %vm1410_vm3, %v1748_v45  ;;  %v1747_v47 = vmul.f32 %v6136_v46, %v6132_v36 }
 0x7b3   : > { %5630 = vmatprep.mubr.msk.bf16.mxu1 %vm6633_vm2, %v6632_v20 }
 0x7b4   : > { %v1749_v50 = vpack.c.bf16 %v1747_v47, %v1747_v47 }
 0x7b5   : > { %5629 = vmatpush3.bf16.xpose.msra.mxu1 %v1867_v49 }
 0x7b6   : > { %5625 = vmatmul.mubr.msk.bf16.vlgmr.msra.gmra.mrb[20].mxu0 %vm1410_vm3, %v1749_v50  ;;  %5640 = vmatprep.subr.bf16.mxu1 %v6632_v20 }
 0x7b7   : > { %5635 = vmatpush3.bf16.xpose.msra.mxu0 %v1917_v51  ;;  %5636 = vmatprep.mubr.msk.bf16.mxu0 %vm6633_vm2, %v6632_v20 }
 0x7b8   : > { %5646 = vmatprep.subr.bf16.mxu0 %v6632_v20 }
 0x7bc   : > { %5631 = vmatmul.mubr.msk.bf16.vlgmr.msra.gmra.mrb[20].mxu1 %vm1410_vm3, %v1860_v52 }
 0x7bd   : > { %5642 = vmatprep.mubr.msk.bf16.mxu1 %vm6633_vm2, %v6632_v20 }
 0x7be   : > { %5637 = vmatmul.mubr.msk.bf16.vlgmr.msra.gmra.mrb[24].mxu0 %vm1410_vm3, %v1910_v53 }
 0x7bf   : > { %5648 = vmatprep.mubr.msk.bf16.mxu0 %vm6633_vm2, %v6632_v20 }
 0x885   : > { %v7342_v54 = vpop.f32.mrb[16].mxu1 }
 0x886   : > { %v5620_v55 = vpop.f32.mrb[17].mxu1 }
 0x887   : > { %v1796_v56 = vpop.f32.mrb[18].mxu1 }
 0x888   : > { %v5621_v57 = vpop.f32.mrb[19].mxu1 }
 0x889   : > { %v7344_v58 = vpop.f32.mrb[20].mxu0 }
 0x88a   : > { %v5626_v59 = vpop.f32.mrb[21].mxu0 }
 0x88b   : > { %v1845_v60 = vpop.f32.mrb[22].mxu0 }
 0x88c   : > { %v5627_v61 = vpop.f32.mrb[23].mxu0 }
 0x88f   : > { %v1903_v62 = vpop.f32.mrb[20].mxu1 }
 0x890   : > { %v1904_v63 = vadd.f32 %v1903_v62, %v7270_v25  ;;  %v5632_v0 = vpop.f32.mrb[21].mxu1 }
 0x891   : > { %v1906_v2 = vpop.f32.mrb[22].mxu1  ;;  %v1953_v3 = vpop.f32.mrb[24].mxu0 }
 0x892   : > { %v1954_v4 = vadd.f32 %v1953_v3, %v7270_v25  ;;  %v5633_v5 = vpop.f32.mrb[23].mxu1  ;;  %v5638_v7 = vpop.f32.mrb[25].mxu0  ;;  %v1959_v8 = vsel %vm1410_vm3, %v1904_v63, -inf }
 0x893   : > { %1960 = vmax.xlane.f32.xlu0 %v1959_v8  ;;  %v1956_v9 = vpop.f32.mrb[26].mxu0 }
 0x894   : > { %v5639_v10 = vpop.f32.mrb[27].mxu0  ;;  %v1962_v13 = vsel %vm1410_vm3, %v1954_v4, -inf }
 0x895   : > { %1963 = vmax.xlane.f32.xlu1 %v1962_v13 }
 0x8a6   : > { %2031 = vrot.lane.b32.xlu1 %v7262_v22, %s6635_s23 }
 0x8aa   : > { %2092 = vrot.lane.b32.xlu1 %v7236_v1, %s6636_s24 }
 0x8ae   : > { %2142 = vrot.lane.b32.xlu1 %v7238_v6, %s6636_s24 }
 0x8b2   : > { %2140 = vrot.lane.b32.xlu1 %v7248_v12, %s6636_s24 }
 0x920   : > { %v1961_v14 = vpop.xlane.xlu0 %1960 }
 0x921   : > { %v1965_v15 = vsub.f32 %v1904_v63, %v1961_v14 }
 0x922   : > { %v1964_v16 = vpop.xlane.xlu1 %1963 }
 0x923   : > { %v1967_v17 = vmul.f32 1.442695, %v1965_v15  ;;  %v1966_v19 = vsub.f32 %v1954_v4, %v1964_v16 }
 0x925   : > { %6137 = vpow2.f32 %v1967_v17  ;;  %v1969_v21 = vmul.f32 1.442695, %v1966_v19 }
 0x926   : > { %v2032_v23 = vpop.permute.xlu1 %2031 }
 0x927   : > { %6139 = vpow2.f32 %v1969_v21  ;;  %v2037_v24 = vsel %vm1530_vm4, %v2032_v23, 0 }
 0x928   : > { %5647 = vmatpush3.bf16.msra.mxu0 %v2037_v24 }
 0x929   : > { %5658 = vmatprep.subr.bf16.mxu0 %v6632_v20 }
 0x92a   : > { %v2093_v35 = vpop.permute.xlu1 %2092 }
 0x92b   : > { %v2098_v41 = vsel %vm1410_vm3, %v2093_v35, 0 }
 0x92e   : > { %v2143_v40 = vpop.permute.xlu1 %2142 }
 0x92f   : > { %v6138_v26 = vpop.eup %6137  ;;  %v2148_v43 = vsel %vm1410_vm3, %v2143_v40, 0 }
 0x930   : > { %v1971_v27 = vsel %vm1410_vm3, %v6138_v26, 0.0 }
 0x931   : > { %v6140_v28 = vpop.eup %6139  ;;  %1972 = vadd.xlane.f32.xlu0 %v1971_v27 }
 0x932   : > { %v1974_v29 = vsel %vm1410_vm3, %v6140_v28, 0.0  ;;  %v2141_v45 = vpop.permute.xlu1 %2140 }
 0x935   : > { %1975 = vadd.xlane.f32.xlu0 %v1974_v29 }
 0x94b   : > { %1983 = vrot.lane.b32.xlu0 %v7260_v18, %s6635_s23 }
 0x94f   : > { %2090 = vrot.lane.b32.xlu0 %v7246_v11, %s6636_s24 }
 0x9be   : > { %v1973_v30 = vpop.xlane.xlu0 %1972 }
 0x9bf   : > { %6141 = vrcp.f32 %v1973_v30 }
 0x9c2   : > { %v1976_v31 = vpop.xlane.xlu0 %1975 }
 0x9c3   : > { %6143 = vrcp.f32 %v1976_v31 }
 0x9c6   : > { %v1984_v32 = vpop.permute.xlu0 %1983 }
 0x9c7   : > { %v1989_v33 = vsel %vm1530_vm4, %v1984_v32, 0 }
 0x9c8   : > { %5641 = vmatpush3.bf16.msra.mxu1 %v1989_v33 }
 0x9c9   : > { %v6142_v34 = vpop.eup %6141  ;;  %5652 = vmatprep.subr.bf16.mxu1 %v6632_v20 }
 0x9ca   : > { %v1979_v36 = vmul.f32 %v6142_v34, %v6138_v26  ;;  %v2091_v44 = vpop.permute.xlu0 %2090 }
 0x9cc   : > { %v1981_v37 = vpack.c.bf16 %v1979_v36, %v1979_v36 }
 0x9cd   : > { %v6144_v38 = vpop.eup %6143 }
 0x9ce   : > { %5643 = vmatmul.mubr.msk.bf16.vlgmr.msra.gmra.mrb[24].mxu1 %vm1410_vm3, %v1981_v37  ;;  %v1980_v39 = vmul.f32 %v6144_v38, %v6140_v28 }
 0x9cf   : > { %5654 = vmatprep.mubr.msk.bf16.mxu1 %vm6633_vm2, %v6632_v20 }
 0x9d0   : > { %v1982_v42 = vpack.c.bf16 %v1980_v39, %v1980_v39 }
 0x9d1   : > { %5653 = vmatpush3.bf16.xpose.msra.mxu1 %v2098_v41 }
 0x9d2   : > { %5649 = vmatmul.mubr.msk.bf16.vlgmr.msra.gmra.mrb[28].mxu0 %vm1410_vm3, %v1982_v42  ;;  %5664 = vmatprep.subr.bf16.mxu1 %v6632_v20 }
 0x9d3   : > { %5659 = vmatpush3.bf16.xpose.msra.mxu0 %v2148_v43  ;;  %5660 = vmatprep.mubr.msk.bf16.mxu0 %vm6633_vm2, %v6632_v20 }
 0x9d4   : > { %5670 = vmatprep.subr.bf16.mxu0 %v6632_v20 }
 0x9d8   : > { %5655 = vmatmul.mubr.msk.bf16.vlgmr.msra.gmra.mrb[28].mxu1 %vm1410_vm3, %v2091_v44 }
 0x9d9   : > { %5666 = vmatprep.mubr.msk.bf16.mxu1 %vm6633_vm2, %v6632_v20 }
 0x9da   : > { %5661 = vmatmul.mubr.msk.bf16.vlgmr.msra.gmra.mrb[32].mxu0 %vm1410_vm3, %v2141_v45 }
 0x9db   : > { %5672 = vmatprep.mubr.msk.bf16.mxu0 %vm6633_vm2, %v6632_v20 }
 0xaa1   : > { %v7384_v46 = vpop.f32.mrb[24].mxu1 }
 0xaa2   : > { %v5644_v47 = vpop.f32.mrb[25].mxu1 }
 0xaa3   : > { %v2028_v48 = vpop.f32.mrb[26].mxu1 }
 0xaa4   : > { %v5645_v49 = vpop.f32.mrb[27].mxu1 }
 0xaa5   : > { %v7386_v50 = vpop.f32.mrb[28].mxu0 }
 0xaa6   : > { %v5650_v51 = vpop.f32.mrb[29].mxu0 }
 0xaa7   : > { %v2076_v52 = vpop.f32.mrb[30].mxu0 }
 0xaa8   : > { %v5651_v53 = vpop.f32.mrb[31].mxu0 }
 0xaab   : > { %v2134_v55 = vpop.f32.mrb[28].mxu1 }
 0xaac   : > { %v2135_v56 = vadd.f32 %v2134_v55, %v7270_v25  ;;  %v5656_v57 = vpop.f32.mrb[29].mxu1 }
 0xaad   : > { %v2137_v59 = vpop.f32.mrb[30].mxu1  ;;  %v2184_v60 = vpop.f32.mrb[32].mxu0 }
 0xaae   : > { %v2185_v61 = vadd.f32 %v2184_v60, %v7270_v25  ;;  %v5657_v62 = vpop.f32.mrb[31].mxu1  ;;  %v5662_v63 = vpop.f32.mrb[33].mxu0  ;;  %v2190_v0 = vsel %vm1410_vm3, %v2135_v56, -inf }
 0xaaf   : > { %2191 = vmax.xlane.f32.xlu0 %v2190_v0  ;;  %v2187_v2 = vpop.f32.mrb[34].mxu0 }
 0xab0   : > { %v5663_v3 = vpop.f32.mrb[35].mxu0  ;;  %v2193_v4 = vsel %vm1410_vm3, %v2185_v61, -inf }
 0xab1   : > { %2194 = vmax.xlane.f32.xlu1 %v2193_v4 }
 0xac2   : > { %2262 = vrot.lane.b32.xlu1 %v7262_v22, %s6636_s24 }
 0xac6   : > { %2323 = vrot.lane.b32.xlu1 %v7236_v1, %s6637_s19 }
 0xaca   : > { %2373 = vrot.lane.b32.xlu1 %v7238_v6, %s6637_s19 }
 0xace   : > { %2371 = vrot.lane.b32.xlu1 %v7248_v12, %s6637_s19 }
 0xb3c   : > { %v2192_v5 = vpop.xlane.xlu0 %2191 }
 0xb3d   : > { %v2196_v7 = vsub.f32 %v2135_v56, %v2192_v5 }
 0xb3e   : > { %v2195_v8 = vpop.xlane.xlu1 %2194 }
 0xb3f   : > { %v2198_v9 = vmul.f32 1.442695, %v2196_v7  ;;  %v2197_v10 = vsub.f32 %v2185_v61, %v2195_v8 }
 0xb41   : > { %6145 = vpow2.f32 %v2198_v9  ;;  %v2200_v13 = vmul.f32 1.442695, %v2197_v10 }
 0xb42   : > { %v2263_v14 = vpop.permute.xlu1 %2262 }
 0xb43   : > { %6147 = vpow2.f32 %v2200_v13  ;;  %v2268_v15 = vsel %vm1530_vm4, %v2263_v14, 0 }
 0xb44   : > { %5671 = vmatpush3.bf16.msra.mxu0 %v2268_v15 }
 0xb45   : > { %5682 = vmatprep.subr.bf16.mxu0 %v6632_v20 }
 0xb46   : > { %v2324_v29 = vpop.permute.xlu1 %2323 }
 0xb47   : > { %v2329_v35 = vsel %vm1410_vm3, %v2324_v29, 0 }
 0xb4a   : > { %v2374_v34 = vpop.permute.xlu1 %2373 }
 0xb4b   : > { %v6146_v16 = vpop.eup %6145  ;;  %v2379_v37 = vsel %vm1410_vm3, %v2374_v34, 0 }
 0xb4c   : > { %v2202_v17 = vsel %vm1410_vm3, %v6146_v16, 0.0 }
 0xb4d   : > { %v6148_v19 = vpop.eup %6147  ;;  %2203 = vadd.xlane.f32.xlu0 %v2202_v17 }
 0xb4e   : > { %v2205_v21 = vsel %vm1410_vm3, %v6148_v19, 0.0  ;;  %v2372_v39 = vpop.permute.xlu1 %2371 }
 0xb51   : > { %2206 = vadd.xlane.f32.xlu0 %v2205_v21 }
 0xb67   : > { %2214 = vrot.lane.b32.xlu0 %v7260_v18, %s6636_s24 }
 0xb6b   : > { %2321 = vrot.lane.b32.xlu0 %v7246_v11, %s6637_s19 }
 0xbda   : > { %v2204_v23 = vpop.xlane.xlu0 %2203 }
 0xbdb   : > { %6149 = vrcp.f32 %v2204_v23 }
 0xbde   : > { %v2207_v24 = vpop.xlane.xlu0 %2206 }
 0xbdf   : > { %6151 = vrcp.f32 %v2207_v24 }
 0xbe2   : > { %v2215_v26 = vpop.permute.xlu0 %2214 }
 0xbe3   : > { %v2220_v27 = vsel %vm1530_vm4, %v2215_v26, 0 }
 0xbe4   : > { %5665 = vmatpush3.bf16.msra.mxu1 %v2220_v27 }
 0xbe5   : > { %v6150_v28 = vpop.eup %6149  ;;  %5676 = vmatprep.subr.bf16.mxu1 %v6632_v20 }
 0xbe6   : > { %v2210_v30 = vmul.f32 %v6150_v28, %v6146_v16  ;;  %v2322_v38 = vpop.permute.xlu0 %2321 }
 0xbe8   : > { %v2212_v31 = vpack.c.bf16 %v2210_v30, %v2210_v30 }
 0xbe9   : > { %v6152_v32 = vpop.eup %6151 }
 0xbea   : > { %5667 = vmatmul.mubr.msk.bf16.vlgmr.msra.gmra.mrb[32].mxu1 %vm1410_vm3, %v2212_v31  ;;  %v2211_v33 = vmul.f32 %v6152_v32, %v6148_v19 }
 0xbeb   : > { %5678 = vmatprep.mubr.msk.bf16.mxu1 %vm6633_vm2, %v6632_v20 }
 0xbec   : > { %v2213_v36 = vpack.c.bf16 %v2211_v33, %v2211_v33 }
 0xbed   : > { %5677 = vmatpush3.bf16.xpose.msra.mxu1 %v2329_v35 }
 0xbee   : > { %5673 = vmatmul.mubr.msk.bf16.vlgmr.msra.gmra.mrb[36].mxu0 %vm1410_vm3, %v2213_v36  ;;  %5688 = vmatprep.subr.bf16.mxu1 %v6632_v20 }
 0xbef   : > { %5683 = vmatpush3.bf16.xpose.msra.mxu0 %v2379_v37  ;;  %5684 = vmatprep.mubr.msk.bf16.mxu0 %vm6633_vm2, %v6632_v20 }
 0xbf0   : > { %5694 = vmatprep.subr.bf16.mxu0 %v6632_v20 }
 0xbf4   : > { %5679 = vmatmul.mubr.msk.bf16.vlgmr.msra.gmra.mrb[36].mxu1 %vm1410_vm3, %v2322_v38 }
 0xbf5   : > { %5690 = vmatprep.mubr.msk.bf16.mxu1 %vm6633_vm2, %v6632_v20 }
 0xbf6   : > { %5685 = vmatmul.mubr.msk.bf16.vlgmr.msra.gmra.mrb[40].mxu0 %vm1410_vm3, %v2372_v39 }
 0xbf7   : > { %5696 = vmatprep.mubr.msk.bf16.mxu0 %vm6633_vm2, %v6632_v20 }
 0xcbd   : > { %v7426_v40 = vpop.f32.mrb[32].mxu1 }
 0xcbe   : > { %v5668_v41 = vpop.f32.mrb[33].mxu1 }
 0xcbf   : > { %v2259_v42 = vpop.f32.mrb[34].mxu1 }
 0xcc0   : > { %v5669_v43 = vpop.f32.mrb[35].mxu1 }
 0xcc1   : > { %v7428_v44 = vpop.f32.mrb[36].mxu0 }
 0xcc2   : > { %v5674_v45 = vpop.f32.mrb[37].mxu0 }
 0xcc3   : > { %v2307_v47 = vpop.f32.mrb[38].mxu0 }
 0xcc4   : > { %v5675_v48 = vpop.f32.mrb[39].mxu0 }
 0xcc7   : > { %v2365_v49 = vpop.f32.mrb[36].mxu1 }
 0xcc8   : > { %v2366_v51 = vadd.f32 %v2365_v49, %v7270_v25  ;;  %v5680_v52 = vpop.f32.mrb[37].mxu1 }
 0xcc9   : > { %v2368_v53 = vpop.f32.mrb[38].mxu1  ;;  %v2415_v55 = vpop.f32.mrb[40].mxu0 }
 0xcca   : > { %v2416_v56 = vadd.f32 %v2415_v55, %v7270_v25  ;;  %v5681_v57 = vpop.f32.mrb[39].mxu1  ;;  %v5686_v59 = vpop.f32.mrb[41].mxu0  ;;  %v2421_v60 = vsel %vm1410_vm3, %v2366_v51, -inf }
 0xccb   : > { %2422 = vmax.xlane.f32.xlu0 %v2421_v60  ;;  %v2418_v61 = vpop.f32.mrb[42].mxu0 }
 0xccc   : > { %v5687_v62 = vpop.f32.mrb[43].mxu0  ;;  %v2424_v63 = vsel %vm1410_vm3, %v2416_v56, -inf }
 0xccd   : > { %2425 = vmax.xlane.f32.xlu1 %v2424_v63 }
 0xcde   : > { %2493 = vrot.lane.b32.xlu1 %v7262_v22, %s6637_s19 }
 0xce2   : > { %2554 = vrot.lane.b32.xlu1 %v7236_v1, %s6638_s16 }
 0xce6   : > { %2604 = vrot.lane.b32.xlu1 %v7238_v6, %s6638_s16 }
 0xcea   : > { %2602 = vrot.lane.b32.xlu1 %v7248_v12, %s6638_s16 }
 0xd58   : > { %v2423_v0 = vpop.xlane.xlu0 %2422 }
 0xd59   : > { %v2427_v2 = vsub.f32 %v2366_v51, %v2423_v0 }
 0xd5a   : > { %v2426_v3 = vpop.xlane.xlu1 %2425 }
 0xd5b   : > { %v2429_v4 = vmul.f32 1.442695, %v2427_v2  ;;  %v2428_v5 = vsub.f32 %v2416_v56, %v2426_v3 }
 0xd5d   : > { %6153 = vpow2.f32 %v2429_v4  ;;  %v2431_v7 = vmul.f32 1.442695, %v2428_v5 }
 0xd5e   : > { %v2494_v8 = vpop.permute.xlu1 %2493 }
 0xd5f   : > { %6155 = vpow2.f32 %v2431_v7  ;;  %v2499_v9 = vsel %vm1530_vm4, %v2494_v8, 0 }
 0xd60   : > { %5695 = vmatpush3.bf16.msra.mxu0 %v2499_v9 }
 0xd61   : > { %5706 = vmatprep.subr.bf16.mxu0 %v6632_v20 }
 0xd62   : > { %v2555_v24 = vpop.permute.xlu1 %2554 }
 0xd63   : > { %v2560_v31 = vsel %vm1410_vm3, %v2555_v24, 0 }
 0xd66   : > { %v2605_v30 = vpop.permute.xlu1 %2604 }
 0xd67   : > { %v6154_v10 = vpop.eup %6153  ;;  %v2610_v33 = vsel %vm1410_vm3, %v2605_v30, 0 }
 0xd68   : > { %v2433_v13 = vsel %vm1410_vm3, %v6154_v10, 0.0 }
 0xd69   : > { %v6156_v14 = vpop.eup %6155  ;;  %2434 = vadd.xlane.f32.xlu0 %v2433_v13 }
 0xd6a   : > { %v2436_v15 = vsel %vm1410_vm3, %v6156_v14, 0.0  ;;  %v2603_v35 = vpop.permute.xlu1 %2602 }
 0xd6d   : > { %2437 = vadd.xlane.f32.xlu0 %v2436_v15 }
 0xd83   : > { %2445 = vrot.lane.b32.xlu0 %v7260_v18, %s6637_s19 }
 0xd87   : > { %2552 = vrot.lane.b32.xlu0 %v7246_v11, %s6638_s16 }
 0xdf6   : > { %v2435_v16 = vpop.xlane.xlu0 %2434 }
 0xdf7   : > { %6157 = vrcp.f32 %v2435_v16 }
 0xdfa   : > { %v2438_v17 = vpop.xlane.xlu0 %2437 }
 0xdfb   : > { %6159 = vrcp.f32 %v2438_v17 }
 0xdfe   : > { %v2446_v19 = vpop.permute.xlu0 %2445 }
 0xdff   : > { %v2451_v21 = vsel %vm1530_vm4, %v2446_v19, 0 }
 0xe00   : > { %5689 = vmatpush3.bf16.msra.mxu1 %v2451_v21 }
 0xe01   : > { %v6158_v23 = vpop.eup %6157  ;;  %5700 = vmatprep.subr.bf16.mxu1 %v6632_v20 }
 0xe02   : > { %v2441_v26 = vmul.f32 %v6158_v23, %v6154_v10  ;;  %v2553_v34 = vpop.permute.xlu0 %2552 }
 0xe04   : > { %v2443_v27 = vpack.c.bf16 %v2441_v26, %v2441_v26 }
 0xe05   : > { %v6160_v28 = vpop.eup %6159 }
 0xe06   : > { %5691 = vmatmul.mubr.msk.bf16.vlgmr.msra.gmra.mrb[40].mxu1 %vm1410_vm3, %v2443_v27  ;;  %v2442_v29 = vmul.f32 %v6160_v28, %v6156_v14 }
 0xe07   : > { %5702 = vmatprep.mubr.msk.bf16.mxu1 %vm6633_vm2, %v6632_v20 }
 0xe08   : > { %v2444_v32 = vpack.c.bf16 %v2442_v29, %v2442_v29 }
 0xe09   : > { %5701 = vmatpush3.bf16.xpose.msra.mxu1 %v2560_v31 }
 0xe0a   : > { %5697 = vmatmul.mubr.msk.bf16.vlgmr.msra.gmra.mrb[44].mxu0 %vm1410_vm3, %v2444_v32  ;;  %5712 = vmatprep.subr.bf16.mxu1 %v6632_v20 }
 0xe0b   : > { %5707 = vmatpush3.bf16.xpose.msra.mxu0 %v2610_v33  ;;  %5708 = vmatprep.mubr.msk.bf16.mxu0 %vm6633_vm2, %v6632_v20 }
 0xe0c   : > { %5718 = vmatprep.subr.bf16.mxu0 %v6632_v20 }
 0xe10   : > { %5703 = vmatmul.mubr.msk.bf16.vlgmr.msra.gmra.mrb[44].mxu1 %vm1410_vm3, %v2553_v34 }
 0xe11   : > { %5714 = vmatprep.mubr.msk.bf16.mxu1 %vm6633_vm2, %v6632_v20 }
 0xe12   : > { %5709 = vmatmul.mubr.msk.bf16.vlgmr.msra.gmra.mrb[48].mxu0 %vm1410_vm3, %v2603_v35 }
 0xe13   : > { %5720 = vmatprep.mubr.msk.bf16.mxu0 %vm6633_vm2, %v6632_v20 }
 0xed9   : > { %v7468_v36 = vpop.f32.mrb[40].mxu1 }
 0xeda   : > { %v5692_v37 = vpop.f32.mrb[41].mxu1 }
 0xedb   : > { %v2490_v38 = vpop.f32.mrb[42].mxu1 }
 0xedc   : > { %v5693_v39 = vpop.f32.mrb[43].mxu1 }
 0xedd   : > { %v7470_v41 = vpop.f32.mrb[44].mxu0 }
 0xede   : > { %v5698_v42 = vpop.f32.mrb[45].mxu0 }
 0xedf   : > { %v2538_v43 = vpop.f32.mrb[46].mxu0 }
 0xee0   : > { %v5699_v45 = vpop.f32.mrb[47].mxu0 }
 0xee3   : > { %v2596_v47 = vpop.f32.mrb[44].mxu1 }
 0xee4   : > { %v2597_v48 = vadd.f32 %v2596_v47, %v7270_v25  ;;  %v5704_v49 = vpop.f32.mrb[45].mxu1 }
 0xee5   : > { %v2599_v51 = vpop.f32.mrb[46].mxu1  ;;  %v2646_v52 = vpop.f32.mrb[48].mxu0 }
 0xee6   : > { %v2647_v53 = vadd.f32 %v2646_v52, %v7270_v25  ;;  %v5705_v55 = vpop.f32.mrb[47].mxu1  ;;  %v5710_v56 = vpop.f32.mrb[49].mxu0  ;;  %v2652_v57 = vsel %vm1410_vm3, %v2597_v48, -inf }
 0xee7   : > { %2653 = vmax.xlane.f32.xlu0 %v2652_v57  ;;  %v2649_v59 = vpop.f32.mrb[50].mxu0 }
 0xee8   : > { %v5711_v60 = vpop.f32.mrb[51].mxu0  ;;  %v2655_v61 = vsel %vm1410_vm3, %v2647_v53, -inf }
 0xee9   : > { %2656 = vmax.xlane.f32.xlu1 %v2655_v61 }
 0xefa   : > { %2724 = vrot.lane.b32.xlu1 %v7262_v22, %s6638_s16 }
 0xefe   : > { %2785 = vrot.lane.b32.xlu1 %v7236_v1, %s6639_s15 }
 0xf02   : > { %2835 = vrot.lane.b32.xlu1 %v7238_v6, %s6639_s15 }
 0xf06   : > { %2833 = vrot.lane.b32.xlu1 %v7248_v12, %s6639_s15 }
 0xf74   : > { %v2654_v62 = vpop.xlane.xlu0 %2653 }
 0xf75   : > { %v2658_v63 = vsub.f32 %v2597_v48, %v2654_v62 }
 0xf76   : > { %v2657_v0 = vpop.xlane.xlu1 %2656 }
 0xf77   : > { %v2660_v2 = vmul.f32 1.442695, %v2658_v63  ;;  %v2659_v3 = vsub.f32 %v2647_v53, %v2657_v0 }
 0xf79   : > { %6161 = vpow2.f32 %v2660_v2  ;;  %v2662_v4 = vmul.f32 1.442695, %v2659_v3 }
 0xf7a   : > { %v2725_v5 = vpop.permute.xlu1 %2724 }
 0xf7b   : > { %6163 = vpow2.f32 %v2662_v4  ;;  %v2730_v7 = vsel %vm1530_vm4, %v2725_v5, 0 }
 0xf7c   : > { %5719 = vmatpush3.bf16.msra.mxu0 %v2730_v7 }
 0xf7d   : > { %5730 = vmatprep.subr.bf16.mxu0 %v6632_v20 }
 0xf7e   : > { %v2786_v21 = vpop.permute.xlu1 %2785 }
 0xf7f   : > { %v2791_v29 = vsel %vm1410_vm3, %v2786_v21, 0 }
 0xf82   : > { %v2836_v28 = vpop.permute.xlu1 %2835 }
 0xf83   : > { %v6162_v8 = vpop.eup %6161  ;;  %v2841_v31 = vsel %vm1410_vm3, %v2836_v28, 0 }
 0xf84   : > { %v2664_v9 = vsel %vm1410_vm3, %v6162_v8, 0.0 }
 0xf85   : > { %v6164_v10 = vpop.eup %6163  ;;  %2665 = vadd.xlane.f32.xlu0 %v2664_v9 }
 0xf86   : > { %v2667_v13 = vsel %vm1410_vm3, %v6164_v10, 0.0  ;;  %v2834_v33 = vpop.permute.xlu1 %2833 }
 0xf89   : > { %2668 = vadd.xlane.f32.xlu0 %v2667_v13 }
 0xf9f   : > { %2676 = vrot.lane.b32.xlu0 %v7260_v18, %s6638_s16 }
 0xfa3   : > { %2783 = vrot.lane.b32.xlu0 %v7246_v11, %s6639_s15 }
0x1012   : > { %v2666_v14 = vpop.xlane.xlu0 %2665 }
0x1013   : > { %6165 = vrcp.f32 %v2666_v14 }
0x1016   : > { %v2669_v15 = vpop.xlane.xlu0 %2668 }
0x1017   : > { %6167 = vrcp.f32 %v2669_v15 }
0x101a   : > { %v2677_v16 = vpop.permute.xlu0 %2676 }
0x101b   : > { %v2682_v17 = vsel %vm1530_vm4, %v2677_v16, 0 }
0x101c   : > { %5713 = vmatpush3.bf16.msra.mxu1 %v2682_v17 }
0x101d   : > { %v6166_v19 = vpop.eup %6165  ;;  %5724 = vmatprep.subr.bf16.mxu1 %v6632_v20 }
0x101e   : > { %v2672_v23 = vmul.f32 %v6166_v19, %v6162_v8  ;;  %v2784_v32 = vpop.permute.xlu0 %2783 }
0x1020   : > { %v2674_v24 = vpack.c.bf16 %v2672_v23, %v2672_v23 }
0x1021   : > { %v6168_v26 = vpop.eup %6167 }
0x1022   : > { %v2673_v27 = vmul.f32 %v6168_v26, %v6164_v10  ;;  %5715 = vmatmul.mubr.msk.bf16.vlgmr.msra.gmra.mrb[48].mxu1 %vm1410_vm3, %v2674_v24 }
0x1023   : > { %5726 = vmatprep.mubr.msk.bf16.mxu1 %vm6633_vm2, %v6632_v20 }
0x1024   : > { %v2675_v30 = vpack.c.bf16 %v2673_v27, %v2673_v27 }
0x1025   : > { %5725 = vmatpush3.bf16.xpose.msra.mxu1 %v2791_v29 }
0x1026   : > { %5721 = vmatmul.mubr.msk.bf16.vlgmr.msra.gmra.mrb[52].mxu0 %vm1410_vm3, %v2675_v30  ;;  %5736 = vmatprep.subr.bf16.mxu1 %v6632_v20 }
0x1027   : > { %5731 = vmatpush3.bf16.xpose.msra.mxu0 %v2841_v31  ;;  %5732 = vmatprep.mubr.msk.bf16.mxu0 %vm6633_vm2, %v6632_v20 }
0x1028   : > { %5742 = vmatprep.subr.bf16.mxu0 %v6632_v20 }
0x102c   : > { %5727 = vmatmul.mubr.msk.bf16.vlgmr.msra.gmra.mrb[52].mxu1 %vm1410_vm3, %v2784_v32 }
0x102d   : > { %5738 = vmatprep.mubr.msk.bf16.mxu1 %vm6633_vm2, %v6632_v20 }
0x102e   : > { %5733 = vmatmul.mubr.msk.bf16.vlgmr.msra.gmra.mrb[56].mxu0 %vm1410_vm3, %v2834_v33 }
0x102f   : > { %5744 = vmatprep.mubr.msk.bf16.mxu0 %vm6633_vm2, %v6632_v20 }
0x10f5   : > { %v7510_v34 = vpop.f32.mrb[48].mxu1 }
0x10f6   : > { %v5716_v35 = vpop.f32.mrb[49].mxu1 }
0x10f7   : > { %v2721_v37 = vpop.f32.mrb[50].mxu1 }
0x10f8   : > { %v5717_v38 = vpop.f32.mrb[51].mxu1 }
0x10f9   : > { %v7512_v39 = vpop.f32.mrb[52].mxu0 }
0x10fa   : > { %v5722_v42 = vpop.f32.mrb[53].mxu0 }
0x10fb   : > { %v2769_v43 = vpop.f32.mrb[54].mxu0 }
0x10fc   : > { %v5723_v45 = vpop.f32.mrb[55].mxu0 }
0x10ff   : > { %v2827_v47 = vpop.f32.mrb[52].mxu1 }
0x1100   : > { %v2828_v48 = vadd.f32 %v2827_v47, %v7270_v25  ;;  %v5728_v49 = vpop.f32.mrb[53].mxu1 }
0x1101   : > { %v2830_v51 = vpop.f32.mrb[54].mxu1  ;;  %v2877_v52 = vpop.f32.mrb[56].mxu0  ;;  %v7556_v49 = vld [vmem:[#allocation7] sm:$0xff] }
0x1102   : > { %v2878_v53 = vadd.f32 %v2877_v52, %v7270_v25  ;;  %v5729_v55 = vpop.f32.mrb[55].mxu1  ;;  %v5734_v56 = vpop.f32.mrb[57].mxu0  ;;  %v2883_v57 = vsel %vm1410_vm3, %v2828_v48, -inf }
0x1103   : > { %2884 = vmax.xlane.f32.xlu0 %v2883_v57  ;;  %v2880_v59 = vpop.f32.mrb[58].mxu0 }
0x1104   : > { %v5735_v60 = vpop.f32.mrb[59].mxu0  ;;  %v2886_v61 = vsel %vm1410_vm3, %v2878_v53, -inf }
0x1105   : > { %2887 = vmax.xlane.f32.xlu1 %v2886_v61 }
0x1116   : > { %2955 = vrot.lane.b32.xlu1 %v7262_v22, %s6639_s15 }
0x111a   : > { %3016 = vrot.lane.b32.xlu1 %v7236_v1, %s6640_s29 }
0x111e   : > { %3066 = vrot.lane.b32.xlu1 %v7238_v6, %s6640_s29 }
0x1122   : > { %3064 = vrot.lane.b32.xlu1 %v7248_v12, %s6640_s29 }
0x1190   : > { %v2885_v25 = vpop.xlane.xlu0 %2884 }
0x1191   : > { %v2889_v62 = vsub.f32 %v2828_v48, %v2885_v25 }
0x1192   : > { %v2888_v63 = vpop.xlane.xlu1 %2887 }
0x1193   : > { %v2891_v0 = vmul.f32 1.442695, %v2889_v62  ;;  %v2890_v2 = vsub.f32 %v2878_v53, %v2888_v63 }
0x1195   : > { %6169 = vpow2.f32 %v2891_v0  ;;  %v2893_v3 = vmul.f32 1.442695, %v2890_v2 }
0x1196   : > { %v2956_v4 = vpop.permute.xlu1 %2955 }
0x1197   : > { %6171 = vpow2.f32 %v2893_v3  ;;  %v2961_v5 = vsel %vm1530_vm4, %v2956_v4, 0 }
0x1198   : > { %5743 = vmatpush3.bf16.msra.mxu0 %v2961_v5 }
0x1199   : > { %5754 = vmatprep.subr.bf16.mxu0 %v6632_v20 }
0x119a   : > { %v3017_v19 = vpop.permute.xlu1 %3016 }
0x119b   : > { %v3022_v28 = vsel %vm1410_vm3, %v3017_v19, 0 }
0x119e   : > { %v3067_v27 = vpop.permute.xlu1 %3066 }
0x119f   : > { %v6170_v7 = vpop.eup %6169  ;;  %v3072_v30 = vsel %vm1410_vm3, %v3067_v27, 0 }
0x11a0   : > { %v2895_v8 = vsel %vm1410_vm3, %v6170_v7, 0.0 }
0x11a1   : > { %v6172_v9 = vpop.eup %6171  ;;  %2896 = vadd.xlane.f32.xlu0 %v2895_v8 }
0x11a2   : > { %v2898_v10 = vsel %vm1410_vm3, %v6172_v9, 0.0  ;;  %v3065_v32 = vpop.permute.xlu1 %3064 }
0x11a5   : > { %2899 = vadd.xlane.f32.xlu0 %v2898_v10 }
0x11bb   : > { %2907 = vrot.lane.b32.xlu0 %v7260_v18, %s6639_s15 }
0x11bf   : > { %3014 = vrot.lane.b32.xlu0 %v7246_v11, %s6640_s29 }
0x122e   : > { %v2897_v13 = vpop.xlane.xlu0 %2896 }
0x122f   : > { %6173 = vrcp.f32 %v2897_v13 }
0x1232   : > { %v2900_v14 = vpop.xlane.xlu0 %2899 }
0x1233   : > { %6175 = vrcp.f32 %v2900_v14 }
0x1236   : > { %v2908_v15 = vpop.permute.xlu0 %2907 }
0x1237   : > { %v2913_v16 = vsel %vm1530_vm4, %v2908_v15, 0 }
0x1238   : > { %5737 = vmatpush3.bf16.msra.mxu1 %v2913_v16 }
0x1239   : > { %v6174_v17 = vpop.eup %6173  ;;  %5748 = vmatprep.subr.bf16.mxu1 %v6632_v20 }
0x123a   : > { %v2903_v21 = vmul.f32 %v6174_v17, %v6170_v7  ;;  %v3015_v31 = vpop.permute.xlu0 %3014 }
0x123c   : > { %v2905_v23 = vpack.c.bf16 %v2903_v21, %v2903_v21 }
0x123d   : > { %v6176_v24 = vpop.eup %6175 }
0x123e   : > { %v2904_v26 = vmul.f32 %v6176_v24, %v6172_v9  ;;  %5739 = vmatmul.mubr.msk.bf16.vlgmr.msra.gmra.mrb[56].mxu1 %vm1410_vm3, %v2905_v23 }
0x123f   : > { %5750 = vmatprep.mubr.msk.bf16.mxu1 %vm6633_vm2, %v6632_v20 }
0x1240   : > { %v2906_v29 = vpack.c.bf16 %v2904_v26, %v2904_v26 }
0x1241   : > { %5749 = vmatpush3.bf16.xpose.msra.mxu1 %v3022_v28 }
0x1242   : > { %5745 = vmatmul.mubr.msk.bf16.vlgmr.msra.gmra.mrb[60].mxu0 %vm1410_vm3, %v2906_v29  ;;  %5760 = vmatprep.subr.bf16.mxu1 %v6632_v20 }
0x1243   : > { %5755 = vmatpush3.bf16.xpose.msra.mxu0 %v3072_v30  ;;  %5756 = vmatprep.mubr.msk.bf16.mxu0 %vm6633_vm2, %v6632_v20 }
0x1244   : > { %5766 = vmatprep.subr.bf16.mxu0 %v6632_v20 }
0x1248   : > { %5751 = vmatmul.mubr.msk.bf16.vlgmr.msra.gmra.mrb[60].mxu1 %vm1410_vm3, %v3015_v31 }
0x1249   : > { %5762 = vmatprep.mubr.msk.bf16.mxu1 %vm6633_vm2, %v6632_v20 }
0x124a   : > { %5757 = vmatmul.mubr.msk.bf16.vlgmr.msra.gmra.mrb[64].mxu0 %vm1410_vm3, %v3065_v32 }
0x124b   : > { %5768 = vmatprep.mubr.msk.bf16.mxu0 %vm6633_vm2, %v6632_v20 }
0x1311   : > { %v7552_v33 = vpop.f32.mrb[56].mxu1 }
0x1312   : > { %v5740_v35 = vpop.f32.mrb[57].mxu1 }
0x1313   : > { %v2952_v37 = vpop.f32.mrb[58].mxu1 }
0x1314   : > { %v5741_v38 = vpop.f32.mrb[59].mxu1 }
0x1315   : > { %v7554_v42 = vpop.f32.mrb[60].mxu0 }
0x1316   : > { %v5746_v43 = vpop.f32.mrb[61].mxu0 }
0x1317   : > { %v3000_v45 = vpop.f32.mrb[62].mxu0 }
0x1318   : > { %v5747_v47 = vpop.f32.mrb[63].mxu0 }
0x131b   : > { %v3058_v48 = vpop.f32.mrb[60].mxu1 }
0x131c   : > { %v3059_v51 = vadd.f32 %v7556_v49, %v3058_v48  ;;  %v5752_v52 = vpop.f32.mrb[61].mxu1 }
0x131d   : > { %v3061_v53 = vpop.f32.mrb[62].mxu1  ;;  %v3108_v55 = vpop.f32.mrb[64].mxu0 }
0x131e   : > { %v3109_v56 = vadd.f32 %v7556_v49, %v3108_v55  ;;  %v5753_v57 = vpop.f32.mrb[63].mxu1  ;;  %v5758_v59 = vpop.f32.mrb[65].mxu0  ;;  %v3114_v60 = vsel %vm1410_vm3, %v3059_v51, -inf }
0x131f   : > { %3115 = vmax.xlane.f32.xlu0 %v3114_v60  ;;  %v3111_v61 = vpop.f32.mrb[66].mxu0 }
0x1320   : > { %v5759_v25 = vpop.f32.mrb[67].mxu0  ;;  %v3117_v62 = vsel %vm1410_vm3, %v3109_v56, -inf }
0x1321   : > { %3118 = vmax.xlane.f32.xlu1 %v3117_v62 }
0x1332   : > { %3186 = vrot.lane.b32.xlu1 %v7262_v22, %s6640_s29 }
0x1336   : > { %3247 = vrot.lane.b32.xlu1 %v7236_v1, %s6641_s0 }
0x133a   : > { %3297 = vrot.lane.b32.xlu1 %v7238_v6, %s6641_s0 }
0x133e   : > { %3295 = vrot.lane.b32.xlu1 %v7248_v12, %s6641_s0 }
0x13ac   : > { %v3116_v63 = vpop.xlane.xlu0 %3115 }
0x13ad   : > { %v3120_v0 = vsub.f32 %v3059_v51, %v3116_v63 }
0x13ae   : > { %v3119_v2 = vpop.xlane.xlu1 %3118 }
0x13af   : > { %v3122_v3 = vmul.f32 1.442695, %v3120_v0  ;;  %v3121_v4 = vsub.f32 %v3109_v56, %v3119_v2 }
0x13b1   : > { %6177 = vpow2.f32 %v3122_v3  ;;  %v3124_v5 = vmul.f32 1.442695, %v3121_v4 }
0x13b2   : > { %v3187_v7 = vpop.permute.xlu1 %3186 }
0x13b3   : > { %6179 = vpow2.f32 %v3124_v5  ;;  %v3192_v8 = vsel %vm1530_vm4, %v3187_v7, 0 }
0x13b4   : > { %5767 = vmatpush3.bf16.msra.mxu0 %v3192_v8 }
0x13b5   : > { %5778 = vmatprep.subr.bf16.mxu0 %v6632_v20 }
0x13b6   : > { %v3248_v23 = vpop.permute.xlu1 %3247 }
0x13b7   : > { %v3253_v30 = vsel %vm1410_vm3, %v3248_v23, 0 }
0x13ba   : > { %v3298_v29 = vpop.permute.xlu1 %3297 }
0x13bb   : > { %v6178_v9 = vpop.eup %6177  ;;  %v3303_v32 = vsel %vm1410_vm3, %v3298_v29, 0 }
0x13bc   : > { %v3126_v10 = vsel %vm1410_vm3, %v6178_v9, 0.0 }
0x13bd   : > { %v6180_v13 = vpop.eup %6179  ;;  %3127 = vadd.xlane.f32.xlu0 %v3126_v10 }
0x13be   : > { %v3129_v14 = vsel %vm1410_vm3, %v6180_v13, 0.0  ;;  %v3296_v37 = vpop.permute.xlu1 %3295 }
0x13c1   : > { %3130 = vadd.xlane.f32.xlu0 %v3129_v14 }
0x13d7   : > { %3138 = vrot.lane.b32.xlu0 %v7260_v18, %s6640_s29 }
0x13db   : > { %3245 = vrot.lane.b32.xlu0 %v7246_v11, %s6641_s0 }
0x144a   : > { %v3128_v15 = vpop.xlane.xlu0 %3127 }
0x144b   : > { %6181 = vrcp.f32 %v3128_v15 }
0x144e   : > { %v3131_v16 = vpop.xlane.xlu0 %3130 }
0x144f   : > { %6183 = vrcp.f32 %v3131_v16 }
0x1452   : > { %v3139_v17 = vpop.permute.xlu0 %3138 }
0x1453   : > { %v3144_v19 = vsel %vm1530_vm4, %v3139_v17, 0 }
0x1454   : > { %5761 = vmatpush3.bf16.msra.mxu1 %v3144_v19 }
0x1455   : > { %v6182_v21 = vpop.eup %6181  ;;  %5772 = vmatprep.subr.bf16.mxu1 %v6632_v20 }
0x1456   : > { %v3134_v24 = vmul.f32 %v6182_v21, %v6178_v9  ;;  %v3246_v35 = vpop.permute.xlu0 %3245 }
0x1458   : > { %v3136_v26 = vpack.c.bf16 %v3134_v24, %v3134_v24 }
0x1459   : > { %v6184_v27 = vpop.eup %6183 }
0x145a   : > { %v3135_v28 = vmul.f32 %v6184_v27, %v6180_v13  ;;  %5763 = vmatmul.mubr.msk.bf16.vlgmr.msra.gmra.mrb[64].mxu1 %vm1410_vm3, %v3136_v26 }
0x145b   : > { %5774 = vmatprep.mubr.msk.bf16.mxu1 %vm6633_vm2, %v6632_v20 }
0x145c   : > { %v3137_v31 = vpack.c.bf16 %v3135_v28, %v3135_v28 }
0x145d   : > { %5773 = vmatpush3.bf16.xpose.msra.mxu1 %v3253_v30 }
0x145e   : > { %5769 = vmatmul.mubr.msk.bf16.vlgmr.msra.gmra.mrb[68].mxu0 %vm1410_vm3, %v3137_v31  ;;  %5784 = vmatprep.subr.bf16.mxu1 %v6632_v20 }
0x145f   : > { %5779 = vmatpush3.bf16.xpose.msra.mxu0 %v3303_v32  ;;  %5780 = vmatprep.mubr.msk.bf16.mxu0 %vm6633_vm2, %v6632_v20 }
0x1460   : > { %5790 = vmatprep.subr.bf16.mxu0 %v6632_v20 }
0x1464   : > { %5775 = vmatmul.mubr.msk.bf16.vlgmr.msra.gmra.mrb[68].mxu1 %vm1410_vm3, %v3246_v35 }
0x1465   : > { %5786 = vmatprep.mubr.msk.bf16.mxu1 %vm6633_vm2, %v6632_v20 }
0x1466   : > { %5781 = vmatmul.mubr.msk.bf16.vlgmr.msra.gmra.mrb[72].mxu0 %vm1410_vm3, %v3296_v37 }
0x1467   : > { %5792 = vmatprep.mubr.msk.bf16.mxu0 %vm6633_vm2, %v6632_v20 }
0x152d   : > { %v7596_v38 = vpop.f32.mrb[64].mxu1 }
0x152e   : > { %v5764_v43 = vpop.f32.mrb[65].mxu1 }
0x152f   : > { %v3183_v45 = vpop.f32.mrb[66].mxu1 }
0x1530   : > { %v5765_v47 = vpop.f32.mrb[67].mxu1 }
0x1531   : > { %v7598_v48 = vpop.f32.mrb[68].mxu0 }
0x1532   : > { %v5770_v51 = vpop.f32.mrb[69].mxu0 }
0x1533   : > { %v3231_v52 = vpop.f32.mrb[70].mxu0 }
0x1534   : > { %v5771_v53 = vpop.f32.mrb[71].mxu0 }
0x1537   : > { %v3289_v55 = vpop.f32.mrb[68].mxu1 }
0x1538   : > { %v3290_v56 = vadd.f32 %v7556_v49, %v3289_v55  ;;  %v5776_v57 = vpop.f32.mrb[69].mxu1 }
0x1539   : > { %v3292_v59 = vpop.f32.mrb[70].mxu1  ;;  %v3339_v60 = vpop.f32.mrb[72].mxu0 }
0x153a   : > { %v3340_v61 = vadd.f32 %v7556_v49, %v3339_v60  ;;  %v5777_v25 = vpop.f32.mrb[71].mxu1  ;;  %v5782_v62 = vpop.f32.mrb[73].mxu0  ;;  %v3345_v63 = vsel %vm1410_vm3, %v3290_v56, -inf }
0x153b   : > { %3346 = vmax.xlane.f32.xlu0 %v3345_v63  ;;  %v3342_v0 = vpop.f32.mrb[74].mxu0 }
0x153c   : > { %v5783_v2 = vpop.f32.mrb[75].mxu0  ;;  %v3348_v3 = vsel %vm1410_vm3, %v3340_v61, -inf }
0x153d   : > { %3349 = vmax.xlane.f32.xlu1 %v3348_v3 }
0x154e   : > { %3417 = vrot.lane.b32.xlu1 %v7262_v22, %s6641_s0 }
0x1552   : > { %3478 = vrot.lane.b32.xlu1 %v7236_v1, %s6642_s6 }
0x1556   : > { %3528 = vrot.lane.b32.xlu1 %v7238_v6, %s6642_s6 }
0x155a   : > { %3526 = vrot.lane.b32.xlu1 %v7248_v12, %s6642_s6 }
0x15c8   : > { %v3347_v4 = vpop.xlane.xlu0 %3346 }
0x15c9   : > { %v3351_v5 = vsub.f32 %v3290_v56, %v3347_v4 }
0x15ca   : > { %v3350_v7 = vpop.xlane.xlu1 %3349 }
0x15cb   : > { %v3353_v8 = vmul.f32 1.442695, %v3351_v5  ;;  %v3352_v9 = vsub.f32 %v3340_v61, %v3350_v7 }
0x15cd   : > { %6185 = vpow2.f32 %v3353_v8  ;;  %v3355_v10 = vmul.f32 1.442695, %v3352_v9 }
0x15ce   : > { %v3418_v13 = vpop.permute.xlu1 %3417 }
0x15cf   : > { %6187 = vpow2.f32 %v3355_v10  ;;  %v3423_v14 = vsel %vm1530_vm4, %v3418_v13, 0 }
0x15d0   : > { %5791 = vmatpush3.bf16.msra.mxu0 %v3423_v14 }
0x15d1   : > { %5802 = vmatprep.subr.bf16.mxu0 %v6632_v20 }
0x15d2   : > { %v3479_v28 = vpop.permute.xlu1 %3478 }
0x15d3   : > { %v3484_v37 = vsel %vm1410_vm3, %v3479_v28, 0 }
0x15d6   : > { %v3529_v35 = vpop.permute.xlu1 %3528 }
0x15d7   : > { %v6186_v15 = vpop.eup %6185  ;;  %v3534_v45 = vsel %vm1410_vm3, %v3529_v35, 0 }
0x15d8   : > { %v3357_v16 = vsel %vm1410_vm3, %v6186_v15, 0.0 }
0x15d9   : > { %v6188_v17 = vpop.eup %6187  ;;  %3358 = vadd.xlane.f32.xlu0 %v3357_v16 }
0x15da   : > { %v3360_v19 = vsel %vm1410_vm3, %v6188_v17, 0.0  ;;  %v3527_v51 = vpop.permute.xlu1 %3526 }
0x15dd   : > { %3361 = vadd.xlane.f32.xlu0 %v3360_v19 }
0x15f3   : > { %3369 = vrot.lane.b32.xlu0 %v7260_v18, %s6641_s0 }
0x15f7   : > { %3476 = vrot.lane.b32.xlu0 %v7246_v11, %s6642_s6 }
0x1666   : > { %v3359_v21 = vpop.xlane.xlu0 %3358 }
0x1667   : > { %6189 = vrcp.f32 %v3359_v21 }
0x166a   : > { %v3362_v23 = vpop.xlane.xlu0 %3361 }
0x166b   : > { %6191 = vrcp.f32 %v3362_v23 }
0x166e   : > { %v3370_v24 = vpop.permute.xlu0 %3369 }
0x166f   : > { %v3375_v26 = vsel %vm1530_vm4, %v3370_v24, 0 }
0x1670   : > { %5785 = vmatpush3.bf16.msra.mxu1 %v3375_v26 }
0x1671   : > { %v6190_v27 = vpop.eup %6189  ;;  %5796 = vmatprep.subr.bf16.mxu1 %v6632_v20 }
0x1672   : > { %v3365_v29 = vmul.f32 %v6190_v27, %v6186_v15  ;;  %v3477_v47 = vpop.permute.xlu0 %3476 }
0x1674   : > { %v3367_v30 = vpack.c.bf16 %v3365_v29, %v3365_v29 }
0x1675   : > { %v6192_v31 = vpop.eup %6191 }
0x1676   : > { %v3366_v32 = vmul.f32 %v6192_v31, %v6188_v17  ;;  %5787 = vmatmul.mubr.msk.bf16.vlgmr.msra.gmra.mrb[72].mxu1 %vm1410_vm3, %v3367_v30 }
0x1677   : > { %5798 = vmatprep.mubr.msk.bf16.mxu1 %vm6633_vm2, %v6632_v20 }
0x1678   : > { %v3368_v43 = vpack.c.bf16 %v3366_v32, %v3366_v32 }
0x1679   : > { %5797 = vmatpush3.bf16.xpose.msra.mxu1 %v3484_v37 }
0x167a   : > { %5793 = vmatmul.mubr.msk.bf16.vlgmr.msra.gmra.mrb[76].mxu0 %vm1410_vm3, %v3368_v43  ;;  %5808 = vmatprep.subr.bf16.mxu1 %v6632_v20 }
0x167b   : > { %5803 = vmatpush3.bf16.xpose.msra.mxu0 %v3534_v45  ;;  %5804 = vmatprep.mubr.msk.bf16.mxu0 %vm6633_vm2, %v6632_v20 }
0x167c   : > { %5814 = vmatprep.subr.bf16.mxu0 %v6632_v20 }
0x1680   : > { %5799 = vmatmul.mubr.msk.bf16.vlgmr.msra.gmra.mrb[76].mxu1 %vm1410_vm3, %v3477_v47 }
0x1681   : > { %5810 = vmatprep.mubr.msk.bf16.mxu1 %vm6633_vm2, %v6632_v20 }
0x1682   : > { %5805 = vmatmul.mubr.msk.bf16.vlgmr.msra.gmra.mrb[80].mxu0 %vm1410_vm3, %v3527_v51 }
0x1683   : > { %5816 = vmatprep.mubr.msk.bf16.mxu0 %vm6633_vm2, %v6632_v20 }
0x1749   : > { %v7638_v52 = vpop.f32.mrb[72].mxu1 }
0x174a   : > { %v5788_v53 = vpop.f32.mrb[73].mxu1 }
0x174b   : > { %v3414_v55 = vpop.f32.mrb[74].mxu1 }
0x174c   : > { %v5789_v56 = vpop.f32.mrb[75].mxu1 }
0x174d   : > { %v7640_v57 = vpop.f32.mrb[76].mxu0 }
0x174e   : > { %v5794_v59 = vpop.f32.mrb[77].mxu0 }
0x174f   : > { %v3462_v60 = vpop.f32.mrb[78].mxu0 }
0x1750   : > { %v5795_v61 = vpop.f32.mrb[79].mxu0 }
0x1753   : > { %v3520_v25 = vpop.f32.mrb[76].mxu1 }
0x1754   : > { %v3521_v62 = vadd.f32 %v7556_v49, %v3520_v25  ;;  %v5800_v63 = vpop.f32.mrb[77].mxu1 }
0x1755   : > { %v3523_v0 = vpop.f32.mrb[78].mxu1  ;;  %v3570_v2 = vpop.f32.mrb[80].mxu0 }
0x1756   : > { %v3571_v3 = vadd.f32 %v7556_v49, %v3570_v2  ;;  %v5801_v4 = vpop.f32.mrb[79].mxu1  ;;  %v5806_v5 = vpop.f32.mrb[81].mxu0  ;;  %v3576_v7 = vsel %vm1410_vm3, %v3521_v62, -inf }
0x1757   : > { %3577 = vmax.xlane.f32.xlu0 %v3576_v7  ;;  %v3573_v8 = vpop.f32.mrb[82].mxu0 }
0x1758   : > { %v5807_v9 = vpop.f32.mrb[83].mxu0  ;;  %v3579_v10 = vsel %vm1410_vm3, %v3571_v3, -inf }
0x1759   : > { %3580 = vmax.xlane.f32.xlu1 %v3579_v10 }
0x176a   : > { %3648 = vrot.lane.b32.xlu1 %v7262_v22, %s6642_s6 }
0x176e   : > { %3709 = vrot.lane.b32.xlu1 %v7236_v1, %s6643_s22 }
0x1772   : > { %3759 = vrot.lane.b32.xlu1 %v7238_v6, %s6643_s22 }
0x1776   : > { %3757 = vrot.lane.b32.xlu1 %v7248_v12, %s6643_s22 }
0x17e4   : > { %v3578_v13 = vpop.xlane.xlu0 %3577 }
0x17e5   : > { %v3582_v14 = vsub.f32 %v3521_v62, %v3578_v13 }
0x17e6   : > { %v3581_v15 = vpop.xlane.xlu1 %3580 }
0x17e7   : > { %v3584_v16 = vmul.f32 1.442695, %v3582_v14  ;;  %v3583_v17 = vsub.f32 %v3571_v3, %v3581_v15 }
0x17e9   : > { %6193 = vpow2.f32 %v3584_v16  ;;  %v3586_v19 = vmul.f32 1.442695, %v3583_v17 }
0x17ea   : > { %v3649_v21 = vpop.permute.xlu1 %3648 }
0x17eb   : > { %6195 = vpow2.f32 %v3586_v19  ;;  %v3654_v23 = vsel %vm1530_vm4, %v3649_v21, 0 }
0x17ec   : > { %5815 = vmatpush3.bf16.msra.mxu0 %v3654_v23 }
0x17ed   : > { %5826 = vmatprep.subr.bf16.mxu0 %v6632_v20 }
0x17ee   : > { %v3710_v37 = vpop.permute.xlu1 %3709 }
0x17ef   : > { %v3715_v55 = vsel %vm1410_vm3, %v3710_v37, 0 }
0x17f2   : > { %v3760_v53 = vpop.permute.xlu1 %3759 }
0x17f3   : > { %v6194_v24 = vpop.eup %6193  ;;  %v3765_v59 = vsel %vm1410_vm3, %v3760_v53, 0 }
0x17f4   : > { %v3588_v26 = vsel %vm1410_vm3, %v6194_v24, 0.0 }
0x17f5   : > { %v6196_v27 = vpop.eup %6195  ;;  %3589 = vadd.xlane.f32.xlu0 %v3588_v26 }
0x17f6   : > { %v3591_v28 = vsel %vm1410_vm3, %v6196_v27, 0.0  ;;  %v3758_v61 = vpop.permute.xlu1 %3757 }
0x17f9   : > { %3592 = vadd.xlane.f32.xlu0 %v3591_v28 }
0x180f   : > { %3600 = vrot.lane.b32.xlu0 %v7260_v18, %s6642_s6 }
0x1813   : > { %3707 = vrot.lane.b32.xlu0 %v7246_v11, %s6643_s22 }
0x1882   : > { %v3590_v29 = vpop.xlane.xlu0 %3589 }
0x1883   : > { %6197 = vrcp.f32 %v3590_v29 }
0x1886   : > { %v3593_v30 = vpop.xlane.xlu0 %3592 }
0x1887   : > { %6199 = vrcp.f32 %v3593_v30 }
0x188a   : > { %v3601_v31 = vpop.permute.xlu0 %3600 }
0x188b   : > { %v3606_v32 = vsel %vm1530_vm4, %v3601_v31, 0 }
0x188c   : > { %5809 = vmatpush3.bf16.msra.mxu1 %v3606_v32 }
0x188d   : > { %v6198_v35 = vpop.eup %6197  ;;  %5820 = vmatprep.subr.bf16.mxu1 %v6632_v20 }
0x188e   : > { %v3596_v43 = vmul.f32 %v6198_v35, %v6194_v24  ;;  %v3708_v60 = vpop.permute.xlu0 %3707 }
0x1890   : > { %v3598_v45 = vpack.c.bf16 %v3596_v43, %v3596_v43 }
0x1891   : > { %v6200_v47 = vpop.eup %6199 }
0x1892   : > { %v3597_v51 = vmul.f32 %v6200_v47, %v6196_v27  ;;  %5811 = vmatmul.mubr.msk.bf16.vlgmr.msra.gmra.mrb[80].mxu1 %vm1410_vm3, %v3598_v45 }
0x1893   : > { %5822 = vmatprep.mubr.msk.bf16.mxu1 %vm6633_vm2, %v6632_v20 }
0x1894   : > { %v3599_v56 = vpack.c.bf16 %v3597_v51, %v3597_v51 }
0x1895   : > { %5821 = vmatpush3.bf16.xpose.msra.mxu1 %v3715_v55 }
0x1896   : > { %5817 = vmatmul.mubr.msk.bf16.vlgmr.msra.gmra.mrb[84].mxu0 %vm1410_vm3, %v3599_v56  ;;  %5832 = vmatprep.subr.bf16.mxu1 %v6632_v20 }
0x1897   : > { %5827 = vmatpush3.bf16.xpose.msra.mxu0 %v3765_v59  ;;  %5828 = vmatprep.mubr.msk.bf16.mxu0 %vm6633_vm2, %v6632_v20 }
0x1898   : > { %5838 = vmatprep.subr.bf16.mxu0 %v6632_v20 }
0x189c   : > { %5823 = vmatmul.mubr.msk.bf16.vlgmr.msra.gmra.mrb[84].mxu1 %vm1410_vm3, %v3708_v60 }
0x189d   : > { %5834 = vmatprep.mubr.msk.bf16.mxu1 %vm6633_vm2, %v6632_v20 }
0x189e   : > { %5829 = vmatmul.mubr.msk.bf16.vlgmr.msra.gmra.mrb[88].mxu0 %vm1410_vm3, %v3758_v61 }
0x189f   : > { %5840 = vmatprep.mubr.msk.bf16.mxu0 %vm6633_vm2, %v6632_v20 }
0x1965   : > { %v7680_v25 = vpop.f32.mrb[80].mxu1 }
0x1966   : > { %v5812_v62 = vpop.f32.mrb[81].mxu1 }
0x1967   : > { %v3645_v63 = vpop.f32.mrb[82].mxu1 }
0x1968   : > { %v5813_v0 = vpop.f32.mrb[83].mxu1 }
0x1969   : > { %v7682_v2 = vpop.f32.mrb[84].mxu0 }
0x196a   : > { %v5818_v3 = vpop.f32.mrb[85].mxu0 }
0x196b   : > { %v3693_v4 = vpop.f32.mrb[86].mxu0 }
0x196c   : > { %v5819_v5 = vpop.f32.mrb[87].mxu0 }
0x196f   : > { %v3751_v7 = vpop.f32.mrb[84].mxu1 }
0x1970   : > { %v3752_v8 = vadd.f32 %v7556_v49, %v3751_v7  ;;  %v5824_v9 = vpop.f32.mrb[85].mxu1 }
0x1971   : > { %v3754_v10 = vpop.f32.mrb[86].mxu1  ;;  %v3801_v13 = vpop.f32.mrb[88].mxu0 }
0x1972   : > { %v3802_v14 = vadd.f32 %v7556_v49, %v3801_v13  ;;  %v5825_v15 = vpop.f32.mrb[87].mxu1  ;;  %v5830_v16 = vpop.f32.mrb[89].mxu0  ;;  %v3807_v17 = vsel %vm1410_vm3, %v3752_v8, -inf }
0x1973   : > { %3808 = vmax.xlane.f32.xlu0 %v3807_v17  ;;  %v3804_v19 = vpop.f32.mrb[90].mxu0 }
0x1974   : > { %v5831_v21 = vpop.f32.mrb[91].mxu0  ;;  %v3810_v23 = vsel %vm1410_vm3, %v3802_v14, -inf }
0x1975   : > { %3811 = vmax.xlane.f32.xlu1 %v3810_v23 }
0x1986   : > { %3879 = vrot.lane.b32.xlu1 %v7262_v22, %s6643_s22 }
0x198a   : > { %3940 = vrot.lane.b32.xlu1 %v7236_v1, %s6644_s8 }
0x198e   : > { %3990 = vrot.lane.b32.xlu1 %v7238_v6, %s6644_s8 }
0x1992   : > { %3988 = vrot.lane.b32.xlu1 %v7248_v12, %s6644_s8 }
0x1a00   : > { %v3809_v24 = vpop.xlane.xlu0 %3808 }
0x1a01   : > { %v3813_v26 = vsub.f32 %v3752_v8, %v3809_v24 }
0x1a02   : > { %v3812_v27 = vpop.xlane.xlu1 %3811 }
0x1a03   : > { %v3815_v28 = vmul.f32 1.442695, %v3813_v26  ;;  %v3814_v29 = vsub.f32 %v3802_v14, %v3812_v27 }
0x1a05   : > { %6201 = vpow2.f32 %v3815_v28  ;;  %v3817_v30 = vmul.f32 1.442695, %v3814_v29 }
0x1a06   : > { %v3880_v31 = vpop.permute.xlu1 %3879 }
0x1a07   : > { %6203 = vpow2.f32 %v3817_v30  ;;  %v3885_v32 = vsel %vm1530_vm4, %v3880_v31, 0 }
0x1a08   : > { %5839 = vmatpush3.bf16.msra.mxu0 %v3885_v32 }
0x1a09   : > { %5850 = vmatprep.subr.bf16.mxu0 %v6632_v20 }
0x1a0a   : > { %v3941_v53 = vpop.permute.xlu1 %3940 }
0x1a0e   : > { %v3991_v61 = vpop.permute.xlu1 %3990 }
0x1a0f   : > { %v6202_v1 = vpop.eup %6201  ;;  %v3996_v63 = vsel %vm1410_vm3, %v3991_v61, 0 }
0x1a10   : > { %v3819_v6 = vsel %vm1410_vm3, %v6202_v1, 0.0 }
0x1a11   : > { %v6204_v35 = vpop.eup %6203  ;;  %3820 = vadd.xlane.f32.xlu0 %v3819_v6 }
0x1a12   : > { %v3822_v12 = vsel %vm1410_vm3, %v6204_v35, 0.0  ;;  %v3989_v3 = vpop.permute.xlu1 %3988 }
0x1a15   : > { %3823 = vadd.xlane.f32.xlu0 %v3822_v12 }
0x1a2b   : > { %3831 = vrot.lane.b32.xlu0 %v7260_v18, %s6643_s22 }
0x1a2f   : > { %3938 = vrot.lane.b32.xlu0 %v7246_v11, %s6644_s8  ;;  %v3946_v11 = vsel %vm1410_vm3, %v3941_v53, 0 }
0x1a9e   : > { %v3821_v37 = vpop.xlane.xlu0 %3820 }
0x1a9f   : > { %6205 = vrcp.f32 %v3821_v37 }
0x1aa2   : > { %v3824_v43 = vpop.xlane.xlu0 %3823 }
0x1aa3   : > { %6207 = vrcp.f32 %v3824_v43 }
0x1aa6   : > { %v3832_v45 = vpop.permute.xlu0 %3831 }
0x1aa7   : > { %v3837_v47 = vsel %vm1530_vm4, %v3832_v45, 0 }
0x1aa8   : > { %5833 = vmatpush3.bf16.msra.mxu1 %v3837_v47 }
0x1aa9   : > { %v6206_v51 = vpop.eup %6205  ;;  %5844 = vmatprep.subr.bf16.mxu1 %v6632_v20 }
0x1aaa   : > { %v3827_v55 = vmul.f32 %v6206_v51, %v6202_v1  ;;  %v3939_v0 = vpop.permute.xlu0 %3938 }
0x1aac   : > { %v3829_v56 = vpack.c.bf16 %v3827_v55, %v3827_v55 }
0x1aad   : > { %v6208_v59 = vpop.eup %6207 }
0x1aae   : > { %v3828_v60 = vmul.f32 %v6208_v59, %v6204_v35  ;;  %5835 = vmatmul.mubr.msk.bf16.vlgmr.msra.gmra.mrb[88].mxu1 %vm1410_vm3, %v3829_v56 }
0x1aaf   : > { %5846 = vmatprep.mubr.msk.bf16.mxu1 %vm6633_vm2, %v6632_v20 }
0x1ab0   : > { %v3830_v62 = vpack.c.bf16 %v3828_v60, %v3828_v60 }
0x1ab1   : > { %5845 = vmatpush3.bf16.xpose.msra.mxu1 %v3946_v11 }
0x1ab2   : > { %5841 = vmatmul.mubr.msk.bf16.vlgmr.msra.gmra.mrb[92].mxu0 %vm1410_vm3, %v3830_v62  ;;  %5856 = vmatprep.subr.bf16.mxu1 %v6632_v20 }
0x1ab3   : > { %5851 = vmatpush3.bf16.xpose.msra.mxu0 %v3996_v63  ;;  %5852 = vmatprep.mubr.msk.bf16.mxu0 %vm6633_vm2, %v6632_v20 }
0x1ab4   : > { %5862 = vmatprep.subr.bf16.mxu0 %v6632_v20 }
0x1ab8   : > { %5847 = vmatmul.mubr.msk.bf16.vlgmr.msra.gmra.mrb[92].mxu1 %vm1410_vm3, %v3939_v0 }
0x1ab9   : > { %5858 = vmatprep.mubr.msk.bf16.mxu1 %vm6633_vm2, %v6632_v20 }
0x1aba   : > { %5853 = vmatmul.mubr.msk.bf16.vlgmr.msra.gmra.mrb[96].mxu0 %vm1410_vm3, %v3989_v3  ;;  %v6063_v3 = vld [vmem:[%s7139_s26] sm:$0xff]  }
0x1abb   : > { %5864 = vmatprep.mubr.msk.bf16.mxu0 %vm6633_vm2, %v6632_v20 }
0x1b81   : > { %v7722_v4 = vpop.f32.mrb[88].mxu1 }
0x1b82   : > { %v5836_v5 = vpop.f32.mrb[89].mxu1 }
0x1b83   : > { %v3876_v7 = vpop.f32.mrb[90].mxu1  ;;  %v6065_v5 = vld [vmem:[%s7139_s26 + $0x10] sm:$0xff]  }
0x1b84   : > { %v5837_v8 = vpop.f32.mrb[91].mxu1  ;;  %v6066_v7 = vld [vmem:[%s7139_s26 + $0x18] sm:$0xff]  }
0x1b85   : > { %v3921_v9 = vpop.f32.mrb[92].mxu0  ;;  %v6067_v8 = vld [vmem:[%s7139_s26 + $0x20] sm:$0xff]  }
0x1b86   : > { %v5842_v10 = vpop.f32.mrb[93].mxu0 }
0x1b87   : > { %v3924_v13 = vpop.f32.mrb[94].mxu0 }
0x1b88   : > { %v5843_v14 = vpop.f32.mrb[95].mxu0 }
0x1b8b   : > { %v3982_v15 = vpop.f32.mrb[92].mxu1 }
0x1b8c   : > { %v3983_v16 = vadd.f32 %v7556_v49, %v3982_v15  ;;  %v5848_v17 = vpop.f32.mrb[93].mxu1 }
0x1b8d   : > { %v3985_v19 = vpop.f32.mrb[94].mxu1  ;;  %v4032_v21 = vpop.f32.mrb[96].mxu0 }
0x1b8e   : > { %v4033_v23 = vadd.f32 %v7556_v49, %v4032_v21  ;;  %v5849_v24 = vpop.f32.mrb[95].mxu1  ;;  %v5854_v26 = vpop.f32.mrb[97].mxu0  ;;  %v4038_v27 = vsel %vm1410_vm3, %v3983_v16, -inf }
0x1b8f   : > { %4039 = vmax.xlane.f32.xlu0 %v4038_v27  ;;  %v4035_v28 = vpop.f32.mrb[98].mxu0 }
0x1b90   : > { %v5855_v29 = vpop.f32.mrb[99].mxu0  ;;  %v4041_v30 = vsel %vm1410_vm3, %v4033_v23, -inf }
0x1b91   : > { %4042 = vmax.xlane.f32.xlu1 %v4041_v30  ;;  %v5308_v29 = vld [vmem:[%s877_s13] ss:$0 sm:$0xff]  ;;  %s8067_s13 = scalar_lea.vmem %s7975_s18, %s7113_s11 }
0x1ba2   : > { %4110 = vrot.lane.b32.xlu1 %v7262_v22, %s6644_s8 }
0x1ba6   : > { %1850 = vrot.lane.b32.xlu1 %v7342_v54, %s6645_s28 }
0x1baa   : > { %1852 = vrot.lane.b32.xlu1 %v7344_v58, %s6645_s28 }
0x1bae   : > { %2083 = vrot.lane.b32.xlu1 %v7386_v50, %s6646_s30 }
0x1bb2   : > { %2314 = vrot.lane.b32.xlu1 %v7428_v44, %s6647_s7 }
0x1bb6   : > { %2545 = vrot.lane.b32.xlu1 %v7470_v41, %s6648_s27 }
0x1bba   : > { %2776 = vrot.lane.b32.xlu1 %v7512_v39, %s6644_s8 }
0x1bbe   : > { %3007 = vrot.lane.b32.xlu1 %v7554_v42, %s6643_s22 }
0x1bc2   : > { %3238 = vrot.lane.b32.xlu1 %v7598_v48, %s6642_s6 }
0x1bc6   : > { %3469 = vrot.lane.b32.xlu1 %v7640_v57, %s6641_s0 }
0x1bca   : > { %3700 = vrot.lane.b32.xlu1 %v7682_v2, %s6640_s29 }
0x1bce   : > { %3931 = vrot.lane.b32.xlu1 %v3921_v9, %s6639_s15  ;;  %v6068_v9 = vld [vmem:[%s7139_s26 + $0x28] sm:$0xff]  }
0x1c1c   : > { %v4040_v22 = vpop.xlane.xlu0 %4039 }
0x1c1d   : > { %v4044_v54 = vsub.f32 %v3983_v16, %v4040_v22 }
0x1c1e   : > { %v4043_v58 = vpop.xlane.xlu1 %4042 }
0x1c1f   : > { %v4046_v50 = vmul.f32 1.442695, %v4044_v54  ;;  %v4045_v44 = vsub.f32 %v4033_v23, %v4043_v58 }
0x1c21   : > { %6209 = vpow2.f32 %v4046_v50  ;;  %v4048_v41 = vmul.f32 1.442695, %v4045_v44  ;;  %v6246_v50 = vld [vmem:[#allocation2] sm:$0xff] }
0x1c22   : > { %v4111_v39 = vpop.permute.xlu1 %4110 }
0x1c23   : > { %6211 = vpow2.f32 %v4048_v41  ;;  %v4116_v42 = vsel %vm1530_vm4, %v4111_v39, 0 }
0x1c24   : > { %5863 = vmatpush3.bf16.msra.mxu0 %v4116_v42  ;;  %v6247_v42 = vld [vmem:[#allocation2 + $0x8] sm:$0xff] }
0x1c26   : > { %v1851_v49 = vpop.permute.xlu1 %1850 }
0x1c27   : > { %1857 = vst.msk [vmem:[#allocation3] sm:$0xff] %vm1856_vm5, %v1851_v49 }
0x1c2a   : > { %v1853_v48 = vpop.permute.xlu1 %1852 }
0x1c2b   : > { %v6210_v57 = vpop.eup %6209  ;;  %1858 = vst.msk [vmem:[#allocation3 + $0x8] sm:$0xff] %vm1856_vm5, %v1853_v48 }
0x1c2c   : > { %v4050_v2 = vsel %vm1410_vm3, %v6210_v57, 0.0 }
0x1c2d   : > { %v6212_v31 = vpop.eup %6211  ;;  %4051 = vadd.xlane.f32.xlu0 %v4050_v2 }
0x1c2e   : > { %v2084_v32 = vpop.permute.xlu1 %2083  ;;  %v4053_v1 = vsel %vm1410_vm3, %v6212_v31, 0.0 }
0x1c2f   : > { %2089 = vst.msk [vmem:[#allocation3 + $0x8] sm:$0xff] %vm2087_vm6, %v2084_v32 }
0x1c31   : > { %4054 = vadd.xlane.f32.xlu0 %v4053_v1 }
0x1c32   : > { %v2315_v6 = vpop.permute.xlu1 %2314 }
0x1c33   : > { %2320 = vst.msk [vmem:[#allocation3 + $0x8] sm:$0xff] %vm2318_vm7, %v2315_v6 }
0x1c36   : > { %v2546_v35 = vpop.permute.xlu1 %2545 }
0x1c37   : > { %2551 = vst.msk [vmem:[#allocation3 + $0x8] sm:$0xff] %vm2549_vm8, %v2546_v35 }
0x1c3a   : > { %v2777_v12 = vpop.permute.xlu1 %2776 }
0x1c3b   : > { %2782 = vst.msk [vmem:[#allocation3 + $0x8] sm:$0xff] %vm2780_vm9, %v2777_v12 }
0x1c3e   : > { %v3008_v37 = vpop.permute.xlu1 %3007 }
0x1c3f   : > { %3013 = vst.msk [vmem:[#allocation3 + $0x8] sm:$0xff] %vm3011_vm10, %v3008_v37 }
0x1c42   : > { %v3239_v43 = vpop.permute.xlu1 %3238 }
0x1c43   : > { %3244 = vst.msk [vmem:[#allocation3 + $0x8] sm:$0xff] %vm3242_vm11, %v3239_v43 }
0x1c46   : > { %v3470_v45 = vpop.permute.xlu1 %3469 }
0x1c47   : > { %3475 = vst.msk [vmem:[#allocation3 + $0x8] sm:$0xff] %vm3473_vm12, %v3470_v45  ;;  %4062 = vrot.lane.b32.xlu0 %v7260_v18, %s6644_s8 }
0x1c4a   : > { %v3701_v47 = vpop.permute.xlu1 %3700 }
0x1c4b   : > { %3706 = vst.msk [vmem:[#allocation3 + $0x8] sm:$0xff] %vm3704_vm13, %v3701_v47  ;;  %2081 = vrot.lane.b32.xlu0 %v7384_v46, %s6646_s30  ;;  %v6071_v47 = vld [vmem:[%s7144_s2 + $0x4] ss:$12 sps:$4 sm:$0xff]  }
0x1c4c   : > { %4458 = vmatprep.subr.bf16.mxu0 %v6071_v47 }
0x1c4e   : > { %v3932_v51 = vpop.permute.xlu1 %3931 }
0x1c4f   : > { %3937 = vst.msk [vmem:[#allocation3 + $0x8] sm:$0xff] %vm3935_vm14, %v3932_v51  ;;  %2312 = vrot.lane.b32.xlu0 %v7426_v40, %s6647_s7  ;;  %v6069_v51 = vld [vmem:[%s7144_s2] ss:$12 sps:$4 sm:$0xff]  }
0x1c53   : > { %2543 = vrot.lane.b32.xlu0 %v7468_v36, %s6648_s27 }
0x1c57   : > { %2774 = vrot.lane.b32.xlu0 %v7510_v34, %s6644_s8 }
0x1c5b   : > { %3005 = vrot.lane.b32.xlu0 %v7552_v33, %s6643_s22 }
0x1c5f   : > { %3236 = vrot.lane.b32.xlu0 %v7596_v38, %s6642_s6 }
0x1c63   : > { %3467 = vrot.lane.b32.xlu0 %v7638_v52, %s6641_s0 }
0x1c67   : > { %3698 = vrot.lane.b32.xlu0 %v7680_v25, %s6640_s29 }
0x1c6b   : > { %3929 = vrot.lane.b32.xlu0 %v7722_v4, %s6639_s15  ;;  %v6064_v4 = vld [vmem:[%s7139_s26 + $0x8] sm:$0xff]   ;;  %s8068_s26 = sld [smem:[#allocation42_spill]] (!%p5363_p6) }
0x1cba   : > { %v4052_v18 = vpop.xlane.xlu0 %4051 }
0x1cbb   : > { %6213 = vrcp.f32 %v4052_v18  ;;  %v6072_v18 = vld [vmem:[%s7144_s2 + $0x8] ss:$12 sps:$4 sm:$0xff]  }
0x1cbe   : > { %v4055_v46 = vpop.xlane.xlu0 %4054 }
0x1cbf   : > { %6215 = vrcp.f32 %v4055_v46  ;;  %v6075_v46 = vld [vmem:[%s7144_s2 + $0x1c] ss:$12 sps:$4 sm:$0xff]  }
0x1cc2   : > { %v4063_v40 = vpop.permute.xlu0 %4062 }
0x1cc3   : > { %v4068_v36 = vsel %vm1530_vm4, %v4063_v40, 0  ;;  %v6073_v40 = vld [vmem:[%s7144_s2 + $0x18] ss:$12 sps:$4 sm:$0xff]  }
0x1cc4   : > { %5857 = vmatpush3.bf16.msra.mxu1 %v4068_v36  ;;  %v6076_v36 = vld [vmem:[%s7144_s2 + $0x20] ss:$12 sps:$4 sm:$0xff]  }
0x1cc5   : > { %v6214_v34 = vpop.eup %6213  ;;  %5868 = vmatprep.subr.bf16.mxu1 %v6632_v20 }
0x1cc6   : > { %v4058_v33 = vmul.f32 %v6214_v34, %v6210_v57  ;;  %v2082_v38 = vpop.permute.xlu0 %2081  ;;  %v6079_v34 = vld [vmem:[%s7144_s2 + $0x34] ss:$12 sps:$4 sm:$0xff]  }
0x1cc7   : > { %2088 = vst.msk [vmem:[#allocation3] sm:$0xff] %vm2087_vm6, %v2082_v38  ;;  %v6080_v38 = vld [vmem:[%s7144_s2 + $0x38] ss:$12 sps:$4 sm:$0xff]  }
0x1cc8   : > { %v4060_v52 = vpack.c.bf16 %v4058_v33, %v4058_v33  ;;  %v6077_v33 = vld [vmem:[%s7144_s2 + $0x30] ss:$12 sps:$4 sm:$0xff]  }
0x1cc9   : > { %v6216_v25 = vpop.eup %6215 }
0x1cca   : > { %v4059_v53 = vmul.f32 %v6216_v25, %v6212_v31  ;;  %5859 = vmatmul.mubr.msk.bf16.vlgmr.msra.gmra.mrb[96].mxu1 %vm1410_vm3, %v4060_v52  ;;  %v2313_v55 = vpop.permute.xlu0 %2312  ;;  %v6083_v52 = vld [vmem:[%s7144_s2 + $0x4c] ss:$12 sps:$4 sm:$0xff]   ;;  %v6081_v25 = vld [vmem:[%s7144_s2 + $0x48] ss:$12 sps:$4 sm:$0xff]  }
0x1ccb   : > { %2319 = vst.msk [vmem:[#allocation3] sm:$0xff] %vm2318_vm7, %v2313_v55  ;;  %5880 = vmatprep.mubr.msk.bf16.mxu1 %vm6633_vm2, %v6632_v20  ;;  %5869 = vmatpush3.bf16.msra.mxu1 %v6063_v3  ;;  %v6087_v55 = vld [vmem:[%s7144_s2 + $0x64] ss:$12 sps:$4 sm:$0xff]  }
0x1ccc   : > { %v4061_v56 = vpack.c.bf16 %v4059_v53, %v4059_v53  ;;  %5870 = vmatprep.subr.bf16.mxu1 %v6632_v20  ;;  %v6084_v53 = vld [vmem:[%s7144_s2 + $0x50] ss:$12 sps:$4 sm:$0xff]  }
0x1cce   : > { %v2544_v59 = vpop.permute.xlu0 %2543  ;;  %5865 = vmatmul.mubr.msk.bf16.vlgmr.msra.gmra.mrb[100].mxu0 %vm1410_vm3, %v4061_v56  ;;  %v6085_v56 = vld [vmem:[%s7144_s2 + $0x60] ss:$12 sps:$4 sm:$0xff]  }
0x1ccf   : > { %2550 = vst.msk [vmem:[#allocation3] sm:$0xff] %vm2549_vm8, %v2544_v59  ;;  %5871 = vmatpush3.bf16.msra.mxu1 %v6064_v4  ;;  %4459 = vmatpush1.bf16.msra.mxu0 %v6069_v51  ;;  %v6088_v59 = vld [vmem:[%s7144_s2 + $0x68] ss:$12 sps:$4 sm:$0xff]  }
0x1cd0   : > { %5872 = vmatprep.subr.bf16.mxu1 %v6632_v20  ;;  %4460 = vmatprep.subr.bf16.mxu0 %v6075_v46  ;;  %v4342_v46 = vld [vmem:[%s7151_s10] sm:$0x7] }
0x1cd2   : > { %v2775_v60 = vpop.permute.xlu0 %2774 }
0x1cd3   : > { %2781 = vst.msk [vmem:[#allocation3] sm:$0xff] %vm2780_vm9, %v2775_v60  ;;  %5873 = vmatpush3.bf16.msra.mxu1 %v6065_v5  ;;  %4461 = vmatpush1.bf16.msra.mxu0 %v6073_v40  ;;  %v6089_v60 = vld [vmem:[%s7144_s2 + $0x78] ss:$12 sps:$4 sm:$0xff]  }
0x1cd4   : > { %5874 = vmatprep.subr.bf16.mxu1 %v6632_v20  ;;  %4462 = vmatprep.subr.bf16.mxu0 %v6079_v34 }
0x1cd6   : > { %v3006_v61 = vpop.permute.xlu0 %3005 }
0x1cd7   : > { %3012 = vst.msk [vmem:[#allocation3] sm:$0xff] %vm3011_vm10, %v3006_v61  ;;  %5875 = vmatpush3.bf16.msra.mxu1 %v6066_v7  ;;  %4463 = vmatpush1.bf16.msra.mxu0 %v6077_v33  ;;  %v6091_v61 = vld [vmem:[%s7144_s2 + $0x7c] ss:$12 sps:$4 sm:$0xff]  }
0x1cd8   : > { %5876 = vmatprep.subr.bf16.mxu1 %v6632_v20  ;;  %4464 = vmatprep.subr.bf16.mxu0 %v6083_v52 }
0x1cda   : > { %v3237_v11 = vpop.permute.xlu0 %3236 }
0x1cdb   : > { %3243 = vst.msk [vmem:[#allocation3] sm:$0xff] %vm3242_vm11, %v3237_v11  ;;  %5877 = vmatpush3.bf16.msra.mxu1 %v6067_v8  ;;  %4465 = vmatpush1.bf16.msra.mxu0 %v6081_v25  ;;  %v6092_v11 = vld [vmem:[%s7144_s2 + $0x80] ss:$12 sps:$4 sm:$0xff]  }
0x1cdc   : > { %5878 = vmatprep.subr.bf16.mxu1 %v6632_v20  ;;  %4466 = vmatprep.subr.bf16.mxu0 %v6087_v55 }
0x1cde   : > { %v3468_v62 = vpop.permute.xlu0 %3467 }
0x1cdf   : > { %3474 = vst.msk [vmem:[#allocation3] sm:$0xff] %vm3473_vm12, %v3468_v62  ;;  %5879 = vmatpush3.bf16.msra.mxu1 %v6068_v9  ;;  %4467 = vmatpush1.bf16.msra.mxu0 %v6085_v56  ;;  %v6649_v62 = vmov 0  }
0x1ce0   : > { %5884 = vmatprep.subr.bf16.mxu1 %v6632_v20  ;;  %4468 = vmatprep.subr.bf16.mxu0 %v6091_v61 }
0x1ce1   : > { %4490 = vmatprep.mubr.bf16.mxu0 %v6649_v62 }
0x1ce2   : > { %v3699_v63 = vpop.permute.xlu0 %3698 }
0x1ce3   : > { %3705 = vst.msk [vmem:[#allocation3] sm:$0xff] %vm3704_vm13, %v3699_v63  ;;  %4469 = vmatpush1.bf16.msra.mxu0 %v6089_v60 }
0x1ce6   : > { %v3930_v0 = vpop.permute.xlu0 %3929 }
0x1ce7   : > { %3936 = vst.msk [vmem:[#allocation3] sm:$0xff] %vm3935_vm14, %v3930_v0 }
0x1d9d   : > { %v4104_v10 = vpop.f32.mrb[96].mxu1 }
0x1d9e   : > { %4160 = vrot.lane.b32.xlu0 %v4104_v10, %s6638_s16  ;;  %v5860_v13 = vpop.f32.mrb[97].mxu1  ;;  %v5316_v10 = vld [vmem:[%s885_s5] ss:$0 sm:$0xff] }
0x1d9f   : > { %v4107_v14 = vpop.f32.mrb[98].mxu1 }
0x1da0   : > { %v5861_v15 = vpop.f32.mrb[99].mxu1 }
0x1da1   : > { %v4152_v16 = vpop.f32.mrb[100].mxu0 }
0x1da2   : > { %4162 = vrot.lane.b32.xlu1 %v4152_v16, %s6638_s16  ;;  %v5866_v17 = vpop.f32.mrb[101].mxu0  ;;  %v5317_v16 = vld [vmem:[%s893_s1] ss:$0 sm:$0xff]  ;;  %s8069_s1 = sld [smem:[#allocation43_spill]] (!%p5363_p6) }
0x1da3   : > { %v4155_v19 = vpop.f32.mrb[102].mxu0 }
0x1da4   : > { %v5867_v21 = vpop.f32.mrb[103].mxu0 }
0x1e10   : > { %v4161_v23 = vpop.permute.xlu0 %4160 }
0x1e11   : > { %4167 = vst.msk [vmem:[#allocation3] sm:$0xff] %vm4166_vm15, %v4161_v23 }
0x1e14   : > { %v4163_v24 = vpop.permute.xlu1 %4162 }
0x1e15   : > { %4168 = vst.msk [vmem:[#allocation3 + $0x8] sm:$0xff] %vm4166_vm15, %v4163_v24  ;;  %v6093_v24 = vld [vmem:[%s7156_s12 + $0x80] sm:$0xff]  }
0x1e18   : > { %v4169_v26 = vld [vmem:[#allocation3] sm:$0xff] }
0x1e1c   : > { %v4170_v27 = vld [vmem:[#allocation3 + $0x8] sm:$0xff] }
0x1e1d   : > { %v4171_v28 = vpack.c.bf16 %v4170_v27, %v4169_v26  ;;  %v6094_v26 = vld [vmem:[%s7156_s12 + $0x40] sm:$0xff]  }
0x1e1e   : > { %v6095_v27 = vld [vmem:[%s7156_s12] sm:$0xff]   ;;  %5501 = vmatprep.subr.bf16.mxu0 %v6094_v26 }
0x1e1f   : > { %5881 = vmatmul.mubr.msk.bf16.vlgmr.msra.gmra.mrb[100].mxu1 %vm1065_vm1, %v4171_v28  ;;  %v6096_v28 = vld [vmem:[%s7156_s12 + $0x88] sm:$0xff]  }
0x1e20   : > { %5896 = vmatprep.mubr.msk.bf16.mxu1 %vm6633_vm2, %v6632_v20  ;;  %5885 = vmatpush3.bf16.msra.mxu1 %v6072_v18 }
0x1e21   : > { %5886 = vmatprep.subr.bf16.mxu1 %v6632_v20 }
0x1e24   : > { %5887 = vmatpush3.bf16.msra.mxu1 %v6076_v36 }
0x1e25   : > { %5888 = vmatprep.subr.bf16.mxu1 %v6632_v20 }
0x1e28   : > { %5889 = vmatpush3.bf16.msra.mxu1 %v6080_v38 }
0x1e29   : > { %5890 = vmatprep.subr.bf16.mxu1 %v6632_v20 }
0x1e2c   : > { %5891 = vmatpush3.bf16.msra.mxu1 %v6084_v53 }
0x1e2d   : > { %5892 = vmatprep.subr.bf16.mxu1 %v6632_v20 }
0x1e30   : > { %5893 = vmatpush3.bf16.msra.mxu1 %v6088_v59 }
0x1e31   : > { %5894 = vmatprep.subr.bf16.mxu1 %v6632_v20 }
0x1e34   : > { %5895 = vmatpush3.bf16.msra.mxu1 %v6092_v11 }
0x1e35   : > { %5900 = vmatprep.subr.bf16.mxu1 %v6632_v20 }
0x1ef2   : > { %v4264_v30 = vpop.f32.mrb[100].mxu1 }
0x1ef3   : > { %v4265_v22 = vadd.f32 %v5308_v29, %v4264_v30  ;;  %v5882_v54 = vpop.f32.mrb[101].mxu1  ;;  %v6098_v30 = vld [vmem:[%s7156_s12 + $0x8] sm:$0xff]  }
0x1ef4   : > { %v4267_v58 = vpop.f32.mrb[102].mxu1  ;;  %v6100_v54 = vld [vmem:[%s7156_s12 + $0x50] sm:$0xff]  }
0x1ef5   : > { %v7817_v44 = vadd.f32 %v6246_v50, %v4265_v22  ;;  %v4268_v41 = vadd.f32 %v5308_v29, %v4267_v58  ;;  %v5883_v39 = vpop.f32.mrb[103].mxu1  ;;  %v6097_v29 = vld [vmem:[%s7156_s12 + $0x48] sm:$0xff]   ;;  %v6099_v22 = vld [vmem:[%s7156_s12 + $0x90] sm:$0xff]   ;;  %v6102_v50 = vld [vmem:[%s7156_s12 + $0x98] sm:$0xff]  }
0x1ef6   : > { %v6101_v58 = vld [vmem:[%s7156_s12 + $0x10] sm:$0xff]   ;;  %v6104_v39 = vld [vmem:[%s7156_s12 + $0x18] sm:$0xff]  }
0x1ef7   : > { %v7819_v49 = vadd.f32 %v6247_v42, %v4268_v41  ;;  %v4275_v48 = vsel %vm1065_vm1, %v7817_v44, 0.0  ;;  %v6103_v41 = vld [vmem:[%s7156_s12 + $0x58] sm:$0xff]   ;;  %v6105_v42 = vld [vmem:[%s7156_s12 + $0xa0] sm:$0xff]  }
0x1ef8   : > { %4276 = vadd.xlane.f32.xlu0 %v4275_v48  ;;  %v6106_v48 = vld [vmem:[%s7156_s12 + $0x60] sm:$0xff]  }
0x1ef9   : > { %v4278_v57 = vsel %vm1065_vm1, %v7819_v49, 0.0 }
0x1efa   : > { %4279 = vadd.xlane.f32.xlu1 %v4278_v57  ;;  %v6107_v57 = vld [vmem:[%s7156_s12 + $0x20] sm:$0xff]  }
0x1f85   : > { %v4277_v2 = vpop.xlane.xlu0 %4276 }
0x1f86   : > { %v4281_v31 = vmul.f32 0.010416667, %v4277_v2  ;;  %v6108_v2 = vld [vmem:[%s7156_s12 + $0xa8] sm:$0xff]  }
0x1f87   : > { %v4280_v32 = vpop.xlane.xlu1 %4279 }
0x1f88   : > { %v4283_v1 = vsub.f32 %v7817_v44, %v4281_v31  ;;  %v4282_v6 = vmul.f32 0.010416667, %v4280_v32  ;;  %v6109_v31 = vld [vmem:[%s7156_s12 + $0x68] sm:$0xff]  }
0x1f89   : > { %v6110_v32 = vld [vmem:[%s7156_s12 + $0x28] sm:$0xff]  }
0x1f8a   : > { %v7827_v35 = vsub.f32 %v7819_v49, %v4282_v6  ;;  %v4285_v12 = vmul.f32 %v4283_v1, %v4283_v1  ;;  %v6112_v6 = vld [vmem:[%s7156_s12 + $0x70] sm:$0xff]  }
0x1f8c   : > { %v4287_v37 = vsel %vm1065_vm1, %v4285_v12, 0.0  ;;  %v4286_v43 = vmul.f32 %v7827_v35, %v7827_v35  ;;  %v6114_v12 = vld [vmem:[%s7156_s12 + $0xb8] sm:$0xff]  }
0x1f8d   : > { %4288 = vadd.xlane.f32.xlu0 %v4287_v37  ;;  %v6115_v37 = vld [vmem:[%s7156_s12 + $0x78] sm:$0xff]  }
0x1f8e   : > { %v4290_v45 = vsel %vm1065_vm1, %v4286_v43, 0.0  ;;  %v6116_v43 = vld [vmem:[%s7156_s12 + $0x38] sm:$0xff]  }
0x1f91   : > { %4291 = vadd.xlane.f32.xlu0 %v4290_v45  ;;  %v4344_v45 = vlaneseq }
0x1f93   : > { %v4345_v47 = vshrl.u32 %v4344_v45, 7 }
0x1f95   : > { %v4346_v51 = vsub.s32 0, %v4345_v47  ;;  %v4354_v18 = vsub.s32 2, %v4345_v47  ;;  %v4350_v40 = vsub.s32 1, %v4345_v47 }
0x1f97   : > { %v4347_v36 = vrot.slane %v4342_v46, %v4346_v51  ;;  %v4355_v34 = vrot.slane %v4342_v46, %v4354_v18  ;;  %v4351_v33 = vrot.slane %v4342_v46, %v4350_v40  ;;  %v5338_v46 = vld [vmem:[%s8067_s13] ss:$0 sm:$0xff] }
0x201a   : > { %v4289_v63 = vpop.xlane.xlu0 %4288 }
0x201b   : > { %v4293_v0 = vmul.f32 0.010416667, %v4289_v63 }
0x201d   : > { %v4295_v3 = vadd.f32 1e-05, %v4293_v0 }
0x201e   : > { %v4292_v4 = vpop.xlane.xlu0 %4291 }
0x201f   : > { %6217 = vrsqrt.f32 %v4295_v3  ;;  %v4294_v5 = vmul.f32 0.010416667, %v4292_v4 }
0x2021   : > { %v4296_v7 = vadd.f32 1e-05, %v4294_v5 }
0x2023   : > { %6219 = vrsqrt.f32 %v4296_v7 }
0x2029   : > { %v6218_v8 = vpop.eup %6217 }
0x202a   : > { %v4299_v9 = vmul.f32 %v6218_v8, %v4283_v1  ;;  %v6111_v1 = vld [vmem:[%s7156_s12 + $0xb0] sm:$0xff]  }
0x202c   : > { %v4307_v14 = vmul.f32 %v5316_v10, %v4299_v9 }
0x202d   : > { %v6220_v13 = vpop.eup %6219 }
0x202e   : > { %v4300_v15 = vmul.f32 %v6220_v13, %v7827_v35  ;;  %v4315_v19 = vadd.f32 %v5317_v16, %v4307_v14  ;;  %v6113_v35 = vld [vmem:[%s7156_s12 + $0x30] sm:$0xff]  }
0x2030   : > { %v4308_v17 = vmul.f32 %v5316_v10, %v4300_v15 }
0x2032   : > { %v4316_v21 = vadd.f32 %v5317_v16, %v4308_v17 }
0x2034   : > { %v4317_v23 = vpack.c.bf16 %v4316_v21, %v4315_v19 }
0x2036   : > { %5336 = vmatmul.mubr.msk.bf16.vlgmr.msra.gmra.mrb[104].mxu0 %vm1065_vm1, %v4317_v23  ;;  %5897 = vmatmul.mubr.msk.bf16.vlgmr.msra.gmra.mrb[104].mxu1 %vm1065_vm1, %v4317_v23 }
0x2037   : > { %5916 = vmatprep.mubr.msk.bf16.mxu1 %vm6633_vm2, %v6632_v20  ;;  %5901 = vmatpush3.bf16.msra.mxu1 %v6093_v24 }
0x2038   : > { %5902 = vmatprep.subr.bf16.mxu1 %v6632_v20  ;;  %5502 = vmatpush3.bf16.msra.mxu0 %v6095_v27 }
0x2039   : > { %5503 = vmatprep.subr.bf16.mxu0 %v6097_v29 }
0x203b   : > { %5903 = vmatpush3.bf16.msra.mxu1 %v6096_v28 }
0x203c   : > { %5904 = vmatprep.subr.bf16.mxu1 %v6632_v20  ;;  %5504 = vmatpush3.bf16.msra.mxu0 %v6098_v30 }
0x203d   : > { %5505 = vmatprep.subr.bf16.mxu0 %v6100_v54 }
0x203f   : > { %5905 = vmatpush3.bf16.msra.mxu1 %v6099_v22 }
0x2040   : > { %5906 = vmatprep.subr.bf16.mxu1 %v6632_v20  ;;  %5506 = vmatpush3.bf16.msra.mxu0 %v6101_v58 }
0x2041   : > { %5507 = vmatprep.subr.bf16.mxu0 %v6103_v41 }
0x2043   : > { %5907 = vmatpush3.bf16.msra.mxu1 %v6102_v50 }
0x2044   : > { %5908 = vmatprep.subr.bf16.mxu1 %v6632_v20  ;;  %5508 = vmatpush3.bf16.msra.mxu0 %v6104_v39 }
0x2045   : > { %5509 = vmatprep.subr.bf16.mxu0 %v6106_v48 }
0x2047   : > { %5909 = vmatpush3.bf16.msra.mxu1 %v6105_v42 }
0x2048   : > { %5910 = vmatprep.subr.bf16.mxu1 %v6632_v20  ;;  %5510 = vmatpush3.bf16.msra.mxu0 %v6107_v57 }
0x2049   : > { %5511 = vmatprep.subr.bf16.mxu0 %v6109_v31 }
0x204b   : > { %5911 = vmatpush3.bf16.msra.mxu1 %v6108_v2 }
0x204c   : > { %5912 = vmatprep.subr.bf16.mxu1 %v6632_v20  ;;  %5512 = vmatpush3.bf16.msra.mxu0 %v6110_v32 }
0x204d   : > { %5513 = vmatprep.subr.bf16.mxu0 %v6112_v6 }
0x204f   : > { %5913 = vmatpush3.bf16.msra.mxu1 %v6111_v1 }
0x2050   : > { %5914 = vmatprep.subr.bf16.mxu1 %v6632_v20  ;;  %5514 = vmatpush3.bf16.msra.mxu0 %v6113_v35 }
0x2051   : > { %5515 = vmatprep.subr.bf16.mxu0 %v6115_v37 }
0x2053   : > { %5915 = vmatpush3.bf16.msra.mxu1 %v6114_v12 }
0x2054   : > { %5516 = vmatpush3.bf16.msra.mxu0 %v6116_v43 }
0x2109   : > { %v4492_v38 = vpop.f32.mrb[104].mxu0  ;;  %v4535_v52 = vpop.f32.mrb[104].mxu1 }
0x210a   : > { %v4493_v25 = vadd.f32 %v4492_v38, %v4347_v36  ;;  %v4536_v20 = vadd.f32 %v4535_v52, %v4355_v34  ;;  %v4494_v53 = vpop.f32.mrb[105].mxu0  ;;  %v5898_v55 = vpop.f32.mrb[105].mxu1 }
0x210b   : > { %v4495_v56 = vadd.f32 %v4494_v53, %v4351_v33  ;;  %v4496_v59 = vpop.f32.mrb[106].mxu0  ;;  %v4538_v60 = vpop.f32.mrb[106].mxu1 }
0x210c   : > { %v4542_v61 = vmul.f32 -1.702, %v4493_v25  ;;  %v4544_v11 = vmul.f32 -1.702, %v4536_v20  ;;  %v4497_v62 = vadd.f32 %v4496_v59, %v4347_v36  ;;  %v4539_v63 = vadd.f32 %v4538_v60, %v4355_v34  ;;  %v4498_v0 = vpop.f32.mrb[107].mxu0  ;;  %v5899_v3 = vpop.f32.mrb[107].mxu1 }
0x210d   : > { %v4543_v4 = vmul.f32 -1.702, %v4495_v56  ;;  %v4499_v5 = vadd.f32 %v4498_v0, %v4351_v33 }
0x210e   : > { %v4548_v7 = vmul.f32 1.442695, %v4542_v61  ;;  %v4552_v8 = vmul.f32 1.442695, %v4544_v11  ;;  %v4545_v9 = vmul.f32 -1.702, %v4497_v62 }
0x210f   : > { %v4550_v10 = vmul.f32 1.442695, %v4543_v4  ;;  %v4547_v13 = vmul.f32 -1.702, %v4539_v63  ;;  %v4546_v14 = vmul.f32 -1.702, %v4499_v5 }
0x2110   : > { %6221 = vpow2.f32 %v4548_v7  ;;  %v4554_v15 = vmul.f32 1.442695, %v4545_v9 }
0x2111   : > { %6223 = vpow2.f32 %v4552_v8  ;;  %v4558_v16 = vmul.f32 1.442695, %v4547_v13  ;;  %v4556_v17 = vmul.f32 1.442695, %v4546_v14 }
0x2112   : > { %6225 = vpow2.f32 %v4550_v10 }
0x2113   : > { %6227 = vpow2.f32 %v4554_v15 }
0x2114   : > { %6229 = vpow2.f32 %v4558_v16 }
0x2115   : > { %6231 = vpow2.f32 %v4556_v17 }
0x211a   : > { %v6222_v19 = vpop.eup %6221 }
0x211b   : > { %v6224_v21 = vpop.eup %6223  ;;  %v4560_v23 = vadd.f32 1.0, %v6222_v19 }
0x211c   : > { %v6226_v24 = vpop.eup %6225  ;;  %v4562_v26 = vadd.f32 1.0, %v6224_v21  ;;  %v5364_v21 = vld [vmem:[%s8068_s26] ss:$0 sm:$0xff] (!%p5363_p6) }
0x211d   : > { %v6228_v27 = vpop.eup %6227  ;;  %6233 = vrcp.f32 %v4560_v23  ;;  %v4561_v28 = vadd.f32 1.0, %v6226_v24  ;;  %v5365_v24 = vld [vmem:[%s8069_s1] ss:$0 sm:$0xff] (!%p5363_p6) }
0x211e   : > { %v6230_v29 = vpop.eup %6229  ;;  %6235 = vrcp.f32 %v4562_v26  ;;  %v4563_v30 = vadd.f32 1.0, %v6228_v27 }
0x211f   : > { %v6232_v22 = vpop.eup %6231  ;;  %6237 = vrcp.f32 %v4561_v28  ;;  %v4565_v54 = vadd.f32 1.0, %v6230_v29 }
0x2120   : > { %6239 = vrcp.f32 %v4563_v30  ;;  %v4564_v58 = vadd.f32 1.0, %v6232_v22 }
0x2121   : > { %6241 = vrcp.f32 %v4565_v54 }
0x2122   : > { %6243 = vrcp.f32 %v4564_v58 }
0x2127   : > { %v6234_v50 = vpop.eup %6233 }
0x2128   : > { %v6236_v41 = vpop.eup %6235  ;;  %v4578_v57 = vmul.f32 %v6234_v50, %v4493_v25 }
0x2129   : > { %v6238_v39 = vpop.eup %6237  ;;  %v4580_v32 = vmul.f32 %v6236_v41, %v4536_v20 }
0x212a   : > { %v6240_v42 = vpop.eup %6239  ;;  %v4579_v6 = vmul.f32 %v6238_v39, %v4495_v56 }
0x212b   : > { %v6242_v48 = vpop.eup %6241  ;;  %v4581_v2 = vmul.f32 %v6240_v42, %v4497_v62 }
0x212c   : > { %v6244_v31 = vpop.eup %6243  ;;  %v4583_v1 = vmul.f32 %v6242_v48, %v4539_v63 }
0x212d   : > { %v4584_v35 = vpack.c.bf16 %v4581_v2, %v4578_v57  ;;  %v4582_v12 = vmul.f32 %v6244_v31, %v4499_v5 }
0x212e   : > { %v4586_v37 = vpack.c.bf16 %v4583_v1, %v4580_v32 }
0x212f   : > { %v4585_v43 = vpack.c.bf16 %v4582_v12, %v4579_v6 }
0x2130   : > { %5917 = vmatmul.mubr.bf16.vlgmr.msra.gmra.mrb[108].mxu1 %v4586_v37 }
0x2131   : > { %4818 = vmatprep.mubr.bf16.mxu0 %v4585_v43 }
0x2132   : > { %4819 = vmatmul.mubr.bf16.vlgmr.msra.gmra.mrb[108].mxu0 %v4584_v35 }
0x2203   : > { %v4861_v45 = vpop.f32.mrb[108].mxu1 }
0x2204   : > { %v5918_v47 = vpop.f32.mrb[109].mxu1 }
0x2205   : > { %v5517_v51 = vpop.f32.mrb[108].mxu0  ;;  %v4864_v18 = vpop.f32.mrb[110].mxu1 }
0x2206   : > { %v5518_v40 = vpop.f32.mrb[109].mxu0  ;;  %v5919_v36 = vpop.f32.mrb[111].mxu1 }
0x2207   : > { %v5519_v34 = vadd.f32 %v5518_v40, %v5517_v51  ;;  %v5520_v33 = vpop.f32.mrb[110].mxu0 }
0x2208   : > { %v5521_v38 = vpop.f32.mrb[111].mxu0 }
0x2209   : > { %v4821_v52 = vadd.f32 %v5519_v34, %v5338_v46  ;;  %v5522_v25 = vadd.f32 %v5521_v38, %v5520_v33 }
0x220b   : > { %v4862_v20 = vadd.f32 %v4861_v45, %v4821_v52  ;;  %v4824_v53 = vadd.f32 %v5522_v25, %v5338_v46  ;;  %4875 = sbr.rel (%p5363_p6) target bundleno = 9045 (0x2355), region = 152 }
0x220d   : > { %v4868_v55 = vadd.f32 %v4862_v20, %v7817_v44  ;;  %v4865_v56 = vadd.f32 %v4864_v18, %v4824_v53 }
0x220f   : > { %4870 = vst.msk [vmem:[#allocation2] sm:$0xff] %vm1065_vm1, %v4868_v55  ;;  %v4869_v59 = vadd.f32 %v4865_v56, %v7819_v49 }
0x2211   : > { %4871 = vst.msk [vmem:[#allocation2 + $0x8] sm:$0xff] %vm1065_vm1, %v4869_v59 }
0x2216   : > { %v4876_v60 = vld [vmem:[#allocation2] sm:$0xff] }
0x2217   : > { %v4880_v11 = vsel %vm1065_vm1, %v4876_v60, 0.0 }
0x2218   : > { %v4877_v61 = vld [vmem:[#allocation2 + $0x8] sm:$0xff]  ;;  %4881 = vadd.xlane.f32.xlu0 %v4880_v11 }
0x2219   : > { %v4883_v62 = vsel %vm1065_vm1, %v4877_v61, 0.0 }
0x221c   : > { %4884 = vadd.xlane.f32.xlu0 %v4883_v62 }
0x22a5   : > { %v4882_v63 = vpop.xlane.xlu0 %4881 }
0x22a6   : > { %v4886_v44 = vmul.f32 0.010416667, %v4882_v63 }
0x22a8   : > { %v4888_v0 = vsub.f32 %v4876_v60, %v4886_v44 }
0x22a9   : > { %v4885_v3 = vpop.xlane.xlu0 %4884 }
0x22aa   : > { %v4887_v4 = vmul.f32 0.010416667, %v4885_v3  ;;  %v4890_v5 = vmul.f32 %v4888_v0, %v4888_v0 }
0x22ac   : > { %v4889_v49 = vsub.f32 %v4877_v61, %v4887_v4  ;;  %v4892_v7 = vsel %vm1065_vm1, %v4890_v5, 0.0 }
0x22ad   : > { %4893 = vadd.xlane.f32.xlu1 %v4892_v7 }
0x22ae   : > { %v4891_v8 = vmul.f32 %v4889_v49, %v4889_v49 }
0x22b0   : > { %v4895_v9 = vsel %vm1065_vm1, %v4891_v8, 0.0 }
0x22b1   : > { %4896 = vadd.xlane.f32.xlu1 %v4895_v9 }
0x233a   : > { %v4894_v10 = vpop.xlane.xlu1 %4893 }
0x233b   : > { %v4898_v13 = vmul.f32 0.010416667, %v4894_v10 }
0x233d   : > { %v4900_v14 = vadd.f32 1e-05, %v4898_v13 }
0x233e   : > { %v4897_v15 = vpop.xlane.xlu1 %4896 }
0x233f   : > { %6248 = vrsqrt.f32 %v4900_v14  ;;  %v4899_v16 = vmul.f32 0.010416667, %v4897_v15 }
0x2341   : > { %v4901_v17 = vadd.f32 1e-05, %v4899_v16 }
0x2343   : > { %6250 = vrsqrt.f32 %v4901_v17 }
0x2349   : > { %v6249_v19 = vpop.eup %6248 }
0x234a   : > { %v4904_v23 = vmul.f32 %v6249_v19, %v4888_v0 }
0x234c   : > { %v4912_v26 = vmul.f32 %v5364_v21, %v4904_v23 }
0x234d   : > { %v6251_v27 = vpop.eup %6250 }
0x234e   : > { %v4920_v28 = vadd.f32 %v5365_v24, %v4912_v26  ;;  %v4905_v29 = vmul.f32 %v6251_v27, %v4889_v49 }
0x2350   : > { %4922 = vst.msk [vmem:[#allocation17] sm:$0xff] %vm1065_vm1, %v4920_v28  ;;  %v4913_v30 = vmul.f32 %v5364_v21, %v4905_v29 }
0x2352   : > { %v4921_v22 = vadd.f32 %v5365_v24, %v4913_v30 }
0x2354   : > { %4923 = vst.msk [vmem:[#allocation17 + $0x8] sm:$0xff] %vm1065_vm1, %v4921_v22 }
0x2355 PF: > { %p5989_p1 = scmp.eq.s32.totalorder %s6781_s3, 11  ;;  %s6650_s9 = smov [#allocation17]  }
0x2356   : > { %s4930_s4 = sshll.u32 %s6650_s9, 4  ;;  %s4931_s4 = int_to_ptr.vmem [resolvable:$true] %s4930_s4 }
0x2357   : > { %s6548_s23 = scalar_lea.vmem %s4931_s4, 256  ;;  %p6555_p5 = scmp.lt.s32.totalorder %s4931_s4, %s4931_s4 }
0x2358   : > { %p6549_p8 = scmp.ne.s32.totalorder %s4931_s4, %s6548_s23  ;;  %p6556_p12 = scmp.lt.s32.totalorder %s6548_s23, %s6548_s23 }
0x235a   : > { %p6550_p9 = pnand %p6549_p8, %p5989_p1  ;;  %p6557_p7 = por %p6556_p12, %p6555_p5 }
0x235c   : > { %p6551_p2 = pneg %p6550_p9 }
0x235e   : > { %p6558_p10 = pnand %p6557_p7, %p6551_p2 }
0x2360   : > { %6561 = shalt.err (!%p6558_p10)
}
0x2361   : > { %s8070_s16 = sld [smem:[#allocation44_spill]] }
0x2367   : > { %s6562_s15 = scalar_lea.hbm %s8070_s16, 256 }
0x2368   : > { %p6563_p3 = scmp.ne.s32.totalorder %s8070_s16, %s6562_s15  ;;  %p6568_p13 = scmp.lt.u32.totalorder %s6562_s15, %s8070_s16 }
0x236a   : > { %p6564_p11 = pnand %p6563_p3, %p5989_p1 }
0x236c   : > { %p6565_p0 = pneg %p6564_p11 }
0x236e   : > { %p6570_p4 = pnand %p6568_p13, %p6565_p0 }
0x2370   : > { %6573 = shalt.err (!%p6570_p4)
}
0x2371   : > { %s6651_s8 = smov 128  }
0x2372   : > { %5949 = dma.vmem_to_hbm [thread:$0]  (%p5989_p1), %s4931_s4, 256, %s8070_s16, [#allocation6], %s6651_s8, %s6651_s8, %s6645_s28  }
0x2373   : > { %6603 = dma.done.wait (%p5989_p1), [#allocation6], 256  }
0x2374   : > { %6605 = vsyncadd (%p5989_p1), [#allocation6], 4294967040 }
0x2375 PF: > { %s8071_s27 = sld [smem:[#allocation23_spill]]  ;;  %s8072_s10 = sld [smem:[#allocation22_spill]] }
0x2376   : > { %s8073_s26 = sld [smem:[#allocation24_spill]]  ;;  %s8074_s2 = smov %s6612_s25 }
0x237b   : > { %p31_p6 = scmp.ge.s32.totalorder %s8071_s27, 14   ;;  %s8075_s25 = smov %s8072_s10 }
0x237d   :  { %33 = sbr.rel (!%p31_p6) target bundleno = 25 (0x19), region = 257 }
0x2384   :  { %4946 = vsyncpa [#allocation5], 1 }
0x2385   :  { %4948 = vsyncpa [#allocation5 + $0x1], 1 }
0x2386   :  { %4949 = vsyncpa [#allocation8], 1 }
0x2387   :  { %4950 = vsyncpa [#allocation6], 1 }
0x2388   :  { %4952 = vsyncpa [#allocation6 + $0x1], 1 }

</bundles_post_ra>
